<compile_context>
chip_gen: v5e
topology: v5e:2x2
jax: 0.10.0
libtpu: 0.0.40
codegen_flags: <defaults>
</compile_context>

<pallas_src>
import functools
import math

import jax
import jax.numpy as jnp
from jax import lax
from jax.experimental import pallas as pl
from jax.experimental.pallas import tpu as pltpu

SQRT2 = math.sqrt(2.0)
FEAT_DIM = 512     # seresnet18 feature width
STEM_C = 64        # stand-in stem channels per backbone
SE_R = 4           # SE reduction ratio
DEFAULT_BT = 256   # target batch tile (MXU-worthy rows for SE/proj/cls matmuls)


# ----------------------------------------------------------------------------
# Fused Pallas kernel: conv matmul -> SE(+GAP) -> proj -> cls head (one tile)
# ----------------------------------------------------------------------------
def _fused_due_head_kernel(patch_ref, conv_w_ref, conv_b_ref,
                           se_w1_ref, se_b1_ref, se_w2_ref, se_b2_ref,
                           proj_w_ref, proj_b_ref,
                           cls_w1_ref, cls_b1_ref, cls_w2_ref, cls_b2_ref,
                           feat_ref, logits_ref, *, bt, hw):
    bf16 = jnp.bfloat16

    # --- shared 3x3/s2 conv stem (both backbones along Cout = 128 lanes) + ReLU
    y = jnp.dot(patch_ref[...], conv_w_ref[...],
                preferred_element_type=jnp.float32)              # (Bt*HW, 128)
    y = jnp.maximum(y + conv_b_ref[...], 0.0)

    # --- SE + global-avg-pool fused: mean_hw(x * s) == mean_hw(x) * s
    pooled = jnp.mean(y.reshape(bt, hw, y.shape[-1]), axis=1)    # (Bt, 128)
    z = jnp.dot(pooled.astype(bf16), se_w1_ref[...],
                preferred_element_type=jnp.float32)
    z = jnp.maximum(z + se_b1_ref[...], 0.0)                     # (Bt, 32)
    s = jnp.dot(z.astype(bf16), se_w2_ref[...],
                preferred_element_type=jnp.float32)
    s = jax.nn.sigmoid(s + se_b2_ref[...])                       # (Bt, 128)
    pooled = pooled * s

    # --- per-backbone 512-d projection (block-diag -> [feat_a | feat_b]) + ReLU
    feat = jnp.dot(pooled.astype(bf16), proj_w_ref[...],
                   preferred_element_type=jnp.float32)
    feat = jnp.maximum(feat + proj_b_ref[...], 0.0)              # (Bt, 1024)
    feat_ref[...] = feat.astype(feat_ref.dtype)

    # --- cls head: Linear(1024,512) -> GELU(exact erf == nn.GELU) -> Linear
    h = jnp.dot(feat.astype(bf16), cls_w1_ref[...],
                preferred_element_type=jnp.float32) + cls_b1_ref[...]
    h = 0.5 * h * (1.0 + lax.erf(h / SQRT2))
    # TODO(synk): nn.Dropout(0.5) is identity in eval mode; training-mode
    #             dropout is not implemented.
    logits = jnp.dot(h.astype(bf16), cls_w2_ref[...],
                     preferred_element_type=jnp.float32) + cls_b2_ref[...]
    logits_ref[...] = logits.astype(logits_ref.dtype)            # (Bt, Npad)


# ----------------------------------------------------------------------------
# Wrapper: bf16 im2col (single HBM pass) + batch-tiled pallas_call
# ----------------------------------------------------------------------------
def due_head_net_forward(x_nchw, packed, num_classes=10, target_bt=DEFAULT_BT):
    bsz = x_nchw.shape[0]

    # Batch tile: multiple of 8 (f32 sublane, unmasked stores); pad batch up.
    b8 = ((bsz + 7) // 8) * 8
    bt = min(target_bt, b8)
    n_tiles = pl.cdiv(b8, bt)
    b_pad = n_tiles * bt
    if b_pad != bsz:
        x_nchw = jnp.pad(x_nchw, ((0, b_pad - bsz), (0, 0), (0, 0), (0, 0)))

    # Cast BEFORE im2col: the patch tensor is written to HBM once, in bf16.
    x_bf16 = x_nchw.astype(jnp.bfloat16)
    patches = lax.conv_general_dilated_patches(
        x_bf16, filter_shape=(3, 3), window_strides=(2, 2),
        padding=((1, 1), (1, 1)),
        dimension_numbers=("NCHW", "OIHW", "NHWC"))      # (Bp, OH, OW, Cin*9)
    _, oh, ow, k = patches.shape
    hw = oh * ow                                          # multiple of 8 here
    patches = patches.reshape(b_pad * hw, k)              # metadata-only

    n_pad = packed["cls_w2"].shape[1]                     # 128 (lane-dense)

    w_names = ("conv_w", "conv_b", "se_w1", "se_b1", "se_w2", "se_b2",
               "proj_w", "proj_b", "cls_w1", "cls_b1", "cls_w2", "cls_b2")
    w_args = [packed[n] for n in w_names]
    # Constant index_map -> weights stay VMEM-resident across grid steps.
    w_specs = [pl.BlockSpec(w.shape, lambda i: (0, 0)) for w in w_args]

    grid_spec = pltpu.PrefetchScalarGridSpec(
        num_scalar_prefetch=0,
        grid=(n_tiles,),
        in_specs=[pl.BlockSpec((bt * hw, k), lambda i: (i, 0))] + w_specs,
        out_specs=[pl.BlockSpec((bt, 2 * FEAT_DIM), lambda i: (i, 0)),
                   pl.BlockSpec((bt, n_pad), lambda i: (i, 0))],
    )

    feat, logits_pad = pl.pallas_call(
        functools.partial(_fused_due_head_kernel, bt=bt, hw=hw),
        out_shape=(
            jax.ShapeDtypeStruct((b_pad, 2 * FEAT_DIM), jnp.float32),
            jax.ShapeDtypeStruct((b_pad, n_pad), jnp.float32),
        ),
        grid_spec=grid_spec,
        compiler_params=pltpu.CompilerParams(
            # batch axis is independent -> megacore-shardable on v7x
            dimension_semantics=("parallel",),
            # safe on v7x's 64 MiB VMEM; raise toward 64-96 MiB on v5e/v6e
            # when using larger Bt.
            vmem_limit_bytes=32 * 1024 * 1024,
        ),
    )(patches, *w_args)

    logits = logits_pad[:bsz, :num_classes]
    fe_map_a = feat[:bsz, :FEAT_DIM].reshape(bsz, FEAT_DIM, 1, 1)
    fe_map_b = feat[:bsz, FEAT_DIM:].reshape(bsz, FEAT_DIM, 1, 1)
    return logits, [fe_map_a, fe_map_b]


# ----------------------------------------------------------------------------
# Parameter init (per-backbone) and packing into the fused/lane-dense layout
# ----------------------------------------------------------------------------
def _init_backbone(key, cin=3, stem_c=STEM_C, feat_dim=FEAT_DIM, se_r=SE_R):
    k = jax.random.split(key, 4)
    cr = stem_c // se_r
    f32 = jnp.float32
    return {
        "conv_w": 0.10 * jax.random.normal(k[0], (stem_c, cin, 3, 3), f32),
        "conv_b": jnp.zeros((stem_c,), f32),
        "se_w1": 0.10 * jax.random.normal(k[1], (stem_c, cr), f32),
        "se_b1": jnp.zeros((cr,), f32),
        "se_w2": 0.10 * jax.random.normal(k[2], (cr, stem_c), f32),
        "se_b2": jnp.zeros((stem_c,), f32),
        "proj_w": 0.05 * jax.random.normal(k[3], (stem_c, feat_dim), f32),
        "proj_b": jnp.zeros((feat_dim,), f32),
    }


def init_params(key, num_classes=10):
    k1, k2, k3, k4 = jax.random.split(key, 4)
    f32 = jnp.float32
    return {
        "model1": _init_backbone(k1),
        "model2": _init_backbone(k2),
        # cls = Linear(2*512, 512) -> GELU -> Dropout -> Linear(512, classes)
        "cls_w1": 0.02 * jax.random.normal(k3, (2 * FEAT_DIM, 512), f32),
        "cls_b1": jnp.zeros((512,), f32),
        "cls_w2": 0.02 * jax.random.normal(k4, (512, num_classes), f32),
        "cls_b2": jnp.zeros((num_classes,), f32),
    }


def pack_params(params, num_classes):
    """Build fused / block-diagonal bf16 weights (done once, host-side)."""
    f32, bf16 = jnp.float32, jnp.bfloat16
    m1, m2 = params["model1"], params["model2"]
    c = STEM_C
    cr = c // SE_R
    k = m1["conv_w"].shape[1] * 9                         # cin*9 = 27 (no pad)

    w = jnp.concatenate([m1["conv_w"].reshape(c, k),
                         m2["conv_w"].reshape(c, k)], axis=0)   # (128, 27)
    conv_w = w.T                                                # (27, 128)
    conv_b = jnp.concatenate([m1["conv_b"], m2["conv_b"]]).reshape(1, 2 * c)

    se_w1 = jnp.zeros((2 * c, 2 * cr), f32)
    se_w1 = se_w1.at[:c, :cr].set(m1["se_w1"]).at[c:, cr:].set(m2["se_w1"])
    se_b1 = jnp.concatenate([m1["se_b1"], m2["se_b1"]]).reshape(1, 2 * cr)
    se_w2 = jnp.zeros((2 * cr, 2 * c), f32)
    se_w2 = se_w2.at[:cr, :c].set(m1["se_w2"]).at[cr:, c:].set(m2["se_w2"])
    se_b2 = jnp.concatenate([m1["se_b2"], m2["se_b2"]]).reshape(1, 2 * c)

    proj_w = jnp.zeros((2 * c, 2 * FEAT_DIM), f32)
    proj_w = proj_w.at[:c, :FEAT_DIM].set(m1["proj_w"]).at[c:, FEAT_DIM:].set(m2["proj_w"])
    proj_b = jnp.concatenate([m1["proj_b"], m2["proj_b"]]).reshape(1, 2 * FEAT_DIM)

    n_pad = ((num_classes + 127) // 128) * 128            # lane-dense logits
    cls_w2 = jnp.zeros((512, n_pad), f32).at[:, :num_classes].set(params["cls_w2"])
    cls_b2 = jnp.zeros((1, n_pad), f32).at[:, :num_classes].set(
        params["cls_b2"].reshape(1, -1))

    return {
        "conv_w": conv_w.astype(bf16), "conv_b": conv_b.astype(f32),
        "se_w1": se_w1.astype(bf16), "se_b1": se_b1.astype(f32),
        "se_w2": se_w2.astype(bf16), "se_b2": se_b2.astype(f32),
        "proj_w": proj_w.astype(bf16), "proj_b": proj_b.astype(f32),
        "cls_w1": params["cls_w1"].astype(bf16),
        "cls_b1": params["cls_b1"].reshape(1, -1).astype(f32),
        "cls_w2": cls_w2.astype(bf16), "cls_b2": cls_b2.astype(f32),
    }


# ----------------------------------------------------------------------------
# Pure-JAX reference of the same stand-in (f32, unpacked weights) for checking
# ----------------------------------------------------------------------------
def _reference_forward(x_nchw, params):
    def backbone(p):
        patches = lax.conv_general_dilated_patches(
            x_nchw, (3, 3), (2, 2), ((1, 1), (1, 1)),
            dimension_numbers=("NCHW", "OIHW", "NHWC"))
        b, oh, ow, k = patches.shape
        pm = patches.reshape(b, oh * ow, k)
        w = p["conv_w"].reshape(p["conv_w"].shape[0], k).T
        y = jnp.maximum(jnp.einsum("bpk,kc->bpc", pm, w) + p["conv_b"], 0.0)
        pooled = jnp.mean(y, axis=1)
        z = jnp.maximum(pooled @ p["se_w1"] + p["se_b1"], 0.0)
        s = jax.nn.sigmoid(z @ p["se_w2"] + p["se_b2"])
        y = y * s[:, None, :]
        pooled = jnp.mean(y, axis=1)
        return jnp.maximum(pooled @ p["proj_w"] + p["proj_b"], 0.0)

    fa = backbone(params["model1"])
    fb = backbone(params["model2"])
    fm = jnp.concatenate([fa, fb], axis=1)
    h = fm @ params["cls_w1"] + params["cls_b1"]
    h = 0.5 * h * (1.0 + lax.erf(h / SQRT2))
    logits = h @ params["cls_w2"] + params["cls_b2"]
    return logits, fm


if __name__ == "__main__":
    key = jax.random.PRNGKey(0)
    pkey, xkey = jax.random.split(key)

    num_classes = 10
    params = init_params(pkey, num_classes=num_classes)
    packed = pack_params(params, num_classes)
    x = jax.random.normal(xkey, (2, 3, 16, 16), dtype=jnp.float32)   # NCHW

    fwd = jax.jit(functools.partial(due_head_net_forward, num_classes=num_classes))
    logits, feature_maps_list = fwd(x, packed)
    jax.block_until_ready(logits)
    jax.block_until_ready(feature_maps_list)

    assert logits.shape == (2, num_classes)
    assert len(feature_maps_list) == 2
    assert feature_maps_list[0].shape == (2, FEAT_DIM, 1, 1)
    assert feature_maps_list[1].shape == (2, FEAT_DIM, 1, 1)

    # numerical check vs pure-JAX f32 reference (bf16 matmul operands in kernel)
    ref_logits, ref_fm = _reference_forward(x, params)
    feat_cat = jnp.concatenate([feature_maps_list[0].reshape(2, -1),
                                feature_maps_list[1].reshape(2, -1)], axis=1)
    assert float(jnp.max(jnp.abs(logits - ref_logits))) < 1e-2
    assert float(jnp.max(jnp.abs(feat_cat - ref_fm))) < 5e-2

    print("KERNEL_OK")
</pallas_src>

<mosaic_0001>
module attributes {stable_mosaic.version = 11 : i64} {
  func.func @_fused_due_head_kernel(%arg0: i32, %arg1: memref<512x27xbf16, #tpu.memory_space<vmem>>, %arg2: memref<27x128xbf16, #tpu.memory_space<vmem>>, %arg3: memref<1x128xf32, #tpu.memory_space<vmem>>, %arg4: memref<128x32xbf16, #tpu.memory_space<vmem>>, %arg5: memref<1x32xf32, #tpu.memory_space<vmem>>, %arg6: memref<32x128xbf16, #tpu.memory_space<vmem>>, %arg7: memref<1x128xf32, #tpu.memory_space<vmem>>, %arg8: memref<128x1024xbf16, #tpu.memory_space<vmem>>, %arg9: memref<1x1024xf32, #tpu.memory_space<vmem>>, %arg10: memref<1024x512xbf16, #tpu.memory_space<vmem>>, %arg11: memref<1x512xf32, #tpu.memory_space<vmem>>, %arg12: memref<512x128xbf16, #tpu.memory_space<vmem>>, %arg13: memref<1x128xf32, #tpu.memory_space<vmem>>, %arg14: memref<8x1024xf32, #tpu.memory_space<vmem>>, %arg15: memref<8x128xf32, #tpu.memory_space<vmem>>) attributes {dimension_semantics = [#tpu.dimension_semantics<parallel>], iteration_bounds = array<i64: 1>, scalar_prefetch = 0 : i64, scratch_operands = 0 : i64, tpu.core_type = #tpu.core_type<tc>, window_params = [{transform_indices = @transform_0, window_bounds = array<i64: 512, 27>}, {pipeline_mode = #tpu.pipeline_mode<synchronous>, transform_indices = @transform_1, window_bounds = array<i64: 27, 128>}, {pipeline_mode = #tpu.pipeline_mode<synchronous>, transform_indices = @transform_2, window_bounds = array<i64: 1, 128>}, {pipeline_mode = #tpu.pipeline_mode<synchronous>, transform_indices = @transform_3, window_bounds = array<i64: 128, 32>}, {pipeline_mode = #tpu.pipeline_mode<synchronous>, transform_indices = @transform_4, window_bounds = array<i64: 1, 32>}, {pipeline_mode = #tpu.pipeline_mode<synchronous>, transform_indices = @transform_5, window_bounds = array<i64: 32, 128>}, {pipeline_mode = #tpu.pipeline_mode<synchronous>, transform_indices = @transform_6, window_bounds = array<i64: 1, 128>}, {pipeline_mode = #tpu.pipeline_mode<synchronous>, transform_indices = @transform_7, window_bounds = array<i64: 128, 1024>}, {pipeline_mode = #tpu.pipeline_mode<synchronous>, transform_indices = @transform_8, window_bounds = array<i64: 1, 1024>}, {pipeline_mode = #tpu.pipeline_mode<synchronous>, transform_indices = @transform_9, window_bounds = array<i64: 1024, 512>}, {pipeline_mode = #tpu.pipeline_mode<synchronous>, transform_indices = @transform_10, window_bounds = array<i64: 1, 512>}, {pipeline_mode = #tpu.pipeline_mode<synchronous>, transform_indices = @transform_11, window_bounds = array<i64: 512, 128>}, {pipeline_mode = #tpu.pipeline_mode<synchronous>, transform_indices = @transform_12, window_bounds = array<i64: 1, 128>}, {transform_indices = @transform_13, window_bounds = array<i64: 8, 1024>}, {transform_indices = @transform_14, window_bounds = array<i64: 8, 128>}]} {
    %c0 = arith.constant 0 : index
    %c0_0 = arith.constant 0 : index
    %0 = vector.load %arg1[%c0, %c0_0] : memref<512x27xbf16, #tpu.memory_space<vmem>>, vector<512x27xbf16>
    %c0_1 = arith.constant 0 : index
    %c0_2 = arith.constant 0 : index
    %1 = vector.load %arg2[%c0_1, %c0_2] : memref<27x128xbf16, #tpu.memory_space<vmem>>, vector<27x128xbf16>
    %cst = arith.constant dense<0.000000e+00> : vector<512x128xf32>
    %2 = tpu.matmul %0, %1, %cst {dimension_numbers = #tpu.dot_dimension_numbers<[1], [0], [0], [1], [0, 0, 1, 1], [], []>} : vector<512x27xbf16>, vector<27x128xbf16>, vector<512x128xf32> -> vector<512x128xf32>
    %c0_3 = arith.constant 0 : index
    %c0_4 = arith.constant 0 : index
    %3 = vector.load %arg3[%c0_3, %c0_4] : memref<1x128xf32, #tpu.memory_space<vmem>>, vector<1x128xf32>
    %4 = vector.broadcast %3 : vector<1x128xf32> to vector<512x128xf32>
    %5 = arith.addf %2, %4 : vector<512x128xf32>
    %cst_5 = arith.constant 0.000000e+00 : f32
    %6 = vector.broadcast %cst_5 : f32 to vector<512x128xf32>
    %7 = arith.maximumf %5, %6 : vector<512x128xf32>
    %8 = vector.shape_cast %7 : vector<512x128xf32> to vector<8x64x128xf32>
    %cst_6 = arith.constant dense<0.000000e+00> : vector<8x128xf32>
    %9 = vector.multi_reduction <add>, %8, %cst_6 [1] : vector<8x64x128xf32> to vector<8x128xf32>
    %cst_7 = arith.constant 6.400000e+01 : f32
    %10 = vector.broadcast %cst_7 : f32 to vector<8x128xf32>
    %11 = arith.divf %9, %10 : vector<8x128xf32>
    %12 = arith.truncf %11 : vector<8x128xf32> to vector<8x128xbf16>
    %c0_8 = arith.constant 0 : index
    %c0_9 = arith.constant 0 : index
    %13 = vector.load %arg4[%c0_8, %c0_9] : memref<128x32xbf16, #tpu.memory_space<vmem>>, vector<128x32xbf16>
    %cst_10 = arith.constant dense<0.000000e+00> : vector<8x32xf32>
    %14 = tpu.matmul %12, %13, %cst_10 {dimension_numbers = #tpu.dot_dimension_numbers<[1], [0], [0], [1], [0, 0, 1, 1], [], []>} : vector<8x128xbf16>, vector<128x32xbf16>, vector<8x32xf32> -> vector<8x32xf32>
    %c0_11 = arith.constant 0 : index
    %c0_12 = arith.constant 0 : index
    %15 = vector.load %arg5[%c0_11, %c0_12] : memref<1x32xf32, #tpu.memory_space<vmem>>, vector<1x32xf32>
    %16 = vector.broadcast %15 : vector<1x32xf32> to vector<8x32xf32>
    %17 = arith.addf %14, %16 : vector<8x32xf32>
    %cst_13 = arith.constant 0.000000e+00 : f32
    %18 = vector.broadcast %cst_13 : f32 to vector<8x32xf32>
    %19 = arith.maximumf %17, %18 : vector<8x32xf32>
    %20 = arith.truncf %19 : vector<8x32xf32> to vector<8x32xbf16>
    %c0_14 = arith.constant 0 : index
    %c0_15 = arith.constant 0 : index
    %21 = vector.load %arg6[%c0_14, %c0_15] : memref<32x128xbf16, #tpu.memory_space<vmem>>, vector<32x128xbf16>
    %cst_16 = arith.constant dense<0.000000e+00> : vector<8x128xf32>
    %22 = tpu.matmul %20, %21, %cst_16 {dimension_numbers = #tpu.dot_dimension_numbers<[1], [0], [0], [1], [0, 0, 1, 1], [], []>} : vector<8x32xbf16>, vector<32x128xbf16>, vector<8x128xf32> -> vector<8x128xf32>
    %c0_17 = arith.constant 0 : index
    %c0_18 = arith.constant 0 : index
    %23 = vector.load %arg7[%c0_17, %c0_18] : memref<1x128xf32, #tpu.memory_space<vmem>>, vector<1x128xf32>
    %24 = vector.broadcast %23 : vector<1x128xf32> to vector<8x128xf32>
    %25 = arith.addf %22, %24 : vector<8x128xf32>
    %26 = arith.negf %25 : vector<8x128xf32>
    %27 = math.exp %26 : vector<8x128xf32>
    %cst_19 = arith.constant 1.000000e+00 : f32
    %28 = vector.broadcast %cst_19 : f32 to vector<8x128xf32>
    %29 = arith.addf %28, %27 : vector<8x128xf32>
    %30 = arith.divf %28, %29 : vector<8x128xf32>
    %31 = arith.mulf %11, %30 : vector<8x128xf32>
    %32 = arith.truncf %31 : vector<8x128xf32> to vector<8x128xbf16>
    %c0_20 = arith.constant 0 : index
    %c0_21 = arith.constant 0 : index
    %33 = vector.load %arg8[%c0_20, %c0_21] : memref<128x1024xbf16, #tpu.memory_space<vmem>>, vector<128x1024xbf16>
    %cst_22 = arith.constant dense<0.000000e+00> : vector<8x1024xf32>
    %34 = tpu.matmul %32, %33, %cst_22 {dimension_numbers = #tpu.dot_dimension_numbers<[1], [0], [0], [1], [0, 0, 1, 1], [], []>} : vector<8x128xbf16>, vector<128x1024xbf16>, vector<8x1024xf32> -> vector<8x1024xf32>
    %c0_23 = arith.constant 0 : index
    %c0_24 = arith.constant 0 : index
    %35 = vector.load %arg9[%c0_23, %c0_24] : memref<1x1024xf32, #tpu.memory_space<vmem>>, vector<1x1024xf32>
    %36 = vector.broadcast %35 : vector<1x1024xf32> to vector<8x1024xf32>
    %37 = arith.addf %34, %36 : vector<8x1024xf32>
    %cst_25 = arith.constant 0.000000e+00 : f32
    %38 = vector.broadcast %cst_25 : f32 to vector<8x1024xf32>
    %39 = arith.maximumf %37, %38 : vector<8x1024xf32>
    %c0_26 = arith.constant 0 : index
    %c0_27 = arith.constant 0 : index
    %40 = vector.load %arg14[%c0_26, %c0_27] : memref<8x1024xf32, #tpu.memory_space<vmem>>, vector<8x1024xf32>
    tpu.vector_store %arg14[%c0_26, %c0_27], %39 {strides = array<i32>} : memref<8x1024xf32, #tpu.memory_space<vmem>>, vector<8x1024xf32>,
    %41 = arith.truncf %39 : vector<8x1024xf32> to vector<8x1024xbf16>
    %c0_28 = arith.constant 0 : index
    %c0_29 = arith.constant 0 : index
    %42 = vector.load %arg10[%c0_28, %c0_29] : memref<1024x512xbf16, #tpu.memory_space<vmem>>, vector<1024x512xbf16>
    %cst_30 = arith.constant dense<0.000000e+00> : vector<8x512xf32>
    %43 = tpu.matmul %41, %42, %cst_30 {dimension_numbers = #tpu.dot_dimension_numbers<[1], [0], [0], [1], [0, 0, 1, 1], [], []>} : vector<8x1024xbf16>, vector<1024x512xbf16>, vector<8x512xf32> -> vector<8x512xf32>
    %c0_31 = arith.constant 0 : index
    %c0_32 = arith.constant 0 : index
    %44 = vector.load %arg11[%c0_31, %c0_32] : memref<1x512xf32, #tpu.memory_space<vmem>>, vector<1x512xf32>
    %45 = vector.broadcast %44 : vector<1x512xf32> to vector<8x512xf32>
    %46 = arith.addf %43, %45 : vector<8x512xf32>
    %cst_33 = arith.constant 5.000000e-01 : f32
    %47 = vector.broadcast %cst_33 : f32 to vector<8x512xf32>
    %48 = arith.mulf %47, %46 : vector<8x512xf32>
    %cst_34 = arith.constant 1.41421354 : f32
    %49 = vector.broadcast %cst_34 : f32 to vector<8x512xf32>
    %50 = arith.divf %46, %49 : vector<8x512xf32>
    %51 = math.erf %50 : vector<8x512xf32>
    %cst_35 = arith.constant 1.000000e+00 : f32
    %52 = vector.broadcast %cst_35 : f32 to vector<8x512xf32>
    %53 = arith.addf %52, %51 : vector<8x512xf32>
    %54 = arith.mulf %48, %53 : vector<8x512xf32>
    %55 = arith.truncf %54 : vector<8x512xf32> to vector<8x512xbf16>
    %c0_36 = arith.constant 0 : index
    %c0_37 = arith.constant 0 : index
    %56 = vector.load %arg12[%c0_36, %c0_37] : memref<512x128xbf16, #tpu.memory_space<vmem>>, vector<512x128xbf16>
    %cst_38 = arith.constant dense<0.000000e+00> : vector<8x128xf32>
    %57 = tpu.matmul %55, %56, %cst_38 {dimension_numbers = #tpu.dot_dimension_numbers<[1], [0], [0], [1], [0, 0, 1, 1], [], []>} : vector<8x512xbf16>, vector<512x128xbf16>, vector<8x128xf32> -> vector<8x128xf32>
    %c0_39 = arith.constant 0 : index
    %c0_40 = arith.constant 0 : index
    %58 = vector.load %arg13[%c0_39, %c0_40] : memref<1x128xf32, #tpu.memory_space<vmem>>, vector<1x128xf32>
    %59 = vector.broadcast %58 : vector<1x128xf32> to vector<8x128xf32>
    %60 = arith.addf %57, %59 : vector<8x128xf32>
    %c0_41 = arith.constant 0 : index
    %c0_42 = arith.constant 0 : index
    %61 = vector.load %arg15[%c0_41, %c0_42] : memref<8x128xf32, #tpu.memory_space<vmem>>, vector<8x128xf32>
    tpu.vector_store %arg15[%c0_41, %c0_42], %60 {strides = array<i32>} : memref<8x128xf32, #tpu.memory_space<vmem>>, vector<8x128xf32>,
    return
  }
  func.func @transform_0(%arg0: i32) -> (i32, i32) {
    %c0_i32 = arith.constant 0 : i32
    %c0_i32_0 = arith.constant 0 : i32
    return %arg0, %c0_i32 : i32, i32
  }
  func.func @transform_1(%arg0: i32) -> (i32, i32) {
    %c0_i32 = arith.constant 0 : i32
    %c0_i32_0 = arith.constant 0 : i32
    %c0_i32_1 = arith.constant 0 : i32
    return %c0_i32, %c0_i32_0 : i32, i32
  }
  func.func @transform_2(%arg0: i32) -> (i32, i32) {
    %c0_i32 = arith.constant 0 : i32
    %c0_i32_0 = arith.constant 0 : i32
    %c0_i32_1 = arith.constant 0 : i32
    return %c0_i32, %c0_i32_0 : i32, i32
  }
  func.func @transform_3(%arg0: i32) -> (i32, i32) {
    %c0_i32 = arith.constant 0 : i32
    %c0_i32_0 = arith.constant 0 : i32
    %c0_i32_1 = arith.constant 0 : i32
    return %c0_i32, %c0_i32_0 : i32, i32
  }
  func.func @transform_4(%arg0: i32) -> (i32, i32) {
    %c0_i32 = arith.constant 0 : i32
    %c0_i32_0 = arith.constant 0 : i32
    %c0_i32_1 = arith.constant 0 : i32
    return %c0_i32, %c0_i32_0 : i32, i32
  }
  func.func @transform_5(%arg0: i32) -> (i32, i32) {
    %c0_i32 = arith.constant 0 : i32
    %c0_i32_0 = arith.constant 0 : i32
    %c0_i32_1 = arith.constant 0 : i32
    return %c0_i32, %c0_i32_0 : i32, i32
  }
  func.func @transform_6(%arg0: i32) -> (i32, i32) {
    %c0_i32 = arith.constant 0 : i32
    %c0_i32_0 = arith.constant 0 : i32
    %c0_i32_1 = arith.constant 0 : i32
    return %c0_i32, %c0_i32_0 : i32, i32
  }
  func.func @transform_7(%arg0: i32) -> (i32, i32) {
    %c0_i32 = arith.constant 0 : i32
    %c0_i32_0 = arith.constant 0 : i32
    %c0_i32_1 = arith.constant 0 : i32
    return %c0_i32, %c0_i32_0 : i32, i32
  }
  func.func @transform_8(%arg0: i32) -> (i32, i32) {
    %c0_i32 = arith.constant 0 : i32
    %c0_i32_0 = arith.constant 0 : i32
    %c0_i32_1 = arith.constant 0 : i32
    return %c0_i32, %c0_i32_0 : i32, i32
  }
  func.func @transform_9(%arg0: i32) -> (i32, i32) {
    %c0_i32 = arith.constant 0 : i32
    %c0_i32_0 = arith.constant 0 : i32
    %c0_i32_1 = arith.constant 0 : i32
    return %c0_i32, %c0_i32_0 : i32, i32
  }
  func.func @transform_10(%arg0: i32) -> (i32, i32) {
    %c0_i32 = arith.constant 0 : i32
    %c0_i32_0 = arith.constant 0 : i32
    %c0_i32_1 = arith.constant 0 : i32
    return %c0_i32, %c0_i32_0 : i32, i32
  }
  func.func @transform_11(%arg0: i32) -> (i32, i32) {
    %c0_i32 = arith.constant 0 : i32
    %c0_i32_0 = arith.constant 0 : i32
    %c0_i32_1 = arith.constant 0 : i32
    return %c0_i32, %c0_i32_0 : i32, i32
  }
  func.func @transform_12(%arg0: i32) -> (i32, i32) {
    %c0_i32 = arith.constant 0 : i32
    %c0_i32_0 = arith.constant 0 : i32
    %c0_i32_1 = arith.constant 0 : i32
    return %c0_i32, %c0_i32_0 : i32, i32
  }
  func.func @transform_13(%arg0: i32) -> (i32, i32) {
    %c0_i32 = arith.constant 0 : i32
    %c0_i32_0 = arith.constant 0 : i32
    return %arg0, %c0_i32 : i32, i32
  }
  func.func @transform_14(%arg0: i32) -> (i32, i32) {
    %c0_i32 = arith.constant 0 : i32
    %c0_i32_0 = arith.constant 0 : i32
    return %arg0, %c0_i32 : i32, i32
  }
}

</mosaic_0001>

<bundles_post_ra>
// kernel: due_head_net_forward.1
= control target key start
LH: loop header
LB: loop body
LE: loop exit
PB: predicated region body
PF: predicated region fallthrough
CT: control target
= control target key end

     0   :  { %20 = vsyncpa [#allocation3], 0  ;;  %s6077_s16 = smov [#allocation2]   ;;  %s6078_s18 = smov 256   ;;  %s7179_s0 = inlined_call_operand.vmem [shape: bf16[512,27], index: 0, kind: input, shape index: {}]   ;;  %s7180_s1 = inlined_call_operand.vmem [shape: bf16[27,128], index: 1, kind: input, shape index: {}]   ;;  %s7181_s2 = inlined_call_operand.vmem [shape: f32[1,128], index: 2, kind: input, shape index: {}]   ;;  %s7182_s3 = inlined_call_operand.vmem [shape: bf16[128,32], index: 3, kind: input, shape index: {}]   ;;  %s7183_s4 = inlined_call_operand.vmem [shape: f32[1,32], index: 4, kind: input, shape index: {}]   ;;  %s7184_s5 = inlined_call_operand.vmem [shape: bf16[32,128], index: 5, kind: input, shape index: {}]   ;;  %s7185_s6 = inlined_call_operand.vmem [shape: f32[1,128], index: 6, kind: input, shape index: {}]   ;;  %s7186_s7 = inlined_call_operand.vmem [shape: bf16[128,1024], index: 7, kind: input, shape index: {}]   ;;  %s7187_s8 = inlined_call_operand.vmem [shape: f32[1,1024], index: 8, kind: input, shape index: {}]   ;;  %s7188_s9 = inlined_call_operand.hbm [shape: bf16[1024,512], index: 9, kind: input, shape index: {}]   ;;  %s7189_s10 = inlined_call_operand.vmem [shape: f32[1,512], index: 10, kind: input, shape index: {}]   ;;  %s7190_s11 = inlined_call_operand.vmem [shape: bf16[512,128], index: 11, kind: input, shape index: {}]   ;;  %s7191_s12 = inlined_call_operand.vmem [shape: f32[1,128], index: 12, kind: input, shape index: {}]   ;;  %s7192_s13 = inlined_call_operand.vmem [shape: f32[8,1024], index: 13, kind: output, shape index: {0}]   ;;  %s7193_s14 = inlined_call_operand.vmem [shape: f32[8,128], index: 14, kind: output, shape index: {1}]  }
   0x1   :  { %s43_s15 = sshll.u32 %s7188_s9, 4  ;;  %s45_s17 = sshll.u32 %s6077_s16, 4  ;;  %s44_s15 = int_to_ptr.hbm [resolvable:$true] %s43_s15  ;;  %s46_s17 = int_to_ptr.vmem [resolvable:$true] %s45_s17 }
   0x2   :  { %s6079_s19 = smov 16  }
   0x3   :  { %51 = dma.hbm_to_vmem [thread:$0]  %s44_s15, 32768, %s46_s17, [#allocation3], %s6078_s18, %s6078_s18, %s6079_s19  }
   0x4   :  { %6075 = dma.done.wait [#allocation3], 32768  }
   0x5   :  { %6076 = vsyncadd [#allocation3], 4294934528  ;;  %vm403_vm0 = vcmask 1044480   ;;  %vm404_vm1 = vcmask 1045504   ;;  %v6080_v0 = vmov 65535   ;;  %v5660_v7 = vld [vmem:[%s7180_s1] sm:$0xff] }
   0x6   :  { %v405_v1 = vsel %vm403_vm0, 4294967295, %v6080_v0  ;;  %v4140_v2 = vld [vmem:[%s7180_s1 + $0x8] sm:$0xf]  ;;  %v5661_v3 = vld [vmem:[%s7180_s1 + $0x8] sm:$0x30]  ;;  %v5628_v8 = vld [vmem:[%s7179_s0] sm:$0xff] }
   0x7   :  { %v406_v4 = vsel %vm404_vm1, %v405_v1, 0  ;;  %v4141_v5 = vor.u32 %v5661_v3, %v4140_v2  ;;  %vm306_vm2 = vcmask 220160   ;;  %v5629_v9 = vld [vmem:[%s7179_s0 + $0x8] sm:$0xff]  ;;  %v5630_v10 = vld [vmem:[%s7179_s0 + $0x10] sm:$0xff]  ;;  %v5631_v11 = vld [vmem:[%s7179_s0 + $0x18] sm:$0xff]  ;;  %vm806_vm4 = vcmask 1041409  }
   0x8   :  { %v5632_v12 = vld [vmem:[%s7179_s0 + $0x20] sm:$0xff]  ;;  %v5633_v13 = vld [vmem:[%s7179_s0 + $0x28] sm:$0xff]  ;;  %v5634_v14 = vld [vmem:[%s7179_s0 + $0x30] sm:$0xff]  ;;  %vm808_vm5 = vcmask 1042434   ;;  %vm810_vm6 = vcmask 1043459   ;;  %vm812_vm7 = vcmask 1044484  }
   0x9   :  { %v408_v6 = vand.u32 %v4141_v5, %v406_v4  ;;  %v5635_v15 = vld [vmem:[%s7179_s0 + $0x38] sm:$0xff]  ;;  %v5636_v16 = vld [vmem:[%s7179_s0 + $0x40] sm:$0xff]  ;;  %v5637_v25 = vld [vmem:[%s7179_s0 + $0x48] sm:$0xff]  ;;  %vm814_vm8 = vcmask 1045509   ;;  %vm816_vm9 = vcmask 1046534   ;;  %vm818_vm10 = vcmask 1047559  }
   0xa   :  { %v6208_v18 = vld [vmem:[%s7181_s2] ss:$0 sm:$0xff]  ;;  %v5638_v34 = vld [vmem:[%s7179_s0 + $0x50] sm:$0xff]  ;;  %v5639_v43 = vld [vmem:[%s7179_s0 + $0x58] sm:$0xff]  ;;  %vm905_vm11 = vcmask 261120  }
   0xb   :  { %416 = vmatpush.bf16.msra.mxu0 %v408_v6  ;;  %v5640_v52 = vld [vmem:[%s7179_s0 + $0x60] sm:$0xff]  ;;  %v5641_v60 = vld [vmem:[%s7179_s0 + $0x68] sm:$0xff]  ;;  %v5642_v5 = vld [vmem:[%s7179_s0 + $0x70] sm:$0xff] }
   0xf   :  { %417 = vmatpush.bf16.msra.mxu0 %v5660_v7 }
  0x12   :  { %4142 = vmatmul.msk.bf16.vlgmr.msra.gmra.mxu0 %vm306_vm2, %v5628_v8 }
  0x22   :  { %4143 = vmatmul.msk.bf16.gmra.mxu0 %vm306_vm2, %v5629_v9 }
  0x32   :  { %4144 = vmatmul.msk.bf16.gmra.mxu0 %vm306_vm2, %v5630_v10 }
  0x42   :  { %4145 = vmatmul.msk.bf16.gmra.mxu0 %vm306_vm2, %v5631_v11 }
  0x52   :  { %4146 = vmatmul.msk.bf16.gmra.mxu0 %vm306_vm2, %v5632_v12 }
  0x62   :  { %4147 = vmatmul.msk.bf16.gmra.mxu0 %vm306_vm2, %v5633_v13 }
  0x72   :  { %4148 = vmatmul.msk.bf16.gmra.mxu0 %vm306_vm2, %v5634_v14  ;;  %v5643_v14 = vld [vmem:[%s7179_s0 + $0x78] sm:$0xff] }
  0x82   :  { %4149 = vmatmul.msk.bf16.gmra.mxu0 %vm306_vm2, %v5635_v15 }
  0x8f   :  { %v419_v17 = vpop.f32.mrf.mxu0 }
  0x90   :  { %v420_v19 = vadd.f32 %v6208_v18, %v419_v17 }
  0x92   :  { %4150 = vmatmul.msk.bf16.gmra.mxu0 %vm306_vm2, %v5636_v16  ;;  %v579_v22 = vmax.f32 %v420_v19, 0.0 }
  0x97   :  { %v421_v20 = vpop.f32.mrf.mxu0 }
  0x98   :  { %v422_v21 = vadd.f32 %v6208_v18, %v421_v20 }
  0x9a   :  { %v580_v23 = vmax.f32 %v422_v21, 0.0 }
  0x9c   :  { %v643_v24 = vadd.f32 %v580_v23, %v579_v22 }
  0x9f   :  { %v424_v26 = vpop.f32.mrf.mxu0 }
  0xa0   :  { %v425_v27 = vadd.f32 %v6208_v18, %v424_v26 }
  0xa2   :  { %v581_v28 = vmax.f32 %v425_v27, 0.0  ;;  %4151 = vmatmul.msk.bf16.gmra.mxu0 %vm306_vm2, %v5637_v25 }
  0xa4   :  { %v644_v29 = vadd.f32 %v643_v24, %v581_v28  ;;  %v5644_v24 = vld [vmem:[%s7179_s0 + $0x80] sm:$0xff] }
  0xa7   :  { %v426_v30 = vpop.f32.mrf.mxu0 }
  0xa8   :  { %v427_v31 = vadd.f32 %v6208_v18, %v426_v30 }
  0xaa   :  { %v582_v32 = vmax.f32 %v427_v31, 0.0 }
  0xac   :  { %v645_v33 = vadd.f32 %v644_v29, %v582_v32  ;;  %v5645_v32 = vld [vmem:[%s7179_s0 + $0x88] sm:$0xff] }
  0xaf   :  { %v429_v35 = vpop.f32.mrf.mxu0 }
  0xb0   :  { %v430_v36 = vadd.f32 %v6208_v18, %v429_v35 }
  0xb2   :  { %v583_v37 = vmax.f32 %v430_v36, 0.0  ;;  %4152 = vmatmul.msk.bf16.gmra.mxu0 %vm306_vm2, %v5638_v34 }
  0xb4   :  { %v646_v38 = vadd.f32 %v645_v33, %v583_v37 }
  0xb7   :  { %v431_v39 = vpop.f32.mrf.mxu0 }
  0xb8   :  { %v432_v40 = vadd.f32 %v6208_v18, %v431_v39 }
  0xba   :  { %v584_v41 = vmax.f32 %v432_v40, 0.0 }
  0xbc   :  { %v647_v42 = vadd.f32 %v646_v38, %v584_v41  ;;  %v5646_v41 = vld [vmem:[%s7179_s0 + $0x90] sm:$0xff] }
  0xbf   :  { %v434_v44 = vpop.f32.mrf.mxu0 }
  0xc0   :  { %v435_v45 = vadd.f32 %v6208_v18, %v434_v44 }
  0xc2   :  { %v585_v46 = vmax.f32 %v435_v45, 0.0  ;;  %4153 = vmatmul.msk.bf16.gmra.mxu0 %vm306_vm2, %v5639_v43 }
  0xc4   :  { %v648_v47 = vadd.f32 %v647_v42, %v585_v46 }
  0xc7   :  { %v436_v48 = vpop.f32.mrf.mxu0 }
  0xc8   :  { %v437_v49 = vadd.f32 %v6208_v18, %v436_v48 }
  0xca   :  { %v586_v50 = vmax.f32 %v437_v49, 0.0 }
  0xcc   :  { %v6231_v51 = vadd.f32 %v648_v47, %v586_v50  ;;  %v5647_v50 = vld [vmem:[%s7179_s0 + $0x98] sm:$0xff] }
  0xcf   :  { %v439_v53 = vpop.f32.mrf.mxu0 }
  0xd0   :  { %v440_v54 = vadd.f32 %v6208_v18, %v439_v53 }
  0xd2   :  { %4154 = vmatmul.msk.bf16.gmra.mxu0 %vm306_vm2, %v5640_v52  ;;  %v587_v57 = vmax.f32 %v440_v54, 0.0 }
  0xd7   :  { %v441_v55 = vpop.f32.mrf.mxu0 }
  0xd8   :  { %v442_v56 = vadd.f32 %v6208_v18, %v441_v55 }
  0xda   :  { %v588_v58 = vmax.f32 %v442_v56, 0.0 }
  0xdc   :  { %v656_v59 = vadd.f32 %v588_v58, %v587_v57 }
  0xdf   :  { %v444_v61 = vpop.f32.mrf.mxu0 }
  0xe0   :  { %v445_v62 = vadd.f32 %v6208_v18, %v444_v61 }
  0xe2   :  { %v589_v63 = vmax.f32 %v445_v62, 0.0  ;;  %4155 = vmatmul.msk.bf16.gmra.mxu0 %vm306_vm2, %v5641_v60  ;;  %v5648_v60 = vld [vmem:[%s7179_s0 + $0xa0] sm:$0xff] }
  0xe4   :  { %v657_v0 = vadd.f32 %v656_v59, %v589_v63 }
  0xe7   :  { %v446_v1 = vpop.f32.mrf.mxu0 }
  0xe8   :  { %v447_v2 = vadd.f32 %v6208_v18, %v446_v1 }
  0xea   :  { %v590_v3 = vmax.f32 %v447_v2, 0.0 }
  0xec   :  { %v658_v4 = vadd.f32 %v657_v0, %v590_v3 }
  0xef   :  { %v449_v6 = vpop.f32.mrf.mxu0 }
  0xf0   :  { %v450_v7 = vadd.f32 %v6208_v18, %v449_v6 }
  0xf2   :  { %v591_v8 = vmax.f32 %v450_v7, 0.0  ;;  %4156 = vmatmul.msk.bf16.gmra.mxu0 %vm306_vm2, %v5642_v5 }
  0xf4   :  { %v659_v9 = vadd.f32 %v658_v4, %v591_v8  ;;  %v5649_v4 = vld [vmem:[%s7179_s0 + $0xa8] sm:$0xff] }
  0xf7   :  { %v451_v10 = vpop.f32.mrf.mxu0 }
  0xf8   :  { %v452_v11 = vadd.f32 %v6208_v18, %v451_v10 }
  0xfa   :  { %v592_v12 = vmax.f32 %v452_v11, 0.0 }
  0xfc   :  { %v660_v13 = vadd.f32 %v659_v9, %v592_v12 }
  0xff   :  { %v454_v15 = vpop.f32.mrf.mxu0 }
 0x100   :  { %v455_v16 = vadd.f32 %v6208_v18, %v454_v15 }
 0x102   :  { %v593_v17 = vmax.f32 %v455_v16, 0.0  ;;  %4157 = vmatmul.msk.bf16.gmra.mxu0 %vm306_vm2, %v5643_v14 }
 0x104   :  { %v661_v19 = vadd.f32 %v660_v13, %v593_v17  ;;  %v5650_v13 = vld [vmem:[%s7179_s0 + $0xb0] sm:$0xff] }
 0x107   :  { %v456_v20 = vpop.f32.mrf.mxu0 }
 0x108   :  { %v457_v21 = vadd.f32 %v6208_v18, %v456_v20 }
 0x10a   :  { %v594_v22 = vmax.f32 %v457_v21, 0.0 }
 0x10c   :  { %v6257_v23 = vadd.f32 %v661_v19, %v594_v22 }
 0x10f   :  { %v459_v25 = vpop.f32.mrf.mxu0 }
 0x110   :  { %v460_v26 = vadd.f32 %v6208_v18, %v459_v25 }
 0x112   :  { %4158 = vmatmul.msk.bf16.gmra.mxu0 %vm306_vm2, %v5644_v24  ;;  %v595_v29 = vmax.f32 %v460_v26, 0.0  ;;  %v5651_v24 = vld [vmem:[%s7179_s0 + $0xb8] sm:$0xff] }
 0x117   :  { %v461_v27 = vpop.f32.mrf.mxu0 }
 0x118   :  { %v462_v28 = vadd.f32 %v6208_v18, %v461_v27 }
 0x11a   :  { %v596_v30 = vmax.f32 %v462_v28, 0.0 }
 0x11c   :  { %v669_v31 = vadd.f32 %v596_v30, %v595_v29 }
 0x11f   :  { %v464_v33 = vpop.f32.mrf.mxu0 }
 0x120   :  { %v465_v34 = vadd.f32 %v6208_v18, %v464_v33  ;;  %v5652_v33 = vld [vmem:[%s7179_s0 + $0xc0] sm:$0xff] }
 0x122   :  { %v597_v35 = vmax.f32 %v465_v34, 0.0  ;;  %4159 = vmatmul.msk.bf16.gmra.mxu0 %vm306_vm2, %v5645_v32 }
 0x124   :  { %v670_v36 = vadd.f32 %v669_v31, %v597_v35 }
 0x127   :  { %v466_v37 = vpop.f32.mrf.mxu0 }
 0x128   :  { %v467_v38 = vadd.f32 %v6208_v18, %v466_v37 }
 0x12a   :  { %v598_v39 = vmax.f32 %v467_v38, 0.0 }
 0x12c   :  { %v671_v40 = vadd.f32 %v670_v36, %v598_v39 }
 0x12f   :  { %v469_v42 = vpop.f32.mrf.mxu0 }
 0x130   :  { %v470_v43 = vadd.f32 %v6208_v18, %v469_v42 }
 0x132   :  { %v599_v44 = vmax.f32 %v470_v43, 0.0  ;;  %4160 = vmatmul.msk.bf16.gmra.mxu0 %vm306_vm2, %v5646_v41  ;;  %v5653_v41 = vld [vmem:[%s7179_s0 + $0xc8] sm:$0xff] }
 0x134   :  { %v672_v45 = vadd.f32 %v671_v40, %v599_v44 }
 0x137   :  { %v471_v46 = vpop.f32.mrf.mxu0 }
 0x138   :  { %v472_v47 = vadd.f32 %v6208_v18, %v471_v46 }
 0x13a   :  { %v600_v48 = vmax.f32 %v472_v47, 0.0 }
 0x13c   :  { %v673_v49 = vadd.f32 %v672_v45, %v600_v48 }
 0x13f   :  { %v474_v52 = vpop.f32.mrf.mxu0 }
 0x140   :  { %v475_v53 = vadd.f32 %v6208_v18, %v474_v52 }
 0x142   :  { %v601_v54 = vmax.f32 %v475_v53, 0.0  ;;  %4161 = vmatmul.msk.bf16.gmra.mxu0 %vm306_vm2, %v5647_v50  ;;  %v5654_v50 = vld [vmem:[%s7179_s0 + $0xd0] sm:$0xff] }
 0x144   :  { %v674_v55 = vadd.f32 %v673_v49, %v601_v54 }
 0x147   :  { %v476_v56 = vpop.f32.mrf.mxu0 }
 0x148   :  { %v477_v57 = vadd.f32 %v6208_v18, %v476_v56 }
 0x14a   :  { %v602_v58 = vmax.f32 %v477_v57, 0.0 }
 0x14c   :  { %v6283_v59 = vadd.f32 %v674_v55, %v602_v58 }
 0x14f   :  { %v479_v61 = vpop.f32.mrf.mxu0 }
 0x150   :  { %v480_v62 = vadd.f32 %v6208_v18, %v479_v61  ;;  %v5655_v61 = vld [vmem:[%s7179_s0 + $0xd8] sm:$0xff] }
 0x152   :  { %4162 = vmatmul.msk.bf16.gmra.mxu0 %vm306_vm2, %v5648_v60  ;;  %v603_v1 = vmax.f32 %v480_v62, 0.0 }
 0x157   :  { %v481_v63 = vpop.f32.mrf.mxu0 }
 0x158   :  { %v482_v0 = vadd.f32 %v6208_v18, %v481_v63 }
 0x15a   :  { %v604_v2 = vmax.f32 %v482_v0, 0.0 }
 0x15c   :  { %v682_v3 = vadd.f32 %v604_v2, %v603_v1 }
 0x15f   :  { %v484_v5 = vpop.f32.mrf.mxu0 }
 0x160   :  { %v485_v6 = vadd.f32 %v6208_v18, %v484_v5 }
 0x162   :  { %v605_v7 = vmax.f32 %v485_v6, 0.0  ;;  %4163 = vmatmul.msk.bf16.gmra.mxu0 %vm306_vm2, %v5649_v4  ;;  %v5656_v6 = vld [vmem:[%s7179_s0 + $0xe0] sm:$0xff] }
 0x164   :  { %v683_v8 = vadd.f32 %v682_v3, %v605_v7 }
 0x167   :  { %v486_v9 = vpop.f32.mrf.mxu0 }
 0x168   :  { %v487_v10 = vadd.f32 %v6208_v18, %v486_v9 }
 0x16a   :  { %v606_v11 = vmax.f32 %v487_v10, 0.0 }
 0x16c   :  { %v684_v12 = vadd.f32 %v683_v8, %v606_v11 }
 0x16f   :  { %v489_v14 = vpop.f32.mrf.mxu0 }
 0x170   :  { %v490_v15 = vadd.f32 %v6208_v18, %v489_v14  ;;  %v5657_v14 = vld [vmem:[%s7179_s0 + $0xe8] sm:$0xff] }
 0x172   :  { %v607_v16 = vmax.f32 %v490_v15, 0.0  ;;  %4164 = vmatmul.msk.bf16.gmra.mxu0 %vm306_vm2, %v5650_v13 }
 0x174   :  { %v685_v17 = vadd.f32 %v684_v12, %v607_v16 }
 0x177   :  { %v491_v19 = vpop.f32.mrf.mxu0 }
 0x178   :  { %v492_v20 = vadd.f32 %v6208_v18, %v491_v19 }
 0x17a   :  { %v608_v21 = vmax.f32 %v492_v20, 0.0 }
 0x17c   :  { %v686_v22 = vadd.f32 %v685_v17, %v608_v21 }
 0x17f   :  { %v494_v25 = vpop.f32.mrf.mxu0 }
 0x180   :  { %v495_v26 = vadd.f32 %v6208_v18, %v494_v25  ;;  %v5658_v25 = vld [vmem:[%s7179_s0 + $0xf0] sm:$0xff] }
 0x182   :  { %v609_v27 = vmax.f32 %v495_v26, 0.0  ;;  %4165 = vmatmul.msk.bf16.gmra.mxu0 %vm306_vm2, %v5651_v24 }
 0x184   :  { %v687_v28 = vadd.f32 %v686_v22, %v609_v27 }
 0x187   :  { %v496_v29 = vpop.f32.mrf.mxu0 }
 0x188   :  { %v497_v30 = vadd.f32 %v6208_v18, %v496_v29 }
 0x18a   :  { %v610_v31 = vmax.f32 %v497_v30, 0.0 }
 0x18c   :  { %v6309_v32 = vadd.f32 %v687_v28, %v610_v31 }
 0x18f   :  { %v499_v34 = vpop.f32.mrf.mxu0 }
 0x190   :  { %v500_v35 = vadd.f32 %v6208_v18, %v499_v34 }
 0x192   :  { %4166 = vmatmul.msk.bf16.gmra.mxu0 %vm306_vm2, %v5652_v33  ;;  %v611_v38 = vmax.f32 %v500_v35, 0.0  ;;  %v5659_v35 = vld [vmem:[%s7179_s0 + $0xf8] sm:$0xff] }
 0x197   :  { %v501_v36 = vpop.f32.mrf.mxu0 }
 0x198   :  { %v502_v37 = vadd.f32 %v6208_v18, %v501_v36 }
 0x19a   :  { %v612_v39 = vmax.f32 %v502_v37, 0.0 }
 0x19c   :  { %v695_v40 = vadd.f32 %v612_v39, %v611_v38 }
 0x19f   :  { %v504_v42 = vpop.f32.mrf.mxu0 }
 0x1a0   :  { %v505_v43 = vadd.f32 %v6208_v18, %v504_v42 }
 0x1a2   :  { %v613_v44 = vmax.f32 %v505_v43, 0.0  ;;  %4167 = vmatmul.msk.bf16.gmra.mxu0 %vm306_vm2, %v5653_v41 }
 0x1a4   :  { %v696_v45 = vadd.f32 %v695_v40, %v613_v44 }
 0x1a7   :  { %v506_v46 = vpop.f32.mrf.mxu0 }
 0x1a8   :  { %v507_v47 = vadd.f32 %v6208_v18, %v506_v46 }
 0x1aa   :  { %v614_v48 = vmax.f32 %v507_v47, 0.0 }
 0x1ac   :  { %v697_v49 = vadd.f32 %v696_v45, %v614_v48 }
 0x1af   :  { %v509_v52 = vpop.f32.mrf.mxu0 }
 0x1b0   :  { %v510_v53 = vadd.f32 %v6208_v18, %v509_v52 }
 0x1b2   :  { %v615_v54 = vmax.f32 %v510_v53, 0.0  ;;  %4168 = vmatmul.msk.bf16.gmra.mxu0 %vm306_vm2, %v5654_v50 }
 0x1b4   :  { %v698_v55 = vadd.f32 %v697_v49, %v615_v54 }
 0x1b7   :  { %v511_v56 = vpop.f32.mrf.mxu0 }
 0x1b8   :  { %v512_v57 = vadd.f32 %v6208_v18, %v511_v56 }
 0x1ba   :  { %v616_v58 = vmax.f32 %v512_v57, 0.0 }
 0x1bc   :  { %v699_v60 = vadd.f32 %v698_v55, %v616_v58 }
 0x1bf   :  { %v514_v62 = vpop.f32.mrf.mxu0 }
 0x1c0   :  { %v515_v63 = vadd.f32 %v6208_v18, %v514_v62 }
 0x1c2   :  { %v617_v0 = vmax.f32 %v515_v63, 0.0  ;;  %4169 = vmatmul.msk.bf16.gmra.mxu0 %vm306_vm2, %v5655_v61 }
 0x1c4   :  { %v700_v1 = vadd.f32 %v699_v60, %v617_v0 }
 0x1c7   :  { %v516_v2 = vpop.f32.mrf.mxu0 }
 0x1c8   :  { %v517_v3 = vadd.f32 %v6208_v18, %v516_v2 }
 0x1ca   :  { %v618_v4 = vmax.f32 %v517_v3, 0.0 }
 0x1cc   :  { %v6335_v5 = vadd.f32 %v700_v1, %v618_v4 }
 0x1cf   :  { %v519_v7 = vpop.f32.mrf.mxu0 }
 0x1d0   :  { %v520_v8 = vadd.f32 %v6208_v18, %v519_v7 }
 0x1d2   :  { %4170 = vmatmul.msk.bf16.gmra.mxu0 %vm306_vm2, %v5656_v6  ;;  %v619_v11 = vmax.f32 %v520_v8, 0.0 }
 0x1d7   :  { %v521_v9 = vpop.f32.mrf.mxu0 }
 0x1d8   :  { %v522_v10 = vadd.f32 %v6208_v18, %v521_v9 }
 0x1da   :  { %v620_v12 = vmax.f32 %v522_v10, 0.0 }
 0x1dc   :  { %v708_v13 = vadd.f32 %v620_v12, %v619_v11 }
 0x1df   :  { %v524_v15 = vpop.f32.mrf.mxu0 }
 0x1e0   :  { %v525_v16 = vadd.f32 %v6208_v18, %v524_v15  ;;  %v5668_v15 = vld [vmem:[%s7182_s3 + $0x30] sm:$0xff] }
 0x1e2   :  { %v621_v17 = vmax.f32 %v525_v16, 0.0  ;;  %4171 = vmatmul.msk.bf16.gmra.mxu0 %vm306_vm2, %v5657_v14  ;;  %v5669_v14 = vld [vmem:[%s7182_s3 + $0x38] sm:$0xff] }
 0x1e3   :  { %870 = vmatpush.bf16.msra.mxu1 %v5669_v14 }
 0x1e4   :  { %v709_v19 = vadd.f32 %v708_v13, %v621_v17  ;;  %v5667_v17 = vld [vmem:[%s7182_s3 + $0x28] sm:$0xff] }
 0x1e7   :  { %v526_v20 = vpop.f32.mrf.mxu0  ;;  %871 = vmatpush.bf16.msra.mxu1 %v5668_v15 }
 0x1e8   :  { %v527_v21 = vadd.f32 %v6208_v18, %v526_v20 }
 0x1ea   :  { %v622_v22 = vmax.f32 %v527_v21, 0.0 }
 0x1eb   :  { %872 = vmatpush.bf16.msra.mxu1 %v5667_v17 }
 0x1ec   :  { %v710_v24 = vadd.f32 %v709_v19, %v622_v22  ;;  %v5666_v19 = vld [vmem:[%s7182_s3 + $0x20] sm:$0xff]  ;;  %v5665_v22 = vld [vmem:[%s7182_s3 + $0x18] sm:$0xff] }
 0x1ef   :  { %v529_v26 = vpop.f32.mrf.mxu0  ;;  %873 = vmatpush.bf16.msra.mxu1 %v5666_v19 }
 0x1f0   :  { %v530_v27 = vadd.f32 %v6208_v18, %v529_v26  ;;  %v663_v26 = vrot.slane %v6257_v23, 4 }
 0x1f2   :  { %v623_v28 = vmax.f32 %v530_v27, 0.0  ;;  %4172 = vmatmul.msk.bf16.gmra.mxu0 %vm306_vm2, %v5658_v25  ;;  %v6081_v25 = vmov 64.0   ;;  %v5664_v27 = vld [vmem:[%s7182_s3 + $0x10] sm:$0xff] }
 0x1f3   :  { %6034 = vrcp.f32 %v6081_v25  ;;  %874 = vmatpush.bf16.msra.mxu1 %v5665_v22 }
 0x1f4   :  { %v711_v29 = vadd.f32 %v710_v24, %v623_v28  ;;  %v650_v28 = vrot.slane %v6231_v51, 4 }
 0x1f7   :  { %v531_v30 = vpop.f32.mrf.mxu0  ;;  %875 = vmatpush.bf16.msra.mxu1 %v5664_v27 }
 0x1f8   :  { %v532_v31 = vadd.f32 %v6208_v18, %v531_v30 }
 0x1fa   :  { %v624_v33 = vmax.f32 %v532_v31, 0.0 }
 0x1fc   :  { %v712_v34 = vadd.f32 %v711_v29, %v624_v33  ;;  %v676_v29 = vrot.slane %v6283_v59, 4  ;;  %v689_v33 = vrot.slane %v6309_v32, 4 }
 0x1ff   :  { %v534_v36 = vpop.f32.mrf.mxu0 }
 0x200   :  { %v535_v37 = vadd.f32 %v6208_v18, %v534_v36  ;;  %v664_v36 = vadd.f32 %v663_v26, %v6257_v23 }
 0x202   :  { %v625_v38 = vmax.f32 %v535_v37, 0.0  ;;  %4173 = vmatmul.msk.bf16.gmra.mxu0 %vm306_vm2, %v5659_v35  ;;  %v5663_v35 = vld [vmem:[%s7182_s3 + $0x8] sm:$0xff]  ;;  %v702_v37 = vrot.slane %v6335_v5, 4 }
 0x203   :  { %876 = vmatpush.bf16.msra.mxu1 %v5663_v35 }
 0x204   :  { %v713_v39 = vadd.f32 %v712_v34, %v625_v38  ;;  %v6399_v38 = vpop.eup %6034 }
 0x205   :  { %vm752_vm3 = vweird.f32 %v6399_v38 }
 0x207   :  { %v536_v40 = vpop.f32.mrf.mxu0 }
 0x208   :  { %v537_v41 = vadd.f32 %v6208_v18, %v536_v40 }
 0x20a   :  { %v626_v42 = vmax.f32 %v537_v41, 0.0 }
 0x20c   :  { %v6361_v43 = vadd.f32 %v713_v39, %v626_v42  ;;  %v651_v42 = vadd.f32 %v650_v28, %v6231_v51 }
 0x20e   :  { %v715_v39 = vrot.slane %v6361_v43, 4 }
 0x20f   :  { %v539_v44 = vpop.f32.mrf.mxu0 }
 0x210   :  { %v540_v45 = vadd.f32 %v6208_v18, %v539_v44  ;;  %v677_v44 = vadd.f32 %v676_v29, %v6283_v59  ;;  %v716_v51 = vadd.f32 %v715_v39, %v6361_v43 }
 0x212   :  { %v627_v48 = vmax.f32 %v540_v45, 0.0 }
 0x217   :  { %v541_v46 = vpop.f32.mrf.mxu0 }
 0x218   :  { %v542_v47 = vadd.f32 %v6208_v18, %v541_v46  ;;  %v690_v46 = vadd.f32 %v689_v33, %v6309_v32  ;;  %v652_v32 = vrot.slane %v651_v42, 2 }
 0x21a   :  { %v628_v49 = vmax.f32 %v542_v47, 0.0 }
 0x21c   :  { %v721_v50 = vadd.f32 %v628_v49, %v627_v48  ;;  %v5662_v48 = vld [vmem:[%s7182_s3] sm:$0xff]  ;;  %v748_v49 = vmul.f32 64.0, %v6399_v38 }
 0x21d   :  { %877 = vmatpush.bf16.msra.mxu1 %v5662_v48 }
 0x21f   :  { %v544_v52 = vpop.f32.mrf.mxu0 }
 0x220   :  { %v545_v53 = vadd.f32 %v6208_v18, %v544_v52  ;;  %v703_v52 = vadd.f32 %v702_v37, %v6335_v5  ;;  %v717_v5 = vrot.slane %v716_v51, 2 }
 0x222   :  { %v629_v54 = vmax.f32 %v545_v53, 0.0  ;;  %v718_v14 = vadd.f32 %v717_v5, %v716_v51 }
 0x224   :  { %v722_v55 = vadd.f32 %v721_v50, %v629_v54  ;;  %v665_v50 = vrot.slane %v664_v36, 2  ;;  %v719_v29 = vrot.slane %v718_v14, 1 }
 0x227   :  { %v546_v56 = vpop.f32.mrf.mxu0 }
 0x228   :  { %v547_v57 = vadd.f32 %v6208_v18, %v546_v56 }
 0x22a   :  { %v630_v58 = vmax.f32 %v547_v57, 0.0 }
 0x22c   :  { %v723_v60 = vadd.f32 %v722_v55, %v630_v58  ;;  %v678_v55 = vrot.slane %v677_v44, 2  ;;  %v691_v58 = vrot.slane %v690_v46, 2 }
 0x22f   :  { %v549_v61 = vpop.f32.mrf.mxu0 }
 0x230   :  { %v550_v62 = vadd.f32 %v6208_v18, %v549_v61 }
 0x232   :  { %v631_v63 = vmax.f32 %v550_v62, 0.0 }
 0x234   :  { %v724_v0 = vadd.f32 %v723_v60, %v631_v63  ;;  %v749_v63 = vsub.f32 1.0, %v748_v49 }
 0x237   :  { %v551_v1 = vpop.f32.mrf.mxu0 }
 0x238   :  { %v552_v2 = vadd.f32 %v6208_v18, %v551_v1  ;;  %v704_v1 = vrot.slane %v703_v52, 2 }
 0x23a   :  { %v632_v3 = vmax.f32 %v552_v2, 0.0 }
 0x23c   :  { %v725_v4 = vadd.f32 %v724_v0, %v632_v3  ;;  %v666_v0 = vadd.f32 %v665_v50, %v664_v36 }
 0x23f   :  { %v554_v6 = vpop.f32.mrf.mxu0 }
 0x240   :  { %v555_v7 = vadd.f32 %v6208_v18, %v554_v6 }
 0x242   :  { %v633_v8 = vmax.f32 %v555_v7, 0.0  ;;  %v653_v7 = vadd.f32 %v652_v32, %v651_v42 }
 0x244   :  { %v726_v9 = vadd.f32 %v725_v4, %v633_v8  ;;  %v679_v4 = vadd.f32 %v678_v55, %v677_v44  ;;  %v692_v8 = vadd.f32 %v691_v58, %v690_v46 }
 0x246   :  { %v680_v17 = vrot.slane %v679_v4, 1  ;;  %v693_v22 = vrot.slane %v692_v8, 1 }
 0x247   :  { %v556_v10 = vpop.f32.mrf.mxu0 }
 0x248   :  { %v557_v20 = vadd.f32 %v6208_v18, %v556_v10  ;;  %v681_v33 = vadd.f32 %v680_v17, %v679_v4  ;;  %v694_v36 = vadd.f32 %v693_v22, %v692_v8  ;;  %v5728_v17 = vld [vmem:[%s7186_s7 + $0x1c4] sm:$0xf]  ;;  %v5724_v22 = vld [vmem:[%s7186_s7 + $0x19c] sm:$0xf0] }
 0x24a   :  { %v634_v24 = vmax.f32 %v557_v20, 0.0 }
 0x24c   :  { %v727_v30 = vadd.f32 %v726_v9, %v634_v24 }
 0x24e   :  { %v728_v45 = vrot.slane %v727_v30, 4 }
 0x24f   :  { %v559_v11 = vpop.f32.mrf.mxu0 }
 0x250   :  { %v560_v40 = vadd.f32 %v6208_v18, %v559_v11  ;;  %v729_v56 = vadd.f32 %v728_v45, %v727_v30  ;;  %v750_v11 = vmul.f32 %v6399_v38, %v749_v63 }
 0x252   :  { %v635_v53 = vmax.f32 %v560_v40, 0.0  ;;  %v730_v6 = vrot.slane %v729_v56, 2  ;;  %v751_v26 = vadd.f32 %v6399_v38, %v750_v11 }
 0x254   :  { %v731_v19 = vadd.f32 %v730_v6, %v729_v56  ;;  %v753_v39 = vsel %vm752_vm3, %v6399_v38, %v751_v26  ;;  %v4412_v26 = vld [vmem:[%s7186_s7 + $0x1a0] sm:$0xf0] }
 0x255   :  { %v6424_v44 = vmul.f32 %v753_v39, %v681_v33 }
 0x257   :  { %v561_v12 = vpop.f32.mrf.mxu0 }
 0x258   :  { %v562_v34 = vadd.f32 %v6208_v18, %v561_v12  ;;  %v705_v12 = vadd.f32 %v704_v1, %v703_v52  ;;  %v764_v52 = vpack.c.bf16 %v6424_v44, %v6424_v44 }
 0x25a   :  { %v636_v47 = vmax.f32 %v562_v34, 0.0  ;;  %v706_v27 = vrot.slane %v705_v12, 1  ;;  %v732_v34 = vrot.slane %v731_v19, 1  ;;  %v800_v58 = vunpack.c.l.b16 %v764_v52  ;;  %v4348_v52 = vld [vmem:[%s7186_s7 + $0x120] sm:$0xf0] }
 0x25c   :  { %v734_v60 = vadd.f32 %v636_v47, %v635_v53  ;;  %v707_v40 = vadd.f32 %v706_v27, %v705_v12  ;;  %v733_v45 = vadd.f32 %v732_v34, %v731_v19  ;;  %v6428_v47 = vmul.f32 %v753_v39, %v694_v36  ;;  %v4378_v36 = vld [vmem:[%s7186_s7 + $0x140] sm:$0xf] }
 0x25e   :  { %v6430_v48 = vmul.f32 %v753_v39, %v707_v40  ;;  %v6438_v51 = vmul.f32 %v753_v39, %v733_v45  ;;  %v4346_v45 = vld [vmem:[%s7186_s7 + $0x100] sm:$0xf] }
 0x25f   :  { %v564_v13 = vpop.f32.mrf.mxu0 }
 0x260   :  { %v565_v41 = vadd.f32 %v6208_v18, %v564_v13  ;;  %v667_v13 = vrot.slane %v666_v0, 1  ;;  %v766_v32 = vpack.c.bf16 %v6430_v48, %v6430_v48 }
 0x262   :  { %v637_v59 = vmax.f32 %v565_v41, 0.0  ;;  %v668_v28 = vadd.f32 %v667_v13, %v666_v0  ;;  %v802_v0 = vunpack.c.l.b16 %v766_v32  ;;  %v5671_v13 = vld [vmem:[%s7184_s5 + $0x8] sm:$0xff] }
 0x263   :  { %915 = vmatpush.bf16.msra.mxu2 %v5671_v13 }
 0x264   :  { %v735_v2 = vadd.f32 %v734_v60, %v637_v59  ;;  %v6422_v41 = vmul.f32 %v753_v39, %v668_v28  ;;  %v765_v59 = vpack.c.bf16 %v6428_v47, %v6428_v47  ;;  %v768_v60 = vpack.c.bf16 %v6438_v51, %v6438_v51 }
 0x266   :  { %v763_v49 = vpack.c.bf16 %v6422_v41, %v6422_v41 }
 0x267   :  { %v566_v16 = vpop.f32.mrf.mxu0 }
 0x268   :  { %v567_v23 = vadd.f32 %v6208_v18, %v566_v16  ;;  %v799_v55 = vunpack.c.l.b16 %v763_v49  ;;  %v5704_v49 = vld [vmem:[%s7186_s7 + $0x104] sm:$0xf] }
 0x26a   :  { %v638_v61 = vmax.f32 %v567_v23, 0.0 }
 0x26c   :  { %v736_v9 = vadd.f32 %v735_v2, %v638_v61 }
 0x26f   :  { %v569_v21 = vpop.f32.mrf.mxu0 }
 0x270   :  { %v570_v54 = vadd.f32 %v6208_v18, %v569_v21  ;;  %v654_v21 = vrot.slane %v653_v7, 1 }
 0x272   :  { %v639_v43 = vmax.f32 %v570_v54, 0.0  ;;  %v655_v35 = vadd.f32 %v654_v21, %v653_v7  ;;  %v4410_v21 = vld [vmem:[%s7186_s7 + $0x180] sm:$0xf] }
 0x273   :  { %v4411_v27 = vor.u32 %v5724_v22, %v4410_v21  ;;  %v5676_v21 = vld [vmem:[%s7186_s7 + $0x1c] sm:$0xf0]  ;;  %v5672_v22 = vld [vmem:[%s7186_s7 + $0x4] sm:$0xf] }
 0x274   :  { %v737_v15 = vadd.f32 %v736_v9, %v639_v43  ;;  %v6426_v46 = vmul.f32 %v753_v39, %v655_v35  ;;  %v804_v43 = vunpack.c.l.b16 %v768_v60  ;;  %v4316_v60 = vld [vmem:[%s7186_s7 + $0xe0] sm:$0xf0] }
 0x276   :  { %v762_v53 = vpack.c.bf16 %v6426_v46, %v6426_v46 }
 0x277   :  { %v571_v31 = vpop.f32.mrf.mxu0 }
 0x278   :  { %v572_v62 = vadd.f32 %v6208_v18, %v571_v31  ;;  %v798_v61 = vunpack.c.l.b16 %v762_v53  ;;  %v4450_v53 = vld [vmem:[%s7186_s7 + $0x1c8] sm:$0xf] }
 0x27a   :  { %v640_v10 = vmax.f32 %v572_v62, 0.0  ;;  %v801_v62 = vunpack.c.l.b16 %v765_v59  ;;  %v807_v2 = vsel %vm806_vm4, %v799_v55, %v798_v61  ;;  %v5733_v59 = vld [vmem:[%s7186_s7 + $0x1e4] sm:$0xf0]  ;;  %v4314_v55 = vld [vmem:[%s7186_s7 + $0xc0] sm:$0xf] }
 0x27b   :  { %v4451_v32 = vor.u32 %v5733_v59, %v4450_v53  ;;  %v4418_v61 = vld [vmem:[%s7186_s7 + $0x188] sm:$0xf] }
 0x27c   :  { %v738_v24 = vadd.f32 %v737_v15, %v640_v10  ;;  %v4442_v15 = vld [vmem:[%s7186_s7 + $0x1c0] sm:$0xf]  ;;  %v4258_v53 = vld [vmem:[%s7186_s7 + $0x48] sm:$0xf] }
 0x27d   :  { %1433 = vmatpush.bf16.msrb.mxu1 %v4451_v32  ;;  %v5685_v59 = vld [vmem:[%s7186_s7 + $0x64] sm:$0xf0] }
 0x27e   :  { %v4259_v32 = vor.u32 %v5685_v59, %v4258_v53  ;;  %v4234_v59 = vld [vmem:[%s7186_s7 + $0x10] sm:$0xf] }
 0x27f   :  { %v574_v57 = vpop.f32.mrf.mxu0 }
 0x280   :  { %v575_v3 = vadd.f32 %v6208_v18, %v574_v57 }
 0x282   :  { %v641_v16 = vmax.f32 %v575_v3, 0.0  ;;  %v809_v3 = vsel %vm808_vm5, %v800_v58, %v807_v2  ;;  %v5692_v2 = vld [vmem:[%s7186_s7 + $0x9c] sm:$0xf0] }
 0x283   :  { %v811_v6 = vsel %vm810_vm6, %v801_v62, %v809_v3  ;;  %v5725_v62 = vld [vmem:[%s7186_s7 + $0x1a4] sm:$0xf0] }
 0x284   :  { %v739_v30 = vadd.f32 %v738_v24, %v641_v16  ;;  %v813_v7 = vsel %vm812_vm7, %v802_v0, %v811_v6  ;;  %v5732_v16 = vld [vmem:[%s7186_s7 + $0x1dc] sm:$0xf0]  ;;  %v4419_v0 = vor.u32 %v5725_v62, %v4418_v61  ;;  %v4386_v6 = vld [vmem:[%s7186_s7 + $0x148] sm:$0xf] }
 0x285   :  { %v4443_v19 = vor.u32 %v5732_v16, %v4442_v15  ;;  %v4354_v15 = vld [vmem:[%s7186_s7 + $0x108] sm:$0xf] }
 0x286   :  { %1434 = vmatpush.bf16.msrb.mxu1 %v4419_v0  ;;  %v5709_v16 = vld [vmem:[%s7186_s7 + $0x124] sm:$0xf0]  ;;  %v5705_v0 = vld [vmem:[%s7186_s7 + $0x10c] sm:$0xf] }
 0x287   :  { %v576_v20 = vpop.f32.mrf.mxu0  ;;  %1407 = vmatpush.bf16.msra.mxu3 %v4443_v19  ;;  %v4355_v19 = vor.u32 %v5709_v16, %v4354_v15  ;;  %v4226_v62 = vld [vmem:[%s7186_s7 + $0x8] sm:$0xf]  ;;  %v5702_v16 = vld [vmem:[%s7186_s7 + $0xec] sm:$0xf0] }
 0x288   :  { %v577_v25 = vadd.f32 %v6208_v18, %v576_v20  ;;  %v720_v18 = vadd.f32 %v719_v29, %v718_v14  ;;  %v5670_v14 = vld [vmem:[%s7184_s5] sm:$0xff] }
 0x289   :  { %916 = vmatpush.bf16.msra.mxu2 %v5670_v14  ;;  %v4444_v20 = vld [vmem:[%s7186_s7 + $0x1e0] sm:$0xf0]  ;;  %v6031_v29 = vld [vmem:[%s7183_s4] ss:$0 sm:$0xff] }
 0x28a   :  { %v642_v31 = vmax.f32 %v577_v25, 0.0  ;;  %v6434_v50 = vmul.f32 %v753_v39, %v720_v18  ;;  %v4447_v24 = vor.u32 %v5728_v17, %v4444_v20  ;;  %v5720_v25 = vld [vmem:[%s7186_s7 + $0x184] sm:$0xf]  ;;  %v4218_v20 = vld [vmem:[%s7186_s7] sm:$0xf] }
 0x28b   :  { %v4415_v28 = vor.u32 %v5720_v25, %v4412_v26  ;;  %1408 = vmatpush.bf16.msra.mxu3 %v4411_v27  ;;  %v4380_v18 = vld [vmem:[%s7186_s7 + $0x160] sm:$0xf0]  ;;  %v4322_v26 = vld [vmem:[%s7186_s7 + $0xc8] sm:$0xf] }
 0x28c   :  { %v740_v37 = vadd.f32 %v739_v30, %v642_v31  ;;  %v767_v57 = vpack.c.bf16 %v6434_v50, %v6434_v50  ;;  %v4252_v14 = vld [vmem:[%s7186_s7 + $0x60] sm:$0xf0]  ;;  %v5701_v27 = vld [vmem:[%s7186_s7 + $0xe4] sm:$0xf0] }
 0x28d   :  { %1420 = vmatpush.bf16.msrb.mxu2 %v4447_v24  ;;  %v4219_v24 = vor.u32 %v5676_v21, %v4218_v20  ;;  %v4220_v25 = vld [vmem:[%s7186_s7 + $0x20] sm:$0xf0] }
 0x28e   :  { %v741_v42 = vrot.slane %v740_v37, 4  ;;  %v803_v5 = vunpack.c.l.b16 %v767_v57  ;;  %v5696_v57 = vld [vmem:[%s7186_s7 + $0xc4] sm:$0xf] }
 0x290   :  { %v742_v23 = vadd.f32 %v741_v42, %v740_v37  ;;  %v815_v9 = vsel %vm814_vm8, %v803_v5, %v813_v7  ;;  %v5716_v37 = vld [vmem:[%s7186_s7 + $0x15c] sm:$0xf0]  ;;  %v5717_v7 = vld [vmem:[%s7186_s7 + $0x164] sm:$0xf0] }
 0x291   :  { %v817_v10 = vsel %vm816_vm9, %v804_v43, %v815_v9  ;;  %1421 = vmatpush.bf16.msrb.mxu2 %v4415_v28  ;;  %v4379_v40 = vor.u32 %v5716_v37, %v4378_v36  ;;  %v4282_v5 = vld [vmem:[%s7186_s7 + $0x80] sm:$0xf]  ;;  %v5688_v43 = vld [vmem:[%s7186_s7 + $0x84] sm:$0xf]  ;;  %v4387_v9 = vor.u32 %v5717_v7, %v4386_v6  ;;  %v4223_v28 = vor.u32 %v5672_v22, %v4220_v25  ;;  %v4290_v37 = vld [vmem:[%s7186_s7 + $0x88] sm:$0xf] }
 0x292   :  { %v743_v38 = vrot.slane %v742_v23, 2  ;;  %v4283_v3 = vor.u32 %v5692_v2, %v4282_v5  ;;  %v4292_v25 = vld [vmem:[%s7186_s7 + $0xa8] sm:$0xf0] }
 0x293   :  { %1409 = vmatpush.bf16.msra.mxu3 %v4379_v40  ;;  %1435 = vmatpush.bf16.msrb.mxu1 %v4387_v9  ;;  %v5721_v40 = vld [vmem:[%s7186_s7 + $0x18c] sm:$0xf]  ;;  %v4460_v9 = vld [vmem:[%s7186_s7 + $0x1f0] sm:$0xf0] }
 0x294   :  { %v744_v54 = vadd.f32 %v743_v38, %v742_v23  ;;  %v5708_v23 = vld [vmem:[%s7186_s7 + $0x11c] sm:$0xf0] }
 0x295   :  { %v4347_v38 = vor.u32 %v5708_v23, %v4346_v45  ;;  %v4426_v45 = vld [vmem:[%s7186_s7 + $0x190] sm:$0xf] }
 0x296   :  { %v745_v56 = vrot.slane %v744_v54, 1  ;;  %v5726_v23 = vld [vmem:[%s7186_s7 + $0x1ac] sm:$0xf0] }
 0x297   :  { %1410 = vmatpush.bf16.msra.mxu3 %v4347_v38  ;;  %1436 = vmatpush.bf16.msrb.mxu1 %v4355_v19  ;;  %v4427_v38 = vor.u32 %v5726_v23, %v4426_v45  ;;  %v4428_v19 = vld [vmem:[%s7186_s7 + $0x1b0] sm:$0xf0] }
 0x298   :  { %v746_v63 = vadd.f32 %v745_v56, %v744_v54  ;;  %v4351_v54 = vor.u32 %v5704_v49, %v4348_v52  ;;  %v5700_v56 = vld [vmem:[%s7186_s7 + $0xdc] sm:$0xf0] }
 0x299   :  { %v4315_v58 = vor.u32 %v5700_v56, %v4314_v55  ;;  %v6032_v52 = vld [vmem:[%s7185_s6] ss:$0 sm:$0xff]  ;;  %v4388_v55 = vld [vmem:[%s7186_s7 + $0x168] sm:$0xf0]  ;;  %v4394_v56 = vld [vmem:[%s7186_s7 + $0x150] sm:$0xf] }
 0x29a   :  { %v6450_v1 = vmul.f32 %v753_v39, %v746_v63  ;;  %v5712_v39 = vld [vmem:[%s7186_s7 + $0x144] sm:$0xf]  ;;  %v4319_v63 = vor.u32 %v5696_v57, %v4316_v60  ;;  %v5718_v57 = vld [vmem:[%s7186_s7 + $0x16c] sm:$0xf0] }
 0x29b   :  { %v4383_v42 = vor.u32 %v5712_v39, %v4380_v18  ;;  %1411 = vmatpush.bf16.msra.mxu3 %v4315_v58  ;;  %v5693_v39 = vld [vmem:[%s7186_s7 + $0xa4] sm:$0xf0]  ;;  %v4395_v60 = vor.u32 %v5718_v57, %v4394_v56  ;;  %v4332_v56 = vld [vmem:[%s7186_s7 + $0xf0] sm:$0xf0] }
 0x29c   :  { %v769_v4 = vpack.c.bf16 %v6450_v1, %v6450_v1  ;;  %v4291_v18 = vor.u32 %v5693_v39, %v4290_v37  ;;  %v5686_v39 = vld [vmem:[%s7186_s7 + $0x6c] sm:$0xf0] }
 0x29d   :  { %1422 = vmatpush.bf16.msrb.mxu2 %v4383_v42  ;;  %v4420_v42 = vld [vmem:[%s7186_s7 + $0x1a8] sm:$0xf0] }
 0x29e   :  { %v805_v8 = vunpack.c.l.b16 %v769_v4  ;;  %v4284_v4 = vld [vmem:[%s7186_s7 + $0xa0] sm:$0xf0]  ;;  %v4423_v49 = vor.u32 %v5721_v40, %v4420_v42  ;;  %v5706_v40 = vld [vmem:[%s7186_s7 + $0x114] sm:$0xf] }
 0x29f   :  { %1412 = vmatpush.bf16.msra.mxu3 %v4283_v3  ;;  %v4362_v3 = vld [vmem:[%s7186_s7 + $0x110] sm:$0xf] }
 0x2a0   :  { %v819_v11 = vsel %vm818_vm10, %v805_v8, %v817_v10  ;;  %v4287_v8 = vor.u32 %v5688_v43, %v4284_v4  ;;  %v4250_v10 = vld [vmem:[%s7186_s7 + $0x40] sm:$0xf]  ;;  %v4356_v43 = vld [vmem:[%s7186_s7 + $0x128] sm:$0xf0]  ;;  %v5710_v4 = vld [vmem:[%s7186_s7 + $0x12c] sm:$0xf0] }
 0x2a1   :  { %v820_v12 = vpack.c.b16 %v819_v11, %v819_v11  ;;  %1423 = vmatpush.bf16.msrb.mxu2 %v4351_v54  ;;  %v5684_v11 = vld [vmem:[%s7186_s7 + $0x5c] sm:$0xf0]  ;;  %v5713_v54 = vld [vmem:[%s7186_s7 + $0x14c] sm:$0xf]  ;;  %v4359_v6 = vor.u32 %v5705_v0, %v4356_v43  ;;  %v4363_v7 = vor.u32 %v5710_v4, %v4362_v3  ;;  %v4268_v43 = vld [vmem:[%s7186_s7 + $0x70] sm:$0xf0] }
 0x2a2   :  { %v4251_v13 = vor.u32 %v5684_v11, %v4250_v10  ;;  %v4391_v58 = vor.u32 %v5713_v54, %v4388_v55  ;;  %v5678_v54 = vld [vmem:[%s7186_s7 + $0x2c] sm:$0xf0] }
 0x2a3   :  { %878 = vmatmul.bf16.vlgmr.msra.gmra.mxu1 %v820_v12  ;;  %v5680_v12 = vld [vmem:[%s7186_s7 + $0x44] sm:$0xf]  ;;  %v4235_v55 = vor.u32 %v5678_v54, %v4234_v59 }
 0x2a4   :  { %v4255_v17 = vor.u32 %v5680_v12, %v4252_v14  ;;  %1413 = vmatpush.bf16.msra.mxu3 %v4251_v13  ;;  %v5697_v12 = vld [vmem:[%s7186_s7 + $0xcc] sm:$0xf]  ;;  %v4330_v14 = vld [vmem:[%s7186_s7 + $0xd0] sm:$0xf] }
 0x2a5   :  { %1424 = vmatpush.bf16.msrb.mxu2 %v4319_v63  ;;  %v5677_v63 = vld [vmem:[%s7186_s7 + $0x24] sm:$0xf0]  ;;  %v4324_v13 = vld [vmem:[%s7186_s7 + $0xe8] sm:$0xf0]  ;;  %v4331_v20 = vor.u32 %v5702_v16, %v4330_v14 }
 0x2a6   :  { %v4227_v2 = vor.u32 %v5677_v63, %v4226_v62  ;;  %v4327_v15 = vor.u32 %v5697_v12, %v4324_v13 }
 0x2a8   :  { %1414 = vmatpush.bf16.msra.mxu3 %v4219_v24  ;;  %v5689_v24 = vld [vmem:[%s7186_s7 + $0x8c] sm:$0xf] }
 0x2a9   :  { %1425 = vmatpush.bf16.msrb.mxu2 %v4287_v8  ;;  %v5730_v8 = vld [vmem:[%s7186_s7 + $0x1d4] sm:$0xf] }
 0x2aa   :  { %v4463_v11 = vor.u32 %v5730_v8, %v4460_v9  ;;  %v5674_v9 = vld [vmem:[%s7186_s7 + $0x14] sm:$0xf] }
 0x2ad   :  { %1426 = vmatpush.bf16.msrb.mxu2 %v4255_v17  ;;  %v5722_v17 = vld [vmem:[%s7186_s7 + $0x194] sm:$0xf] }
 0x2ae   :  { %v4431_v21 = vor.u32 %v5722_v17, %v4428_v19 }
 0x2b1   :  { %1427 = vmatpush.bf16.msrb.mxu2 %v4223_v28  ;;  %v5694_v28 = vld [vmem:[%s7186_s7 + $0xac] sm:$0xf0] }
 0x320   :  { %v879_v30 = vpop.f32.mrf.mxu1 }
 0x321   :  { %v880_v31 = vadd.f32 %v6031_v29, %v879_v30  ;;  %v4323_v29 = vor.u32 %v5701_v27, %v4322_v26  ;;  %v5729_v30 = vld [vmem:[%s7186_s7 + $0x1cc] sm:$0xf]  ;;  %v4298_v26 = vld [vmem:[%s7186_s7 + $0x90] sm:$0xf]  ;;  %v4295_v27 = vor.u32 %v5689_v24, %v4292_v25 }
 0x323   :  { %v883_v33 = vmax.f32 %v880_v31, 0.0  ;;  %v4452_v31 = vld [vmem:[%s7186_s7 + $0x1e8] sm:$0xf0]  ;;  %1437 = vmatpush.bf16.msrb.mxu1 %v4323_v29  ;;  %v5714_v29 = vld [vmem:[%s7186_s7 + $0x154] sm:$0xf] }
 0x325   :  { %v884_v34 = vpack.c.bf16 %v883_v33, %v883_v33  ;;  %v4458_v33 = vld [vmem:[%s7186_s7 + $0x1d0] sm:$0xf] }
 0x327   :  { %4214 = vmatmul.msk.bf16.vlgmr.msra.gmra.mxu2 %vm905_vm11, %v884_v34  ;;  %v4455_v34 = vor.u32 %v5729_v30, %v4452_v31  ;;  %1438 = vmatpush.bf16.msrb.mxu1 %v4291_v18  ;;  %v4396_v30 = vld [vmem:[%s7186_s7 + $0x170] sm:$0xf0]  ;;  %v4299_v31 = vor.u32 %v5694_v28, %v4298_v26 }
 0x328   :  { %v881_v35 = vpop.f32.mrf.mxu1  ;;  %v4364_v18 = vld [vmem:[%s7186_s7 + $0x130] sm:$0xf0] }
 0x329   :  { %v5734_v35 = vld [vmem:[%s7186_s7 + $0x1ec] sm:$0xf0]  ;;  %1446 = vmatpush.bf16.msrb.mxu3 %v4455_v34  ;;  %v5681_v34 = vld [vmem:[%s7186_s7 + $0x4c] sm:$0xf] }
 0x32a   :  { %v4459_v36 = vor.u32 %v5734_v35, %v4458_v33  ;;  %v4399_v33 = vor.u32 %v5714_v29, %v4396_v30  ;;  %v4260_v35 = vld [vmem:[%s7186_s7 + $0x68] sm:$0xf0] }
 0x32b   :  { %1439 = vmatpush.bf16.msrb.mxu1 %v4259_v32  ;;  %v4263_v45 = vor.u32 %v5681_v34, %v4260_v35  ;;  %v5698_v32 = vld [vmem:[%s7186_s7 + $0xd4] sm:$0xf] }
 0x32c   :  { %1459 = vmatpush.bf16.msra.mxu2 %v4459_v36  ;;  %v4266_v36 = vld [vmem:[%s7186_s7 + $0x50] sm:$0xf]  ;;  %v4335_v57 = vor.u32 %v5698_v32, %v4332_v56  ;;  %v4466_v32 = vld [vmem:[%s7186_s7 + $0x1d8] sm:$0xf] }
 0x32d   :  { %1447 = vmatpush.bf16.msrb.mxu3 %v4423_v49  ;;  %v4267_v23 = vor.u32 %v5686_v39, %v4266_v36  ;;  %v4367_v49 = vor.u32 %v5706_v40, %v4364_v18 }
 0x32f   :  { %1440 = vmatpush.bf16.msrb.mxu1 %v4227_v2  ;;  %v5682_v2 = vld [vmem:[%s7186_s7 + $0x54] sm:$0xf] }
 0x330   :  { %1460 = vmatpush.bf16.msra.mxu2 %v4427_v38  ;;  %v5673_v38 = vld [vmem:[%s7186_s7 + $0xc] sm:$0xf] }
 0x331   :  { %1448 = vmatpush.bf16.msrb.mxu3 %v4391_v58 }
 0x333   :  { %1472 = vmatpush.bf16.msra.mxu1 %v4463_v11 }
 0x334   :  { %1461 = vmatpush.bf16.msra.mxu2 %v4395_v60  ;;  %v5690_v60 = vld [vmem:[%s7186_s7 + $0x94] sm:$0xf] }
 0x335   :  { %1449 = vmatpush.bf16.msrb.mxu3 %v4359_v6  ;;  %v4271_v6 = vor.u32 %v5682_v2, %v4268_v43  ;;  %v4434_v2 = vld [vmem:[%s7186_s7 + $0x198] sm:$0xf] }
 0x336   :  { %v5727_v43 = vld [vmem:[%s7186_s7 + $0x1b4] sm:$0xf0] }
 0x337   :  { %1473 = vmatpush.bf16.msra.mxu1 %v4431_v21 }
 0x338   :  { %1462 = vmatpush.bf16.msra.mxu2 %v4363_v7 }
 0x339   :  { %1450 = vmatpush.bf16.msrb.mxu3 %v4327_v15 }
 0x33b   :  { %1474 = vmatpush.bf16.msra.mxu1 %v4399_v33 }
 0x33c   :  { %1463 = vmatpush.bf16.msra.mxu2 %v4331_v20 }
 0x33d   :  { %1451 = vmatpush.bf16.msrb.mxu3 %v4295_v27 }
 0x33f   :  { %1475 = vmatpush.bf16.msra.mxu1 %v4367_v49 }
 0x340   :  { %1464 = vmatpush.bf16.msra.mxu2 %v4299_v31 }
 0x341   :  { %1452 = vmatpush.bf16.msrb.mxu3 %v4263_v45 }
 0x343   :  { %1476 = vmatpush.bf16.msra.mxu1 %v4335_v57 }
 0x344   :  { %1465 = vmatpush.bf16.msra.mxu2 %v4267_v23 }
 0x348   :  { %1466 = vmatpush.bf16.msra.mxu2 %v4235_v55  ;;  %v5735_v55 = vld [vmem:[%s7186_s7 + $0x1f4] sm:$0xf0] }
 0x3aa   :  { %v918_v61 = vpop.f32.mrf.mxu2 }
 0x3ab   :  { %v919_v5 = vadd.f32 %v6032_v52, %v918_v61  ;;  %v4228_v52 = vld [vmem:[%s7186_s7 + $0x28] sm:$0xf0]  ;;  %v4300_v61 = vld [vmem:[%s7186_s7 + $0xb0] sm:$0xf0] }
 0x3ac   :  { %v4231_v53 = vor.u32 %v5673_v38, %v4228_v52  ;;  %v4303_v63 = vor.u32 %v5690_v60, %v4300_v61  ;;  %v4468_v60 = vld [vmem:[%s7186_s7 + $0x1f8] sm:$0xf0] }
 0x3ad   :  { %v4215_v10 = vmul.f32 -1.442695, %v919_v5 }
 0x3ae   :  { %1453 = vmatpush.bf16.msrb.mxu3 %v4231_v53  ;;  %1477 = vmatpush.bf16.msra.mxu1 %v4303_v63  ;;  %v4467_v63 = vor.u32 %v5735_v55, %v4466_v32  ;;  %v5675_v32 = vld [vmem:[%s7186_s7 + $0x1c] sm:$0xf] }
 0x3af   :  { %6036 = vpow2.f32 %v4215_v10  ;;  %v4236_v10 = vld [vmem:[%s7186_s7 + $0x30] sm:$0xf0]  ;;  %v4244_v55 = vld [vmem:[%s7186_s7 + $0x38] sm:$0xf0] }
 0x3b0   :  { %v4239_v12 = vor.u32 %v5674_v9, %v4236_v10  ;;  %v5719_v9 = vld [vmem:[%s7186_s7 + $0x174] sm:$0xf0]  ;;  %v5715_v10 = vld [vmem:[%s7186_s7 + $0x15c] sm:$0xf] }
 0x3b2   :  { %v920_v22 = vpop.f32.mrf.mxu2  ;;  %1478 = vmatpush.bf16.msra.mxu1 %v4271_v6  ;;  %v4435_v6 = vor.u32 %v5727_v43, %v4434_v2  ;;  %v4247_v2 = vor.u32 %v5675_v32, %v4244_v55  ;;  %v5806_v32 = vld [vmem:[#allocation2 + $0x22c] sm:$0xf0] }
 0x3b5   :  { %v6037_v37 = vpop.eup %6036 }
 0x3b6   :  { %v925_v42 = vadd.f32 1.0, %v6037_v37  ;;  %1479 = vmatpush.bf16.msra.mxu1 %v4239_v12  ;;  %v4586_v12 = vld [vmem:[#allocation2 + $0xe0] sm:$0xf] }
 0x3b8   :  { %6038 = vrcp.f32 %v925_v42  ;;  %v937_v5 = vand.u32 2147483648, %v925_v42  ;;  %v935_v4 = vand.u32 2147483647, %v925_v42  ;;  %vm931_vm13 = vweird.f32 %v925_v42 }
 0x3ba   :  { %v938_v8 = vor.u32 1.1754944e-38, %v937_v5  ;;  %vm936_vm15 = vcmp.eq.f32.partialorder %v935_v4, 8.507059e+37  ;;  %v4436_v4 = vld [vmem:[%s7186_s7 + $0x1b8] sm:$0xf0] }
 0x3be   :  { %v6039_v58 = vpop.eup %6038 }
 0x3bf   :  { %v927_v62 = vmul.f32 %v6039_v58, %v925_v42  ;;  %vm932_vm12 = vweird.f32 %v6039_v58 }
 0x3c0   :  { %vm933_vm14 = vmor %vm931_vm13, %vm932_vm12 }
 0x3c1   :  { %v928_v0 = vsub.f32 1.0, %v927_v62 }
 0x3c3   :  { %v929_v3 = vmul.f32 %v6039_v58, %v928_v0 }
 0x3c5   :  { %v930_v7 = vadd.f32 %v6039_v58, %v929_v3  ;;  %v5723_v3 = vld [vmem:[%s7186_s7 + $0x19c] sm:$0xf] }
 0x3c7   :  { %v934_v11 = vsel %vm933_vm14, %v6039_v58, %v930_v7  ;;  %v5731_v58 = vld [vmem:[%s7186_s7 + $0x1dc] sm:$0xf]  ;;  %v4439_v7 = vor.u32 %v5723_v3, %v4436_v4  ;;  %v4826_v4 = vld [vmem:[#allocation2 + $0x2c0] sm:$0xf] }
 0x3c8   :  { %v939_v13 = vsel %vm936_vm15, %v938_v8, %v934_v11  ;;  %v4471_v5 = vor.u32 %v5731_v58, %v4468_v60  ;;  %v4402_v8 = vld [vmem:[%s7186_s7 + $0x158] sm:$0xf]  ;;  %v4404_v11 = vld [vmem:[%s7186_s7 + $0x178] sm:$0xf0]  ;;  %v4506_v58 = vld [vmem:[#allocation2 + $0x40] sm:$0xf] }
 0x3c9   :  { %v942_v14 = vrot.slane %v939_v13, 1  ;;  %v943_v15 = vrot.slane %v939_v13, 2  ;;  %v944_v16 = vrot.slane %v939_v13, 3  ;;  %v945_v17 = vrot.slane %v939_v13, 4  ;;  %v5746_v60 = vld [vmem:[#allocation2 + $0x4c] sm:$0xf0] }
 0x3ca   :  { %v946_v19 = vrot.slane %v939_v13, 5  ;;  %v947_v20 = vrot.slane %v939_v13, 6  ;;  %v948_v21 = vrot.slane %v939_v13, 7  ;;  %v957_v22 = vmul.f32 %v939_v13, %v6426_v46  ;;  %v5766_v13 = vld [vmem:[#allocation2 + $0xec] sm:$0xf0] }
 0x3cb   :  { %v958_v24 = vmul.f32 %v942_v14, %v6422_v41  ;;  %v959_v25 = vmul.f32 %v943_v15, %v6424_v44  ;;  %v960_v26 = vmul.f32 %v944_v16, %v6428_v47  ;;  %v961_v27 = vmul.f32 %v945_v17, %v6430_v48  ;;  %v4370_v17 = vld [vmem:[%s7186_s7 + $0x118] sm:$0xf] }
 0x3cc   :  { %v962_v28 = vmul.f32 %v946_v19, %v6434_v50  ;;  %v963_v29 = vmul.f32 %v947_v20, %v6438_v51  ;;  %v964_v30 = vmul.f32 %v948_v21, %v6450_v1  ;;  %v965_v31 = vpack.c.bf16 %v957_v22, %v957_v22  ;;  %v5711_v19 = vld [vmem:[%s7186_s7 + $0x134] sm:$0xf0]  ;;  %v5707_v20 = vld [vmem:[%s7186_s7 + $0x11c] sm:$0xf]  ;;  %v4570_v22 = vld [vmem:[#allocation2 + $0xc0] sm:$0xf] }
 0x3cd   :  { %v966_v33 = vpack.c.bf16 %v958_v24, %v958_v24  ;;  %v967_v34 = vpack.c.bf16 %v959_v25, %v959_v25  ;;  %v968_v35 = vpack.c.bf16 %v960_v26, %v960_v26  ;;  %v969_v46 = vpack.c.bf16 %v961_v27, %v961_v27  ;;  %v4372_v21 = vld [vmem:[%s7186_s7 + $0x138] sm:$0xf0]  ;;  %v5762_v24 = vld [vmem:[#allocation2 + $0xcc] sm:$0xf0] }
 0x3ce   :  { %v970_v36 = vpack.c.bf16 %v962_v28, %v962_v28  ;;  %v971_v41 = vpack.c.bf16 %v963_v29, %v963_v29  ;;  %v972_v37 = vpack.c.bf16 %v964_v30, %v964_v30  ;;  %v1063_v48 = vunpack.c.l.b16 %v965_v31  ;;  %v4338_v28 = vld [vmem:[%s7186_s7 + $0xd8] sm:$0xf]  ;;  %v5699_v30 = vld [vmem:[%s7186_s7 + $0xdc] sm:$0xf] }
 0x3cf   :  { %v1064_v44 = vunpack.c.l.b16 %v966_v33  ;;  %v1065_v39 = vunpack.c.l.b16 %v967_v34  ;;  %v1066_v47 = vunpack.c.l.b16 %v968_v35  ;;  %v1067_v40 = vunpack.c.l.b16 %v969_v46  ;;  %v5703_v29 = vld [vmem:[%s7186_s7 + $0xf4] sm:$0xf0]  ;;  %v4340_v31 = vld [vmem:[%s7186_s7 + $0xf8] sm:$0xf0]  ;;  %v4554_v33 = vld [vmem:[#allocation2 + $0xa0] sm:$0xf] }
 0x3d0   :  { %v1068_v18 = vunpack.c.l.b16 %v970_v36  ;;  %v1069_v45 = vunpack.c.l.b16 %v971_v41  ;;  %v1070_v23 = vunpack.c.l.b16 %v972_v37  ;;  %v4587_v14 = vor.u32 %v5766_v13, %v4586_v12  ;;  %v5758_v34 = vld [vmem:[#allocation2 + $0xac] sm:$0xf0]  ;;  %v4306_v41 = vld [vmem:[%s7186_s7 + $0x98] sm:$0xf] }
 0x3d1   :  { %v1071_v42 = vrot.slane %v1064_v44, 7  ;;  %v1073_v50 = vrot.slane %v1065_v39, 6  ;;  %v1075_v1 = vrot.slane %v1066_v47, 5  ;;  %v1077_v38 = vrot.slane %v1067_v40, 4  ;;  %v5695_v37 = vld [vmem:[%s7186_s7 + $0xb4] sm:$0xf0] }
 0x3d2   :  { %v1079_v52 = vrot.slane %v1068_v18, 3  ;;  %v1081_v59 = vrot.slane %v1069_v45, 2  ;;  %v1083_v57 = vrot.slane %v1070_v23, 1  ;;  %v4403_v15 = vor.u32 %v5719_v9, %v4402_v8  ;;  %v5691_v44 = vld [vmem:[%s7186_s7 + $0x9c] sm:$0xf] }
 0x3d3   :  { %v1072_v51 = vsel %vm806_vm4, %v1071_v42, %v1063_v48  ;;  %v4407_v16 = vor.u32 %v5715_v10, %v4404_v11  ;;  %v4571_v25 = vor.u32 %v5762_v24, %v4570_v22  ;;  %v4371_v26 = vor.u32 %v5711_v19, %v4370_v17  ;;  %v4308_v39 = vld [vmem:[%s7186_s7 + $0xb8] sm:$0xf0]  ;;  %v4538_v47 = vld [vmem:[#allocation2 + $0x80] sm:$0xf]  ;;  %v5754_v40 = vld [vmem:[#allocation2 + $0x8c] sm:$0xf0] }
 0x3d4   :  { %v1074_v49 = vsel %vm808_vm5, %v1073_v50, %v1072_v51  ;;  %v4375_v27 = vor.u32 %v5707_v20, %v4372_v21  ;;  %v4555_v35 = vor.u32 %v5758_v34, %v4554_v33  ;;  %v4339_v46 = vor.u32 %v5703_v29, %v4338_v28  ;;  %v4274_v50 = vld [vmem:[%s7186_s7 + $0x58] sm:$0xf]  ;;  %v5683_v51 = vld [vmem:[%s7186_s7 + $0x5c] sm:$0xf]  ;;  %v4522_v23 = vld [vmem:[#allocation2 + $0x60] sm:$0xf] }
 0x3d5   :  { %v1076_v53 = vsel %vm810_vm6, %v1075_v1, %v1074_v49  ;;  %v4343_v36 = vor.u32 %v5699_v30, %v4340_v31  ;;  %v4539_v48 = vor.u32 %v5754_v40, %v4538_v47  ;;  %v4307_v18 = vor.u32 %v5695_v37, %v4306_v41  ;;  %v5687_v45 = vld [vmem:[%s7186_s7 + $0x74] sm:$0xf0]  ;;  %v4276_v1 = vld [vmem:[%s7186_s7 + $0x78] sm:$0xf0]  ;;  %v5750_v49 = vld [vmem:[#allocation2 + $0x6c] sm:$0xf0] }
 0x3d6   :  { %v1078_v54 = vsel %vm812_vm7, %v1077_v38, %v1076_v53  ;;  %v4311_v42 = vor.u32 %v5691_v44, %v4308_v39  ;;  %v4523_v38 = vor.u32 %v5750_v49, %v4522_v23  ;;  %v4242_v53 = vld [vmem:[%s7186_s7 + $0x18] sm:$0xf]  ;;  %v5826_v8 = vld [vmem:[#allocation2 + $0x2cc] sm:$0xf0]  ;;  %v4490_v9 = vld [vmem:[#allocation2 + $0x20] sm:$0xf] }
 0x3d7   :  { %v1080_v56 = vsel %vm814_vm8, %v1079_v52, %v1078_v54  ;;  %v4275_v52 = vor.u32 %v5687_v45, %v4274_v50  ;;  %v4279_v54 = vor.u32 %v5683_v51, %v4276_v1  ;;  %v5742_v10 = vld [vmem:[#allocation2 + $0x2c] sm:$0xf0]  ;;  %v4827_v13 = vor.u32 %v5826_v8, %v4826_v4  ;;  %v4474_v19 = vld [vmem:[#allocation2] sm:$0xf] }
 0x3d8   :  { %v1082_v61 = vsel %vm816_vm9, %v1081_v59, %v1080_v56  ;;  %v5679_v59 = vld [vmem:[%s7186_s7 + $0x34] sm:$0xf0]  ;;  %v4714_v56 = vld [vmem:[#allocation2 + $0x1e0] sm:$0xf]  ;;  %v4491_v11 = vor.u32 %v5742_v10, %v4490_v9  ;;  %v5822_v17 = vld [vmem:[#allocation2 + $0x2ac] sm:$0xf0] }
 0x3d9   :  { %v1084_v62 = vsel %vm818_vm10, %v1083_v57, %v1082_v61  ;;  %v5798_v57 = vld [vmem:[#allocation2 + $0x1ec] sm:$0xf0]  ;;  %v4842_v61 = vld [vmem:[#allocation2 + $0x2e0] sm:$0xf] }
 0x3da   :  { %v6788_v0 = vpack.c.b16 %v1084_v62, %v1084_v62  ;;  %v5830_v62 = vld [vmem:[#allocation2 + $0x2ec] sm:$0xf0]  ;;  %v4715_v43 = vor.u32 %v5798_v57, %v4714_v56  ;;  %v4970_v22 = vld [vmem:[#allocation2 + $0x3e0] sm:$0xf] }
 0x3db   :  { %v4843_v3 = vor.u32 %v5830_v62, %v4842_v61  ;;  %v5738_v20 = vld [vmem:[#allocation2 + $0xc] sm:$0xf0]  ;;  %v4794_v28 = vld [vmem:[#allocation2 + $0x280] sm:$0xf] }
 0x3dc   :  { %1415 = vmatmul.bf16.vlgmr.msra.gmra.mxu3 %v6788_v0  ;;  %1428 = vmatmul.bf16.vlgmr.msrb.gmra.mxu2 %v6788_v0  ;;  %v4475_v21 = vor.u32 %v5738_v20, %v4474_v19  ;;  %v5862_v24 = vld [vmem:[#allocation2 + $0x3ec] sm:$0xf0]  ;;  %v4666_v29 = vld [vmem:[#allocation2 + $0x180] sm:$0xf] }
 0x3dd   :  { %1441 = vmatmul.bf16.vlgmr.msrb.gmra.mxu1 %v6788_v0  ;;  %1485 = vmatpush.bf16.msra.mxu3 %v4467_v63  ;;  %v4507_v63 = vor.u32 %v5746_v60, %v4506_v58  ;;  %v5786_v30 = vld [vmem:[#allocation2 + $0x18c] sm:$0xf0]  ;;  %v4954_v33 = vld [vmem:[#allocation2 + $0x3c0] sm:$0xf] }
 0x3de   :  { %1498 = vmatpush.bf16.msrb.mxu2 %v4471_v5  ;;  %3081 = vmatpush.bf16.msrb.mxu1 %v4587_v14  ;;  %v4243_v5 = vor.u32 %v5679_v59, %v4242_v53  ;;  %v4810_v14 = vld [vmem:[#allocation2 + $0x2a0] sm:$0xf]  ;;  %v5818_v31 = vld [vmem:[#allocation2 + $0x28c] sm:$0xf0] }
 0x3df   :  { %v5858_v34 = vld [vmem:[#allocation2 + $0x3cc] sm:$0xf0]  ;;  %v4650_v41 = vld [vmem:[#allocation2 + $0x160] sm:$0xf] }
 0x3e0   :  { %v5782_v37 = vld [vmem:[#allocation2 + $0x16c] sm:$0xf0]  ;;  %v4938_v39 = vld [vmem:[#allocation2 + $0x3a0] sm:$0xf] }
 0x3e1   :  { %1486 = vmatpush.bf16.msra.mxu3 %v4435_v6  ;;  %v4698_v6 = vld [vmem:[#allocation2 + $0x1c0] sm:$0xf]  ;;  %v5814_v44 = vld [vmem:[#allocation2 + $0x26c] sm:$0xf0] }
 0x3e2   :  { %1499 = vmatpush.bf16.msrb.mxu2 %v4439_v7  ;;  %3082 = vmatpush.bf16.msrb.mxu1 %v4571_v25  ;;  %v5794_v7 = vld [vmem:[#allocation2 + $0x1cc] sm:$0xf0]  ;;  %v4634_v50 = vld [vmem:[#allocation2 + $0x140] sm:$0xf] }
 0x3e3   :  { %v4699_v12 = vor.u32 %v5794_v7, %v4698_v6  ;;  %v5854_v47 = vld [vmem:[#allocation2 + $0x3ac] sm:$0xf0]  ;;  %v4922_v1 = vld [vmem:[#allocation2 + $0x380] sm:$0xf] }
 0x3e4   :  { %v4939_v40 = vor.u32 %v5854_v47, %v4938_v39  ;;  %v5778_v45 = vld [vmem:[#allocation2 + $0x14c] sm:$0xf0]  ;;  %v4618_v53 = vld [vmem:[#allocation2 + $0x120] sm:$0xf] }
 0x3e5   :  { %1487 = vmatpush.bf16.msra.mxu3 %v4403_v15  ;;  %v4682_v15 = vld [vmem:[#allocation2 + $0x1a0] sm:$0xf]  ;;  %v5810_v51 = vld [vmem:[#allocation2 + $0x24c] sm:$0xf0] }
 0x3e6   :  { %1500 = vmatpush.bf16.msrb.mxu2 %v4407_v16  ;;  %3083 = vmatpush.bf16.msrb.mxu1 %v4555_v35  ;;  %v5790_v16 = vld [vmem:[#allocation2 + $0x1ac] sm:$0xf0]  ;;  %v4955_v35 = vor.u32 %v5858_v34, %v4954_v33  ;;  %v4730_v57 = vld [vmem:[#allocation2 + $0x200] sm:$0xf] }
 0x3e7   :  { %v4683_v25 = vor.u32 %v5790_v16, %v4682_v15  ;;  %v5850_v23 = vld [vmem:[#allocation2 + $0x38c] sm:$0xf0]  ;;  %v4602_v58 = vld [vmem:[#allocation2 + $0x100] sm:$0xf] }
 0x3e8   :  { %v4923_v49 = vor.u32 %v5850_v23, %v4922_v1  ;;  %v5774_v59 = vld [vmem:[#allocation2 + $0x12c] sm:$0xf0]  ;;  %v5098_v62 = vld [vmem:[#allocation2 + $0x4e0] sm:$0xf] }
 0x3e9   :  { %1488 = vmatpush.bf16.msra.mxu3 %v4371_v26  ;;  %v4971_v26 = vor.u32 %v5862_v24, %v4970_v22  ;;  %v4619_v55 = vor.u32 %v5774_v59, %v4618_v53  ;;  %v5770_v60 = vld [vmem:[#allocation2 + $0x10c] sm:$0xf0]  ;;  %v5082_v7 = vld [vmem:[#allocation2 + $0x4c0] sm:$0xf] }
 0x3ea   :  { %1501 = vmatpush.bf16.msrb.mxu2 %v4375_v27  ;;  %3084 = vmatpush.bf16.msrb.mxu1 %v4539_v48  ;;  %v4811_v27 = vor.u32 %v5822_v17, %v4810_v14  ;;  %v4651_v48 = vor.u32 %v5782_v37, %v4650_v41  ;;  %v5802_v61 = vld [vmem:[#allocation2 + $0x20c] sm:$0xf0]  ;;  %v5210_v9 = vld [vmem:[#allocation2 + $0x5c0] sm:$0xf] }
 0x3eb   :  { %v5890_v8 = vld [vmem:[#allocation2 + $0x4cc] sm:$0xf0]  ;;  %v5194_v15 = vld [vmem:[#allocation2 + $0x5a0] sm:$0xf] }
 0x3ec   :  { %1454 = vmatmul.bf16.vlgmr.msrb.gmra.mxu3 %v6788_v0  ;;  %1467 = vmatmul.bf16.vlgmr.msra.gmra.mxu2 %v6788_v0  ;;  %v5922_v10 = vld [vmem:[#allocation2 + $0x5cc] sm:$0xf0]  ;;  %v5050_v20 = vld [vmem:[#allocation2 + $0x480] sm:$0xf] }
 0x3ed   :  { %1480 = vmatmul.bf16.vlgmr.msra.gmra.mxu1 %v6788_v0  ;;  %1489 = vmatpush.bf16.msra.mxu3 %v4339_v46  ;;  %v4667_v46 = vor.u32 %v5786_v30, %v4666_v29  ;;  %v5886_v14 = vld [vmem:[#allocation2 + $0x4ac] sm:$0xf0]  ;;  %v5178_v22 = vld [vmem:[#allocation2 + $0x580] sm:$0xf] }
 0x3ee   :  { %1502 = vmatpush.bf16.msrb.mxu2 %v4343_v36  ;;  %3085 = vmatpush.bf16.msrb.mxu1 %v4523_v38  ;;  %v4778_v36 = vld [vmem:[#allocation2 + $0x260] sm:$0xf]  ;;  %v4635_v38 = vor.u32 %v5778_v45, %v4634_v50  ;;  %v5918_v16 = vld [vmem:[#allocation2 + $0x5ac] sm:$0xf0] }
 0x3ef   :  { %v5195_v19 = vor.u32 %v5918_v16, %v5194_v15  ;;  %v5914_v24 = vld [vmem:[#allocation2 + $0x58c] sm:$0xf0]  ;;  %v5146_v30 = vld [vmem:[#allocation2 + $0x540] sm:$0xf] }
 0x3f0   :  { %v4906_v34 = vld [vmem:[#allocation2 + $0x360] sm:$0xf]  ;;  %v5870_v53 = vld [vmem:[#allocation2 + $0x42c] sm:$0xf0] }
 0x3f1   :  { %1490 = vmatpush.bf16.msra.mxu3 %v4307_v18  ;;  %v4779_v18 = vor.u32 %v5814_v44, %v4778_v36  ;;  %v5878_v36 = vld [vmem:[#allocation2 + $0x46c] sm:$0xf0]  ;;  %v5130_v37 = vld [vmem:[#allocation2 + $0x520] sm:$0xf] }
 0x3f2   :  { %1503 = vmatpush.bf16.msrb.mxu2 %v4311_v42  ;;  %3086 = vmatpush.bf16.msrb.mxu1 %v4507_v63  ;;  %v4762_v42 = vld [vmem:[#allocation2 + $0x240] sm:$0xf]  ;;  %v5894_v63 = vld [vmem:[#allocation2 + $0x4ec] sm:$0xf0] }
 0x3f3   :  { %v5099_v4 = vor.u32 %v5894_v63, %v5098_v62  ;;  %v5902_v44 = vld [vmem:[#allocation2 + $0x52c] sm:$0xf0]  ;;  %v4890_v47 = vld [vmem:[#allocation2 + $0x340] sm:$0xf] }
 0x3f4   :  { %v5131_v39 = vor.u32 %v5902_v44, %v5130_v37  ;;  %v5114_v45 = vld [vmem:[#allocation2 + $0x500] sm:$0xf]  ;;  %v5958_v15 = vld [vmem:[#allocation2 + $0x6ec] sm:$0xf0]  ;;  %v5752_v37 = vld [vmem:[#allocation2 + $0x84] sm:$0xf] }
 0x3f5   :  { %1491 = vmatpush.bf16.msra.mxu3 %v4275_v52  ;;  %v4763_v52 = vor.u32 %v5810_v51, %v4762_v42  ;;  %v5874_v42 = vld [vmem:[#allocation2 + $0x44c] sm:$0xf0]  ;;  %v4874_v23 = vld [vmem:[#allocation2 + $0x320] sm:$0xf]  ;;  %v4540_v44 = vld [vmem:[#allocation2 + $0x90] sm:$0xf0] }
 0x3f6   :  { %1504 = vmatpush.bf16.msrb.mxu2 %v4279_v54  ;;  %3087 = vmatpush.bf16.msrb.mxu1 %v4491_v11  ;;  %v4746_v54 = vld [vmem:[#allocation2 + $0x220] sm:$0xf]  ;;  %v5083_v11 = vor.u32 %v5890_v8, %v5082_v7  ;;  %v5898_v51 = vld [vmem:[#allocation2 + $0x50c] sm:$0xf0] }
 0x3f7   :  { %v4747_v56 = vor.u32 %v5806_v32, %v4746_v54  ;;  %v5115_v1 = vor.u32 %v5898_v51, %v5114_v45  ;;  %v4858_v54 = vld [vmem:[#allocation2 + $0x300] sm:$0xf]  ;;  %v5834_v32 = vld [vmem:[#allocation2 + $0x30c] sm:$0xf0] }
 0x3f8   :  { %v5482_v16 = vld [vmem:[#allocation2 + $0x7e0] sm:$0xf] }
 0x3f9   :  { %1492 = vmatpush.bf16.msra.mxu3 %v4243_v5  ;;  %v5226_v5 = vld [vmem:[#allocation2 + $0x5e0] sm:$0xf] }
 0x3fa   :  { %1505 = vmatpush.bf16.msrb.mxu2 %v4247_v2  ;;  %3088 = vmatpush.bf16.msrb.mxu1 %v4475_v21  ;;  %v5926_v2 = vld [vmem:[#allocation2 + $0x5ec] sm:$0xf0] }
 0x3fb   :  { %v5227_v6 = vor.u32 %v5926_v2, %v5226_v5  ;;  %v5882_v21 = vld [vmem:[#allocation2 + $0x48c] sm:$0xf0]  ;;  %v5764_v5 = vld [vmem:[#allocation2 + $0xe4] sm:$0xf]  ;;  %v4588_v2 = vld [vmem:[#allocation2 + $0xf0] sm:$0xf0] }
 0x3fc   :  { %1493 = vmatmul.bf16.vlgmr.msra.gmra.mxu3 %v6788_v0 }
 0x3fd   :  { %3094 = vmatpush.bf16.msrb.mxu3 %v4715_v43  ;;  %1506 = vmatmul.bf16.vlgmr.msrb.gmra.mxu2 %v6788_v0  ;;  %v4795_v0 = vor.u32 %v5818_v31, %v4794_v28  ;;  %v4603_v43 = vor.u32 %v5770_v60, %v4602_v58  ;;  %v5910_v28 = vld [vmem:[#allocation2 + $0x56c] sm:$0xf0]  ;;  %v6885_v60 = vld [vmem:[%s7187_s8] sm:$0xff] }
 0x3fe   :  { %3107 = vmatpush.bf16.msra.mxu2 %v4843_v3  ;;  %3120 = vmatpush.bf16.msra.mxu1 %v4971_v26  ;;  %v4731_v3 = vor.u32 %v5802_v61, %v4730_v57  ;;  %v5179_v26 = vor.u32 %v5914_v24, %v5178_v22  ;;  %v5906_v31 = vld [vmem:[#allocation2 + $0x54c] sm:$0xf0]  ;;  %v1041_v61 = vperm.slane %v6885_v60, 2 }
 0x3ff   :  { %v5147_v33 = vor.u32 %v5906_v31, %v5146_v30  ;;  %v5866_v57 = vld [vmem:[#allocation2 + $0x40c] sm:$0xf0]  ;;  %v5338_v30 = vld [vmem:[#allocation2 + $0x6c0] sm:$0xf] }
 0x400   :  { %v5954_v31 = vld [vmem:[#allocation2 + $0x6cc] sm:$0xf0] }
 0x401   :  { %3095 = vmatpush.bf16.msrb.mxu3 %v4699_v12  ;;  %v5211_v12 = vor.u32 %v5922_v10, %v5210_v9  ;;  %v5760_v10 = vld [vmem:[#allocation2 + $0xc4] sm:$0xf] }
 0x402   :  { %3108 = vmatpush.bf16.msra.mxu2 %v4827_v13  ;;  %3121 = vmatpush.bf16.msra.mxu1 %v4955_v35  ;;  %v5066_v13 = vld [vmem:[#allocation2 + $0x4a0] sm:$0xf]  ;;  %v5846_v35 = vld [vmem:[#allocation2 + $0x36c] sm:$0xf0] }
 0x403   :  { %v5067_v17 = vor.u32 %v5886_v14, %v5066_v13  ;;  %v5354_v14 = vld [vmem:[#allocation2 + $0x6e0] sm:$0xf] }
 0x404   :  { %v5355_v24 = vor.u32 %v5958_v15, %v5354_v14  ;;  %v5740_v15 = vld [vmem:[#allocation2 + $0x24] sm:$0xf] }
 0x405   :  { %3096 = vmatpush.bf16.msrb.mxu3 %v4683_v25  ;;  %v5051_v25 = vor.u32 %v5882_v21, %v5050_v20 }
 0x406   :  { %3109 = vmatpush.bf16.msra.mxu2 %v4811_v27  ;;  %3122 = vmatpush.bf16.msra.mxu1 %v4939_v40  ;;  %v5162_v27 = vld [vmem:[#allocation2 + $0x560] sm:$0xf]  ;;  %v5842_v40 = vld [vmem:[#allocation2 + $0x34c] sm:$0xf0] }
 0x407   :  { %v5163_v29 = vor.u32 %v5910_v28, %v5162_v27 }
 0x409   :  { %3097 = vmatpush.bf16.msrb.mxu3 %v4667_v46  ;;  %v5034_v46 = vld [vmem:[#allocation2 + $0x460] sm:$0xf] }
 0x40a   :  { %3110 = vmatpush.bf16.msra.mxu2 %v4795_v0  ;;  %3123 = vmatpush.bf16.msra.mxu1 %v4923_v49  ;;  %v4907_v0 = vor.u32 %v5846_v35, %v4906_v34  ;;  %v5035_v41 = vor.u32 %v5878_v36, %v5034_v46  ;;  %v5838_v49 = vld [vmem:[#allocation2 + $0x32c] sm:$0xf0]  ;;  %v1044_v36 = vperm.slane %v6885_v60, 5 }
 0x40b   :  { %v5986_v34 = vld [vmem:[#allocation2 + $0x7cc] sm:$0xf0] }
 0x40d   :  { %3098 = vmatpush.bf16.msrb.mxu3 %v4651_v48  ;;  %v5018_v48 = vld [vmem:[#allocation2 + $0x440] sm:$0xf] }
 0x40e   :  { %3111 = vmatpush.bf16.msra.mxu2 %v4779_v18  ;;  %3124 = vmatpush.bf16.msra.mxu1 %v4907_v0  ;;  %v4891_v18 = vor.u32 %v5842_v40, %v4890_v47  ;;  %v5019_v50 = vor.u32 %v5874_v42, %v5018_v48  ;;  %v5322_v47 = vld [vmem:[#allocation2 + $0x6a0] sm:$0xf]  ;;  %v5950_v40 = vld [vmem:[#allocation2 + $0x6ac] sm:$0xf0] }
 0x40f   :  { %v5450_v48 = vld [vmem:[#allocation2 + $0x7a0] sm:$0xf]  ;;  %v5323_v51 = vor.u32 %v5950_v40, %v5322_v47 }
 0x411   :  { %3099 = vmatpush.bf16.msrb.mxu3 %v4635_v38  ;;  %v5002_v38 = vld [vmem:[#allocation2 + $0x420] sm:$0xf] }
 0x412   :  { %3112 = vmatpush.bf16.msra.mxu2 %v4763_v52  ;;  %3125 = vmatpush.bf16.msra.mxu1 %v4891_v18  ;;  %v4875_v52 = vor.u32 %v5838_v49, %v4874_v23  ;;  %v5003_v59 = vor.u32 %v5870_v53, %v5002_v38  ;;  %v5982_v18 = vld [vmem:[#allocation2 + $0x7ac] sm:$0xf0]  ;;  %v4524_v23 = vld [vmem:[#allocation2 + $0x70] sm:$0xf0]  ;;  %v1042_v38 = vperm.slane %v6885_v60, 3 }
 0x413   :  { %v5451_v49 = vor.u32 %v5982_v18, %v5450_v48  ;;  %v5306_v53 = vld [vmem:[#allocation2 + $0x680] sm:$0xf]  ;;  %v1045_v48 = vperm.slane %v6885_v60, 6  ;;  %v1046_v18 = vperm.slane %v6885_v60, 7 }
 0x415   :  { %3100 = vmatpush.bf16.msrb.mxu3 %v4619_v55  ;;  %v4986_v55 = vld [vmem:[#allocation2 + $0x400] sm:$0xf] }
 0x416   :  { %3113 = vmatpush.bf16.msra.mxu2 %v4747_v56  ;;  %3126 = vmatpush.bf16.msra.mxu1 %v4875_v52  ;;  %v4859_v56 = vor.u32 %v5834_v32, %v4858_v54  ;;  %v4987_v58 = vor.u32 %v5866_v57, %v4986_v55  ;;  %v1043_v52 = vperm.slane %v6885_v60, 4  ;;  %v5434_v32 = vld [vmem:[#allocation2 + $0x780] sm:$0xf]  ;;  %v5978_v55 = vld [vmem:[#allocation2 + $0x78c] sm:$0xf0] }
 0x419   :  { %3101 = vmatpush.bf16.msrb.mxu3 %v4603_v43  ;;  %v1039_v43 = vperm.slane %v6885_v60, 0 }
 0x41a   :  { %3114 = vmatpush.bf16.msra.mxu2 %v4731_v3  ;;  %3127 = vmatpush.bf16.msra.mxu1 %v4859_v56  ;;  %v1040_v3 = vperm.slane %v6885_v60, 1 }
 0x41d   :  { %3133 = vmatpush.bf16.msra.mxu3 %v5099_v4 }
 0x41e   :  { %3146 = vmatpush.bf16.msrb.mxu2 %v5227_v6  ;;  %v4591_v6 = vor.u32 %v5764_v5, %v4588_v2  ;;  %v4508_v5 = vld [vmem:[#allocation2 + $0x50] sm:$0xf0] }
 0x421   :  { %3134 = vmatpush.bf16.msra.mxu3 %v5083_v11  ;;  %v4572_v11 = vld [vmem:[#allocation2 + $0xd0] sm:$0xf0] }
 0x422   :  { %3147 = vmatpush.bf16.msrb.mxu2 %v5211_v12  ;;  %v4575_v22 = vor.u32 %v5760_v10, %v4572_v11 }
 0x425   :  { %3135 = vmatpush.bf16.msra.mxu3 %v5067_v17  ;;  %v5990_v17 = vld [vmem:[#allocation2 + $0x7ec] sm:$0xf0] }
 0x426   :  { %3148 = vmatpush.bf16.msrb.mxu2 %v5195_v19 }
 0x429   :  { %3136 = vmatpush.bf16.msra.mxu3 %v5051_v25  ;;  %v5756_v25 = vld [vmem:[#allocation2 + $0xa4] sm:$0xf] }
 0x42a   :  { %3149 = vmatpush.bf16.msrb.mxu2 %v5179_v26  ;;  %v4556_v26 = vld [vmem:[#allocation2 + $0xb0] sm:$0xf0] }
 0x42b   :  { %v4559_v35 = vor.u32 %v5756_v25, %v4556_v26  ;;  %v5970_v25 = vld [vmem:[#allocation2 + $0x74c] sm:$0xf0] }
 0x42d   :  { %3137 = vmatpush.bf16.msra.mxu3 %v5035_v41  ;;  %v5339_v41 = vor.u32 %v5954_v31, %v5338_v30 }
 0x42e   :  { %3150 = vmatpush.bf16.msrb.mxu2 %v5163_v29  ;;  %v5483_v29 = vor.u32 %v5990_v17, %v5482_v16  ;;  %v4492_v16 = vld [vmem:[#allocation2 + $0x30] sm:$0xf0] }
 0x42f   :  { %v4495_v26 = vor.u32 %v5740_v15, %v4492_v16 }
 0x431   :  { %3138 = vmatpush.bf16.msra.mxu3 %v5019_v50  ;;  %v4543_v50 = vor.u32 %v5752_v37, %v4540_v44  ;;  %v5386_v37 = vld [vmem:[#allocation2 + $0x720] sm:$0xf]  ;;  %v5966_v44 = vld [vmem:[#allocation2 + $0x72c] sm:$0xf0] }
 0x432   :  { %3151 = vmatpush.bf16.msrb.mxu2 %v5147_v33  ;;  %v5466_v33 = vld [vmem:[#allocation2 + $0x7c0] sm:$0xf] }
 0x435   :  { %3139 = vmatpush.bf16.msra.mxu3 %v5003_v59  ;;  %v5946_v59 = vld [vmem:[#allocation2 + $0x68c] sm:$0xf0] }
 0x436   :  { %3152 = vmatpush.bf16.msrb.mxu2 %v5131_v39  ;;  %v5467_v39 = vor.u32 %v5986_v34, %v5466_v33  ;;  %v5736_v33 = vld [vmem:[#allocation2 + $0x4] sm:$0xf]  ;;  %v4476_v34 = vld [vmem:[#allocation2 + $0x10] sm:$0xf0] }
 0x439   :  { %3140 = vmatpush.bf16.msra.mxu3 %v4987_v58 }
 0x43a   :  { %3153 = vmatpush.bf16.msrb.mxu2 %v5115_v1  ;;  %v5748_v1 = vld [vmem:[#allocation2 + $0x64] sm:$0xf] }
 0x43b   :  { %v4527_v56 = vor.u32 %v5748_v1, %v4524_v23  ;;  %v5930_v1 = vld [vmem:[#allocation2 + $0x60c] sm:$0xf0]  ;;  %v5370_v23 = vld [vmem:[#allocation2 + $0x700] sm:$0xf] }
 0x45a   :  { %v1442_v62 = vpop.f32.mrf.mxu1 }
 0x45b   :  { %v1443_v63 = vadd.f32 %v1442_v62, %v1041_v61  ;;  %v5307_v62 = vor.u32 %v5946_v59, %v5306_v53  ;;  %v5828_v53 = vld [vmem:[#allocation2 + $0x2e4] sm:$0xf]  ;;  %v4844_v59 = vld [vmem:[#allocation2 + $0x2f0] sm:$0xf0] }
 0x45d   :  { %v1513_v4 = vmax.f32 %v1443_v63, 0.0  ;;  %v5744_v63 = vld [vmem:[#allocation2 + $0x44] sm:$0xf] }
 0x45f   :  { %1521 = vst [vmem:[%s7192_s13 + $0x10] sm:$0xff] %v1513_v4  ;;  %v6893_v7 = vpack.c.bf16 %v1513_v4, %v1513_v4  ;;  %v1416_v8 = vpop.f32.mrf.mxu3  ;;  %v1429_v9 = vpop.f32.mrf.mxu2  ;;  %v5290_v4 = vld [vmem:[#allocation2 + $0x660] sm:$0xf] }
 0x460   :  { %v1417_v12 = vadd.f32 %v1416_v8, %v1039_v43  ;;  %v1430_v13 = vadd.f32 %v1429_v9, %v1040_v3  ;;  %v5435_v3 = vor.u32 %v5978_v55, %v5434_v32  ;;  %v5418_v8 = vld [vmem:[#allocation2 + $0x760] sm:$0xf]  ;;  %v5974_v9 = vld [vmem:[#allocation2 + $0x76c] sm:$0xf0] }
 0x461   :  { %3115 = vmatmul.bf16.vlgmr.msra.gmra.mxu2 %v6893_v7 }
 0x462   :  { %v1511_v19 = vmax.f32 %v1417_v12, 0.0  ;;  %v1512_v20 = vmax.f32 %v1430_v13, 0.0  ;;  %3185 = vmatpush.bf16.msra.mxu2 %v4591_v6  ;;  %v1444_v21 = vpop.f32.mrf.mxu1  ;;  %v5942_v6 = vld [vmem:[#allocation2 + $0x66c] sm:$0xf0]  ;;  %v4511_v13 = vor.u32 %v5744_v63, %v4508_v5  ;;  %v4940_v63 = vld [vmem:[#allocation2 + $0x3b0] sm:$0xf0] }
 0x463   :  { %v5291_v14 = vor.u32 %v5942_v6, %v5290_v4  ;;  %v5274_v21 = vld [vmem:[#allocation2 + $0x640] sm:$0xf]  ;;  %v5824_v6 = vld [vmem:[#allocation2 + $0x2c4] sm:$0xf] }
 0x464   :  { %1519 = vst [vmem:[%s7192_s13] sm:$0xff] %v1511_v19  ;;  %v6899_v27 = vpack.c.bf16 %v1511_v19, %v1511_v19  ;;  %v6901_v28 = vpack.c.bf16 %v1512_v20, %v1512_v20 }
 0x465   :  { %1520 = vst [vmem:[%s7192_s13 + $0x8] sm:$0xff] %v1512_v20  ;;  %v5419_v20 = vor.u32 %v5974_v9, %v5418_v8  ;;  %v4828_v8 = vld [vmem:[#allocation2 + $0x2d0] sm:$0xf0] }
 0x466   :  { %3186 = vmatpush.bf16.msra.mxu2 %v4575_v22  ;;  %3089 = vmatmul.bf16.vlgmr.msrb.gmra.mxu1 %v6899_v27  ;;  %v5938_v22 = vld [vmem:[#allocation2 + $0x64c] sm:$0xf0]  ;;  %v4831_v16 = vor.u32 %v5824_v6, %v4828_v8  ;;  %v5340_v6 = vld [vmem:[#allocation2 + $0x6d0] sm:$0xf0] }
 0x467   :  { %3102 = vmatmul.bf16.vlgmr.msrb.gmra.mxu3 %v6901_v28  ;;  %3159 = vmatpush.bf16.msrb.mxu1 %v5355_v24  ;;  %v1418_v46 = vpop.f32.mrf.mxu3  ;;  %v1431_v0 = vpop.f32.mrf.mxu2  ;;  %v5402_v24 = vld [vmem:[#allocation2 + $0x740] sm:$0xf]  ;;  %v5275_v31 = vor.u32 %v5938_v22, %v5274_v21  ;;  %v4684_v21 = vld [vmem:[#allocation2 + $0x1b0] sm:$0xf0]  ;;  %v5820_v22 = vld [vmem:[#allocation2 + $0x2a4] sm:$0xf] }
 0x468   :  { %3172 = vmatpush.bf16.msrb.mxu3 %v5483_v29  ;;  %v5403_v46 = vor.u32 %v5970_v25, %v5402_v24  ;;  %v4972_v0 = vld [vmem:[#allocation2 + $0x3f0] sm:$0xf0] }
 0x469   :  { %v4812_v24 = vld [vmem:[#allocation2 + $0x2b0] sm:$0xf0] }
 0x46a   :  { %3187 = vmatpush.bf16.msra.mxu2 %v4559_v35  ;;  %v1481_v42 = vpop.f32.mrf.mxu1  ;;  %v5860_v35 = vld [vmem:[#allocation2 + $0x3e4] sm:$0xf] }
 0x46b   :  { %v1482_v45 = vadd.f32 %v1481_v42, %v1044_v36  ;;  %3160 = vmatpush.bf16.msrb.mxu1 %v5339_v41  ;;  %v5258_v36 = vld [vmem:[#allocation2 + $0x620] sm:$0xf]  ;;  %v5934_v41 = vld [vmem:[#allocation2 + $0x62c] sm:$0xf0]  ;;  %v4975_v47 = vor.u32 %v5860_v35, %v4972_v0  ;;  %v5856_v42 = vld [vmem:[#allocation2 + $0x3c4] sm:$0xf] }
 0x46c   :  { %3173 = vmatpush.bf16.msrb.mxu3 %v5467_v39  ;;  %v4479_v39 = vor.u32 %v5736_v33, %v4476_v34  ;;  %v5259_v40 = vor.u32 %v5934_v41, %v5258_v36  ;;  %v4908_v33 = vld [vmem:[#allocation2 + $0x370] sm:$0xf0]  ;;  %v4815_v34 = vor.u32 %v5820_v22, %v4812_v24  ;;  %v5784_v35 = vld [vmem:[#allocation2 + $0x184] sm:$0xf] }
 0x46d   :  { %v1516_v54 = vmax.f32 %v1482_v45, 0.0  ;;  %v5387_v45 = vor.u32 %v5966_v44, %v5386_v37  ;;  %v5816_v0 = vld [vmem:[#allocation2 + $0x284] sm:$0xf]  ;;  %v4796_v36 = vld [vmem:[#allocation2 + $0x290] sm:$0xf0] }
 0x46e   :  { %3188 = vmatpush.bf16.msra.mxu2 %v4543_v50  ;;  %v4956_v50 = vld [vmem:[#allocation2 + $0x3d0] sm:$0xf0]  ;;  %v5840_v44 = vld [vmem:[#allocation2 + $0x344] sm:$0xf] }
 0x46f   :  { %1524 = vst [vmem:[%s7192_s13 + $0x28] sm:$0xff] %v1516_v54  ;;  %v6914_v57 = vpack.c.bf16 %v1516_v54, %v1516_v54  ;;  %3161 = vmatpush.bf16.msrb.mxu1 %v5323_v51  ;;  %v1455_v58 = vpop.f32.mrf.mxu3  ;;  %v1468_v61 = vpop.f32.mrf.mxu2  ;;  %v5242_v51 = vld [vmem:[#allocation2 + $0x600] sm:$0xf]  ;;  %v4959_v32 = vor.u32 %v5856_v42, %v4956_v50  ;;  %v4780_v42 = vld [vmem:[#allocation2 + $0x270] sm:$0xf0] }
 0x470   :  { %3174 = vmatpush.bf16.msrb.mxu3 %v5451_v49  ;;  %v1456_v2 = vadd.f32 %v1455_v58, %v1042_v38  ;;  %v1469_v43 = vadd.f32 %v1468_v61, %v1043_v52  ;;  %v5962_v49 = vld [vmem:[#allocation2 + $0x70c] sm:$0xf0]  ;;  %v5796_v38 = vld [vmem:[#allocation2 + $0x1e4] sm:$0xf]  ;;  %v4716_v52 = vld [vmem:[#allocation2 + $0x1f0] sm:$0xf0]  ;;  %v5243_v55 = vor.u32 %v5930_v1, %v5242_v51 }
 0x471   :  { %3154 = vmatmul.bf16.vlgmr.msrb.gmra.mxu2 %v6914_v57  ;;  %v5371_v58 = vor.u32 %v5962_v49, %v5370_v23  ;;  %v4719_v61 = vor.u32 %v5796_v38, %v4716_v52  ;;  %v5836_v51 = vld [vmem:[#allocation2 + $0x324] sm:$0xf]  ;;  %v4876_v1 = vld [vmem:[#allocation2 + $0x330] sm:$0xf0] }
 0x472   :  { %v1514_v10 = vmax.f32 %v1456_v2, 0.0  ;;  %v1515_v11 = vmax.f32 %v1469_v43, 0.0  ;;  %3189 = vmatpush.bf16.msra.mxu2 %v4527_v56  ;;  %v1483_v12 = vpop.f32.mrf.mxu1  ;;  %v4847_v2 = vor.u32 %v5828_v53, %v4844_v59  ;;  %v5792_v43 = vld [vmem:[#allocation2 + $0x1c4] sm:$0xf]  ;;  %v4636_v38 = vld [vmem:[#allocation2 + $0x150] sm:$0xf0]  ;;  %v4879_v59 = vor.u32 %v5836_v51, %v4876_v1 }
 0x473   :  { %3162 = vmatpush.bf16.msrb.mxu1 %v5307_v62  ;;  %v5852_v62 = vld [vmem:[#allocation2 + $0x3a4] sm:$0xf]  ;;  %v4764_v53 = vld [vmem:[#allocation2 + $0x250] sm:$0xf0] }
 0x474   :  { %1522 = vst [vmem:[%s7192_s13 + $0x18] sm:$0xff] %v1514_v10  ;;  %v6920_v17 = vpack.c.bf16 %v1514_v10, %v1514_v10  ;;  %v6922_v19 = vpack.c.bf16 %v1515_v11, %v1515_v11  ;;  %3175 = vmatpush.bf16.msrb.mxu3 %v5435_v3  ;;  %v4700_v3 = vld [vmem:[#allocation2 + $0x1d0] sm:$0xf0]  ;;  %v4943_v10 = vor.u32 %v5852_v62, %v4940_v63  ;;  %v5776_v49 = vld [vmem:[#allocation2 + $0x144] sm:$0xf] }
 0x475   :  { %1523 = vst [vmem:[%s7192_s13 + $0x20] sm:$0xff] %v1515_v11  ;;  %v4703_v12 = vor.u32 %v5792_v43, %v4700_v3  ;;  %v5808_v52 = vld [vmem:[#allocation2 + $0x244] sm:$0xf]  ;;  %v4620_v62 = vld [vmem:[#allocation2 + $0x130] sm:$0xf0] }
 0x476   :  { %3190 = vmatpush.bf16.msra.mxu2 %v4511_v13  ;;  %3128 = vmatmul.bf16.vlgmr.msra.gmra.mxu1 %v6920_v17  ;;  %v5848_v13 = vld [vmem:[#allocation2 + $0x384] sm:$0xf] }
 0x477   :  { %3141 = vmatmul.bf16.vlgmr.msra.gmra.mxu3 %v6922_v19  ;;  %3163 = vmatpush.bf16.msrb.mxu1 %v5291_v14  ;;  %v1457_v29 = vpop.f32.mrf.mxu3  ;;  %v1470_v30 = vpop.f32.mrf.mxu2  ;;  %v4924_v14 = vld [vmem:[#allocation2 + $0x390] sm:$0xf0]  ;;  %v5804_v63 = vld [vmem:[#allocation2 + $0x224] sm:$0xf] }
 0x478   :  { %3176 = vmatpush.bf16.msrb.mxu3 %v5419_v20  ;;  %v5788_v20 = vld [vmem:[#allocation2 + $0x1a4] sm:$0xf] }
 0x479   :  { %v4687_v30 = vor.u32 %v5788_v20, %v4684_v21  ;;  %v5924_v20 = vld [vmem:[#allocation2 + $0x5e4] sm:$0xf]  ;;  %v5228_v21 = vld [vmem:[#allocation2 + $0x5f0] sm:$0xf0] }
 0x47a   :  { %3191 = vmatpush.bf16.msra.mxu2 %v4495_v26  ;;  %v4927_v26 = vor.u32 %v5848_v13, %v4924_v14  ;;  %v4732_v13 = vld [vmem:[#allocation2 + $0x210] sm:$0xf0]  ;;  %v5892_v14 = vld [vmem:[#allocation2 + $0x4e4] sm:$0xf] }
 0x47b   :  { %3164 = vmatpush.bf16.msrb.mxu1 %v5275_v31  ;;  %v5844_v31 = vld [vmem:[#allocation2 + $0x364] sm:$0xf] }
 0x47c   :  { %3177 = vmatpush.bf16.msrb.mxu3 %v5403_v46  ;;  %v4668_v46 = vld [vmem:[#allocation2 + $0x190] sm:$0xf0]  ;;  %v4911_v41 = vor.u32 %v5844_v31, %v4908_v33  ;;  %v5231_v31 = vor.u32 %v5924_v20, %v5228_v21  ;;  %v5888_v33 = vld [vmem:[#allocation2 + $0x4c4] sm:$0xf] }
 0x47d   :  { %v4671_v37 = vor.u32 %v5784_v35, %v4668_v46  ;;  %v5920_v35 = vld [vmem:[#allocation2 + $0x5c4] sm:$0xf]  ;;  %v5212_v46 = vld [vmem:[#allocation2 + $0x5d0] sm:$0xf0] }
 0x47e   :  { %3192 = vmatpush.bf16.msra.mxu2 %v4479_v39  ;;  %v4892_v39 = vld [vmem:[#allocation2 + $0x350] sm:$0xf0]  ;;  %v5880_v1 = vld [vmem:[#allocation2 + $0x484] sm:$0xf] }
 0x47f   :  { %3165 = vmatpush.bf16.msrb.mxu1 %v5259_v40  ;;  %v1494_v54 = vpop.f32.mrf.mxu3  ;;  %v5780_v40 = vld [vmem:[#allocation2 + $0x164] sm:$0xf]  ;;  %v4895_v50 = vor.u32 %v5840_v44, %v4892_v39  ;;  %v5215_v44 = vor.u32 %v5920_v35, %v5212_v46  ;;  %v5004_v21 = vld [vmem:[#allocation2 + $0x430] sm:$0xf0] }
 0x480   :  { %3178 = vmatpush.bf16.msrb.mxu3 %v5387_v45  ;;  %v1495_v60 = vadd.f32 %v1494_v54, %v1045_v48  ;;  %v1507_v56 = vpop.f32.mrf.mxu2  ;;  %v4652_v48 = vld [vmem:[#allocation2 + $0x170] sm:$0xf0]  ;;  %v4639_v54 = vor.u32 %v5776_v49, %v4636_v38  ;;  %v5884_v39 = vld [vmem:[#allocation2 + $0x4a4] sm:$0xf] }
 0x481   :  { %v1508_v5 = vadd.f32 %v1507_v56, %v1046_v18  ;;  %3193 = vmatmul.bf16.vlgmr.msra.gmra.mxu2 %v6899_v27  ;;  %v5812_v18 = vld [vmem:[#allocation2 + $0x264] sm:$0xf]  ;;  %v4655_v45 = vor.u32 %v5780_v40, %v4652_v48  ;;  %v4767_v56 = vor.u32 %v5808_v52, %v4764_v53  ;;  %v5196_v48 = vld [vmem:[#allocation2 + $0x5b0] sm:$0xf0] }
 0x482   :  { %3224 = vmatpush.bf16.msrb.mxu2 %v4975_v47  ;;  %v1517_v4 = vmax.f32 %v1495_v60, 0.0  ;;  %v4799_v47 = vor.u32 %v5816_v0, %v4796_v36  ;;  %v4783_v23 = vor.u32 %v5812_v18, %v4780_v42  ;;  %v5956_v60 = vld [vmem:[#allocation2 + $0x6e4] sm:$0xf]  ;;  %v5180_v38 = vld [vmem:[#allocation2 + $0x590] sm:$0xf0] }
 0x483   :  { %v1518_v9 = vmax.f32 %v1508_v5, 0.0  ;;  %3166 = vmatpush.bf16.msrb.mxu1 %v5243_v55  ;;  %v4860_v55 = vld [vmem:[#allocation2 + $0x310] sm:$0xf0]  ;;  %v5916_v40 = vld [vmem:[#allocation2 + $0x5a4] sm:$0xf] }
 0x484   :  { %1525 = vst [vmem:[%s7192_s13 + $0x30] sm:$0xff] %v1517_v4  ;;  %v6935_v11 = vpack.c.bf16 %v1517_v4, %v1517_v4  ;;  %3179 = vmatpush.bf16.msrb.mxu3 %v5371_v58  ;;  %v5356_v58 = vld [vmem:[#allocation2 + $0x6f0] sm:$0xf0]  ;;  %v5952_v4 = vld [vmem:[#allocation2 + $0x6c4] sm:$0xf]  ;;  %v5199_v51 = vor.u32 %v5916_v40, %v5196_v48 }
 0x485   :  { %1526 = vst [vmem:[%s7192_s13 + $0x38] sm:$0xff] %v1518_v9  ;;  %v6940_v15 = vpack.c.bf16 %v1518_v9, %v1518_v9  ;;  %v4748_v5 = vld [vmem:[#allocation2 + $0x230] sm:$0xf0]  ;;  %v5359_v43 = vor.u32 %v5956_v60, %v5356_v58  ;;  %v5768_v9 = vld [vmem:[#allocation2 + $0x104] sm:$0xf]  ;;  %v5343_v22 = vor.u32 %v5952_v4, %v5340_v6 }
 0x486   :  { %3225 = vmatpush.bf16.msrb.mxu2 %v4959_v32  ;;  %3167 = vmatmul.bf16.vlgmr.msrb.gmra.mxu1 %v6935_v11  ;;  %v5832_v32 = vld [vmem:[#allocation2 + $0x304] sm:$0xf]  ;;  %v4751_v8 = vor.u32 %v5804_v63, %v4748_v5  ;;  %v5036_v60 = vld [vmem:[#allocation2 + $0x470] sm:$0xf0] }
 0x487   :  { %3198 = vmatpush.bf16.msra.mxu1 %v4719_v61  ;;  %3180 = vmatmul.bf16.vlgmr.msrb.gmra.mxu3 %v6940_v15  ;;  %v1496_v25 = vpop.f32.mrf.mxu3  ;;  %v5772_v61 = vld [vmem:[#allocation2 + $0x124] sm:$0xf]  ;;  %v5164_v58 = vld [vmem:[#allocation2 + $0x570] sm:$0xf0] }
 0x488   :  { %3211 = vmatpush.bf16.msra.mxu3 %v4847_v2  ;;  %v1509_v29 = vpop.f32.mrf.mxu2  ;;  %v4863_v2 = vor.u32 %v5832_v32, %v4860_v55  ;;  %v4623_v3 = vor.u32 %v5772_v61, %v4620_v62  ;;  %v5912_v49 = vld [vmem:[#allocation2 + $0x584] sm:$0xf]  ;;  %v5260_v5 = vld [vmem:[#allocation2 + $0x630] sm:$0xf0] }
 0x489   :  { %v5948_v29 = vld [vmem:[#allocation2 + $0x6a4] sm:$0xf]  ;;  %v5183_v32 = vor.u32 %v5912_v49, %v5180_v38  ;;  %v5148_v6 = vld [vmem:[#allocation2 + $0x550] sm:$0xf0] }
 0x48a   :  { %3226 = vmatpush.bf16.msrb.mxu2 %v4943_v10  ;;  %v4604_v10 = vld [vmem:[#allocation2 + $0x110] sm:$0xf0]  ;;  %v5876_v55 = vld [vmem:[#allocation2 + $0x464] sm:$0xf] }
 0x48b   :  { %3199 = vmatpush.bf16.msra.mxu1 %v4703_v12  ;;  %v5800_v12 = vld [vmem:[#allocation2 + $0x204] sm:$0xf]  ;;  %v4607_v24 = vor.u32 %v5768_v9, %v4604_v10  ;;  %v5039_v62 = vor.u32 %v5876_v55, %v5036_v60  ;;  %v4988_v35 = vld [vmem:[#allocation2 + $0x410] sm:$0xf0]  ;;  %v4562_v55 = vld [vmem:[#allocation2 + $0xa8] sm:$0xf] }
 0x48c   :  { %3212 = vmatpush.bf16.msra.mxu3 %v4831_v16  ;;  %v5100_v16 = vld [vmem:[#allocation2 + $0x4f0] sm:$0xf0]  ;;  %v4735_v25 = vor.u32 %v5800_v12, %v4732_v13  ;;  %v5932_v63 = vld [vmem:[#allocation2 + $0x624] sm:$0xf]  ;;  %v4722_v13 = vld [vmem:[#allocation2 + $0x1e8] sm:$0xf] }
 0x48d   :  { %v5904_v4 = vld [vmem:[#allocation2 + $0x544] sm:$0xf]  ;;  %v5244_v12 = vld [vmem:[#allocation2 + $0x610] sm:$0xf0]  ;;  %v5759_v60 = vld [vmem:[#allocation2 + $0xb4] sm:$0xf0] }
 0x48e   :  { %3227 = vmatpush.bf16.msrb.mxu2 %v4927_v26  ;;  %v5103_v26 = vor.u32 %v5892_v14, %v5100_v16  ;;  %v5928_v10 = vld [vmem:[#allocation2 + $0x604] sm:$0xf]  ;;  %v5151_v14 = vor.u32 %v5904_v4, %v5148_v6  ;;  %v5799_v16 = vld [vmem:[#allocation2 + $0x1f4] sm:$0xf0] }
 0x48f   :  { %3200 = vmatpush.bf16.msra.mxu1 %v4687_v30  ;;  %v5324_v30 = vld [vmem:[#allocation2 + $0x6b0] sm:$0xf0]  ;;  %v5868_v20 = vld [vmem:[#allocation2 + $0x424] sm:$0xf] }
 0x490   :  { %3213 = vmatpush.bf16.msra.mxu3 %v4815_v34  ;;  %v5084_v34 = vld [vmem:[#allocation2 + $0x4d0] sm:$0xf0]  ;;  %v5327_v0 = vor.u32 %v5948_v29, %v5324_v30  ;;  %v5007_v29 = vor.u32 %v5868_v20, %v5004_v21  ;;  %v4706_v30 = vld [vmem:[#allocation2 + $0x1c8] sm:$0xf]  ;;  %v5896_v46 = vld [vmem:[#allocation2 + $0x504] sm:$0xf] }
 0x491   :  { %v5087_v36 = vor.u32 %v5888_v33, %v5084_v34  ;;  %v5864_v34 = vld [vmem:[#allocation2 + $0x404] sm:$0xf] }
 0x492   :  { %3228 = vmatpush.bf16.msrb.mxu2 %v4911_v41  ;;  %v5944_v41 = vld [vmem:[#allocation2 + $0x684] sm:$0xf] }
 0x493   :  { %3201 = vmatpush.bf16.msra.mxu1 %v4671_v37  ;;  %v5308_v37 = vld [vmem:[#allocation2 + $0x690] sm:$0xf0] }
 0x494   :  { %3214 = vmatpush.bf16.msra.mxu3 %v4799_v47  ;;  %v5068_v47 = vld [vmem:[#allocation2 + $0x4b0] sm:$0xf0]  ;;  %v5311_v18 = vor.u32 %v5944_v41, %v5308_v37  ;;  %v4594_v37 = vld [vmem:[#allocation2 + $0xe8] sm:$0xf] }
 0x495   :  { %v5071_v42 = vor.u32 %v5884_v39, %v5068_v47  ;;  %v5484_v41 = vld [vmem:[#allocation2 + $0x7f0] sm:$0xf0]  ;;  %v4991_v47 = vor.u32 %v5864_v34, %v4988_v35  ;;  %v4610_v35 = vld [vmem:[#allocation2 + $0x108] sm:$0xf] }
 0x496   :  { %3229 = vmatpush.bf16.msrb.mxu2 %v4895_v50  ;;  %v5940_v50 = vld [vmem:[#allocation2 + $0x664] sm:$0xf] }
 0x497   :  { %3202 = vmatpush.bf16.msra.mxu1 %v4655_v45  ;;  %v5292_v45 = vld [vmem:[#allocation2 + $0x670] sm:$0xf0] }
 0x498   :  { %3215 = vmatpush.bf16.msra.mxu3 %v4783_v23  ;;  %v5052_v23 = vld [vmem:[#allocation2 + $0x490] sm:$0xf0]  ;;  %v5295_v52 = vor.u32 %v5940_v50, %v5292_v45  ;;  %v5984_v45 = vld [vmem:[#allocation2 + $0x7c4] sm:$0xf] }
 0x499   :  { %v5055_v53 = vor.u32 %v5880_v1, %v5052_v23  ;;  %v4578_v1 = vld [vmem:[#allocation2 + $0xc8] sm:$0xf]  ;;  %v5763_v23 = vld [vmem:[#allocation2 + $0xd4] sm:$0xf0] }
 0x49a   :  { %3230 = vmatpush.bf16.msrb.mxu2 %v4879_v59  ;;  %v5936_v59 = vld [vmem:[#allocation2 + $0x644] sm:$0xf] }
 0x49b   :  { %3203 = vmatpush.bf16.msra.mxu1 %v4639_v54  ;;  %v5276_v54 = vld [vmem:[#allocation2 + $0x650] sm:$0xf0] }
 0x49c   :  { %3216 = vmatpush.bf16.msra.mxu3 %v4767_v56  ;;  %v5908_v56 = vld [vmem:[#allocation2 + $0x564] sm:$0xf]  ;;  %v5279_v61 = vor.u32 %v5936_v59, %v5276_v54  ;;  %v4579_v59 = vor.u32 %v5763_v23, %v4578_v1  ;;  %v5372_v1 = vld [vmem:[#allocation2 + $0x710] sm:$0xf0]  ;;  %v4482_v23 = vld [vmem:[#allocation2 + $0x8] sm:$0xf] }
 0x49d   :  { %v5980_v54 = vld [vmem:[#allocation2 + $0x7a4] sm:$0xf] }
 0x49e   :  { %3231 = vmatpush.bf16.msrb.mxu2 %v4863_v2  ;;  %v5167_v2 = vor.u32 %v5908_v56, %v5164_v58 }
 0x49f   :  { %3204 = vmatpush.bf16.msra.mxu1 %v4623_v3  ;;  %v5020_v3 = vld [vmem:[#allocation2 + $0x450] sm:$0xf0] }
 0x4a0   :  { %3217 = vmatpush.bf16.msra.mxu3 %v4751_v8  ;;  %v5263_v8 = vor.u32 %v5932_v63, %v5260_v5  ;;  %v4563_v63 = vor.u32 %v5759_v60, %v4562_v55  ;;  %v5976_v5 = vld [vmem:[#allocation2 + $0x784] sm:$0xf] }
 0x4a1   :  { %3232 = vmatmul.bf16.vlgmr.msrb.gmra.mxu2 %v6920_v17 }
 0x4a2   :  { %3263 = vmatpush.bf16.msra.mxu2 %v5359_v43  ;;  %v5872_v43 = vld [vmem:[#allocation2 + $0x444] sm:$0xf] }
 0x4a3   :  { %3205 = vmatpush.bf16.msra.mxu1 %v4607_v24  ;;  %v5023_v9 = vor.u32 %v5872_v43, %v5020_v3  ;;  %v5132_v24 = vld [vmem:[#allocation2 + $0x530] sm:$0xf0]  ;;  %v4546_v43 = vld [vmem:[#allocation2 + $0x88] sm:$0xf]  ;;  %v5755_v3 = vld [vmem:[#allocation2 + $0x94] sm:$0xf0] }
 0x4a4   :  { %3218 = vmatpush.bf16.msra.mxu3 %v4735_v25  ;;  %v5247_v25 = vor.u32 %v5928_v10, %v5244_v12  ;;  %v4547_v10 = vor.u32 %v5755_v3, %v4546_v43  ;;  %v5972_v12 = vld [vmem:[#allocation2 + $0x764] sm:$0xf] }
 0x4a6   :  { %3264 = vmatpush.bf16.msra.mxu2 %v5343_v22  ;;  %3206 = vmatmul.bf16.vlgmr.msra.gmra.mxu1 %v6901_v28  ;;  %v5900_v22 = vld [vmem:[#allocation2 + $0x524] sm:$0xf] }
 0x4a7   :  { %3237 = vmatpush.bf16.msrb.mxu1 %v5103_v26  ;;  %3219 = vmatmul.bf16.vlgmr.msra.gmra.mxu3 %v6893_v7  ;;  %v4723_v26 = vor.u32 %v5799_v16, %v4722_v13  ;;  %v5135_v33 = vor.u32 %v5900_v22, %v5132_v24  ;;  %v5420_v13 = vld [vmem:[#allocation2 + $0x770] sm:$0xf0]  ;;  %v5751_v16 = vld [vmem:[#allocation2 + $0x74] sm:$0xf0]  ;;  %v4626_v22 = vld [vmem:[#allocation2 + $0x128] sm:$0xf] }
 0x4a8   :  { %3250 = vmatpush.bf16.msrb.mxu3 %v5231_v31  ;;  %v5795_v31 = vld [vmem:[#allocation2 + $0x1d4] sm:$0xf0]  ;;  %v5423_v21 = vor.u32 %v5972_v12, %v5420_v13  ;;  %v4946_v12 = vld [vmem:[#allocation2 + $0x3a8] sm:$0xf] }
 0x4a9   :  { %v4707_v39 = vor.u32 %v5795_v31, %v4706_v30  ;;  %v5775_v24 = vld [vmem:[#allocation2 + $0x134] sm:$0xf0]  ;;  %v4514_v30 = vld [vmem:[#allocation2 + $0x48] sm:$0xf] }
 0x4aa   :  { %3265 = vmatpush.bf16.msra.mxu2 %v5327_v0  ;;  %v5116_v0 = vld [vmem:[#allocation2 + $0x510] sm:$0xf0]  ;;  %v5747_v31 = vld [vmem:[#allocation2 + $0x54] sm:$0xf0] }
 0x4ab   :  { %3238 = vmatpush.bf16.msrb.mxu1 %v5087_v36  ;;  %v5988_v36 = vld [vmem:[#allocation2 + $0x7e4] sm:$0xf]  ;;  %v5119_v40 = vor.u32 %v5896_v46, %v5116_v0  ;;  %v5771_v46 = vld [vmem:[#allocation2 + $0x114] sm:$0xf0]  ;;  %v5106_v0 = vld [vmem:[#allocation2 + $0x4e8] sm:$0xf] }
 0x4ac   :  { %3251 = vmatpush.bf16.msrb.mxu3 %v5215_v44  ;;  %v5767_v44 = vld [vmem:[#allocation2 + $0xf4] sm:$0xf0]  ;;  %v5487_v48 = vor.u32 %v5988_v36, %v5484_v41  ;;  %v4515_v36 = vor.u32 %v5747_v31, %v4514_v30  ;;  %v6956_v30 = vld [vmem:[%s7189_s10] sm:$0xf] }
 0x4ad   :  { %v4595_v50 = vor.u32 %v5767_v44, %v4594_v37  ;;  %v5895_v41 = vld [vmem:[#allocation2 + $0x4f4] sm:$0xf0]  ;;  %v5964_v37 = vld [vmem:[#allocation2 + $0x724] sm:$0xf]  ;;  %v5388_v44 = vld [vmem:[#allocation2 + $0x730] sm:$0xf0] }
 0x4ae   :  { %3266 = vmatpush.bf16.msra.mxu2 %v5311_v18  ;;  %v4690_v18 = vld [vmem:[#allocation2 + $0x1a8] sm:$0xf]  ;;  %v5855_v13 = vld [vmem:[#allocation2 + $0x3b4] sm:$0xf0] }
 0x4af   :  { %3239 = vmatpush.bf16.msrb.mxu1 %v5071_v42  ;;  %v5791_v42 = vld [vmem:[#allocation2 + $0x1b4] sm:$0xf0] }
 0x4b0   :  { %3252 = vmatpush.bf16.msrb.mxu3 %v5199_v51  ;;  %v5468_v51 = vld [vmem:[#allocation2 + $0x7d0] sm:$0xf0]  ;;  %v4691_v49 = vor.u32 %v5791_v42, %v4690_v18  ;;  %v5391_v18 = vor.u32 %v5964_v37, %v5388_v44  ;;  %v5090_v42 = vld [vmem:[#allocation2 + $0x4c8] sm:$0xf]  ;;  %v5815_v37 = vld [vmem:[#allocation2 + $0x274] sm:$0xf0] }
 0x4b1   :  { %v5471_v38 = vor.u32 %v5984_v45, %v5468_v51  ;;  %v5960_v51 = vld [vmem:[#allocation2 + $0x704] sm:$0xf]  ;;  %v1793_v44 = vperm.slane %v6956_v30, 0 }
 0x4b2   :  { %3267 = vmatpush.bf16.msra.mxu2 %v5295_v52  ;;  %v4674_v52 = vld [vmem:[#allocation2 + $0x188] sm:$0xf] }
 0x4b3   :  { %3240 = vmatpush.bf16.msrb.mxu1 %v5055_v53  ;;  %v5787_v53 = vld [vmem:[#allocation2 + $0x194] sm:$0xf0] }
 0x4b4   :  { %3253 = vmatpush.bf16.msrb.mxu3 %v5183_v32  ;;  %v5452_v32 = vld [vmem:[#allocation2 + $0x7b0] sm:$0xf0]  ;;  %v4675_v56 = vor.u32 %v5787_v53, %v4674_v52  ;;  %v5831_v52 = vld [vmem:[#allocation2 + $0x2f4] sm:$0xf0]  ;;  %v4978_v53 = vld [vmem:[#allocation2 + $0x3e8] sm:$0xf] }
 0x4b5   :  { %v5455_v58 = vor.u32 %v5980_v54, %v5452_v32  ;;  %v5375_v32 = vor.u32 %v5960_v51, %v5372_v1  ;;  %v5811_v51 = vld [vmem:[#allocation2 + $0x254] sm:$0xf0] }
 0x4b6   :  { %3268 = vmatpush.bf16.msra.mxu2 %v5279_v61  ;;  %v4658_v61 = vld [vmem:[#allocation2 + $0x168] sm:$0xf] }
 0x4b7   :  { %3241 = vmatpush.bf16.msrb.mxu1 %v5039_v62  ;;  %v5783_v62 = vld [vmem:[#allocation2 + $0x174] sm:$0xf0] }
 0x4b8   :  { %3254 = vmatpush.bf16.msrb.mxu3 %v5167_v2  ;;  %v5436_v2 = vld [vmem:[#allocation2 + $0x790] sm:$0xf0]  ;;  %v4659_v4 = vor.u32 %v5783_v62, %v4658_v61  ;;  %v4834_v62 = vld [vmem:[#allocation2 + $0x2c8] sm:$0xf] }
 0x4b9   :  { %v5439_v6 = vor.u32 %v5976_v5, %v5436_v2  ;;  %v4962_v5 = vld [vmem:[#allocation2 + $0x3c8] sm:$0xf]  ;;  %v5859_v2 = vld [vmem:[#allocation2 + $0x3d4] sm:$0xf0] }
 0x4ba   :  { %3269 = vmatpush.bf16.msra.mxu2 %v5263_v8  ;;  %v4642_v8 = vld [vmem:[#allocation2 + $0x148] sm:$0xf] }
 0x4bb   :  { %3242 = vmatpush.bf16.msrb.mxu1 %v5023_v9  ;;  %v5779_v9 = vld [vmem:[#allocation2 + $0x154] sm:$0xf0] }
 0x4bc   :  { %3255 = vmatpush.bf16.msrb.mxu3 %v5151_v14  ;;  %v4530_v14 = vld [vmem:[#allocation2 + $0x68] sm:$0xf]  ;;  %v4643_v20 = vor.u32 %v5779_v9, %v4642_v8  ;;  %v4963_v8 = vor.u32 %v5859_v2, %v4962_v5  ;;  %v5839_v2 = vld [vmem:[#allocation2 + $0x334] sm:$0xf0] }
 0x4bd   :  { %v4818_v9 = vld [vmem:[#allocation2 + $0x2a8] sm:$0xf] }
 0x4be   :  { %3270 = vmatpush.bf16.msra.mxu2 %v5247_v25  ;;  %v4531_v25 = vor.u32 %v5751_v16, %v4530_v14  ;;  %v4882_v5 = vld [vmem:[#allocation2 + $0x328] sm:$0xf] }
 0x4bf   :  { %3243 = vmatpush.bf16.msrb.mxu1 %v5007_v29  ;;  %v5404_v29 = vld [vmem:[#allocation2 + $0x750] sm:$0xf0] }
 0x4c0   :  { %3256 = vmatpush.bf16.msrb.mxu3 %v5135_v33  ;;  %v4627_v33 = vor.u32 %v5775_v24, %v4626_v22  ;;  %v4947_v22 = vor.u32 %v5855_v13, %v4946_v12  ;;  %v4802_v24 = vld [vmem:[#allocation2 + $0x288] sm:$0xf]  ;;  %v5803_v13 = vld [vmem:[#allocation2 + $0x214] sm:$0xf0] }
 0x4c1   :  { %3271 = vmatmul.bf16.vlgmr.msra.gmra.mxu2 %v6935_v11  ;;  %v4738_v12 = vld [vmem:[#allocation2 + $0x208] sm:$0xf] }
 0x4c2   :  { %3302 = vmatpush.bf16.msrb.mxu2 %v4723_v26  ;;  %v5968_v26 = vld [vmem:[#allocation2 + $0x744] sm:$0xf] }
 0x4c3   :  { %3244 = vmatpush.bf16.msrb.mxu1 %v4991_v47  ;;  %v5407_v34 = vor.u32 %v5968_v26, %v5404_v29  ;;  %v5743_v47 = vld [vmem:[#allocation2 + $0x34] sm:$0xf0]  ;;  %v4930_v26 = vld [vmem:[#allocation2 + $0x388] sm:$0xf] }
 0x4c4   :  { %3257 = vmatpush.bf16.msrb.mxu3 %v5119_v40  ;;  %v4611_v40 = vor.u32 %v5771_v46, %v4610_v35  ;;  %v5851_v29 = vld [vmem:[#allocation2 + $0x394] sm:$0xf0]  ;;  %v5026_v35 = vld [vmem:[#allocation2 + $0x448] sm:$0xf] }
 0x4c5   :  { %v5875_v46 = vld [vmem:[#allocation2 + $0x454] sm:$0xf0] }
 0x4c6   :  { %3303 = vmatpush.bf16.msrb.mxu2 %v4707_v39  ;;  %3245 = vmatmul.bf16.vlgmr.msrb.gmra.mxu1 %v6922_v19  ;;  %v4498_v39 = vld [vmem:[#allocation2 + $0x28] sm:$0xf] }
 0x4c7   :  { %3276 = vmatpush.bf16.msra.mxu1 %v5487_v48  ;;  %3258 = vmatmul.bf16.vlgmr.msrb.gmra.mxu3 %v6914_v57  ;;  %v5107_v48 = vor.u32 %v5895_v41, %v5106_v0  ;;  %v4499_v45 = vor.u32 %v5743_v47, %v4498_v39  ;;  %v4786_v41 = vld [vmem:[#allocation2 + $0x268] sm:$0xf]  ;;  %v5847_v47 = vld [vmem:[#allocation2 + $0x374] sm:$0xf0] }
 0x4c8   :  { %3289 = vmatpush.bf16.msra.mxu3 %v4595_v50  ;;  %v5891_v50 = vld [vmem:[#allocation2 + $0x4d4] sm:$0xf0]  ;;  %v4914_v39 = vld [vmem:[#allocation2 + $0x368] sm:$0xf] }
 0x4c9   :  { %v5091_v54 = vor.u32 %v5891_v50, %v5090_v42  ;;  %v5871_v42 = vld [vmem:[#allocation2 + $0x434] sm:$0xf0]  ;;  %v4915_v50 = vor.u32 %v5847_v47, %v4914_v39  ;;  %v5346_v39 = vld [vmem:[#allocation2 + $0x6c8] sm:$0xf] }
 0x4ca   :  { %3304 = vmatpush.bf16.msrb.mxu2 %v4691_v49  ;;  %v5739_v49 = vld [vmem:[#allocation2 + $0x14] sm:$0xf0] }
 0x4cb   :  { %3277 = vmatpush.bf16.msra.mxu1 %v5471_v38  ;;  %v4850_v38 = vld [vmem:[#allocation2 + $0x2e8] sm:$0xf]  ;;  %v4483_v55 = vor.u32 %v5739_v49, %v4482_v23  ;;  %v5843_v49 = vld [vmem:[#allocation2 + $0x354] sm:$0xf0] }
 0x4cc   :  { %3290 = vmatpush.bf16.msra.mxu3 %v4579_v59  ;;  %v5863_v59 = vld [vmem:[#allocation2 + $0x3f4] sm:$0xf0]  ;;  %v4851_v60 = vor.u32 %v5831_v52, %v4850_v38  ;;  %v4898_v23 = vld [vmem:[#allocation2 + $0x348] sm:$0xf] }
 0x4cd   :  { %v4979_v61 = vor.u32 %v5863_v59, %v4978_v53  ;;  %v5955_v47 = vld [vmem:[#allocation2 + $0x6d4] sm:$0xf0] }
 0x4ce   :  { %3305 = vmatpush.bf16.msrb.mxu2 %v4675_v56  ;;  %v5074_v56 = vld [vmem:[#allocation2 + $0x4a8] sm:$0xf] }
 0x4cf   :  { %3278 = vmatpush.bf16.msra.mxu1 %v5455_v58  ;;  %v5887_v58 = vld [vmem:[#allocation2 + $0x4b4] sm:$0xf0] }
 0x4d0   :  { %3291 = vmatpush.bf16.msra.mxu3 %v4563_v63  ;;  %v5827_v63 = vld [vmem:[#allocation2 + $0x2d4] sm:$0xf0]  ;;  %v5075_v43 = vor.u32 %v5887_v58, %v5074_v56  ;;  %v4899_v58 = vor.u32 %v5843_v49, %v4898_v23  ;;  %v5330_v49 = vld [vmem:[#allocation2 + $0x6a8] sm:$0xf] }
 0x4d1   :  { %v4835_v3 = vor.u32 %v5827_v63, %v4834_v62  ;;  %v4754_v62 = vld [vmem:[#allocation2 + $0x228] sm:$0xf]  ;;  %v5807_v63 = vld [vmem:[#allocation2 + $0x234] sm:$0xf0] }
 0x4d2   :  { %3306 = vmatpush.bf16.msrb.mxu2 %v4659_v4  ;;  %v5058_v4 = vld [vmem:[#allocation2 + $0x488] sm:$0xf] }
 0x4d3   :  { %3279 = vmatpush.bf16.msra.mxu1 %v5439_v6  ;;  %v5883_v6 = vld [vmem:[#allocation2 + $0x494] sm:$0xf0] }
 0x4d4   :  { %3292 = vmatpush.bf16.msra.mxu3 %v4547_v10  ;;  %v5823_v10 = vld [vmem:[#allocation2 + $0x2b4] sm:$0xf0]  ;;  %v5059_v14 = vor.u32 %v5883_v6, %v5058_v4  ;;  %v4755_v6 = vor.u32 %v5807_v63, %v4754_v62  ;;  %v5314_v62 = vld [vmem:[#allocation2 + $0x688] sm:$0xf] }
 0x4d5   :  { %v4819_v16 = vor.u32 %v5823_v10, %v4818_v9  ;;  %v5987_v9 = vld [vmem:[#allocation2 + $0x7d4] sm:$0xf0]  ;;  %v4883_v10 = vor.u32 %v5839_v2, %v4882_v5 }
 0x4d6   :  { %3307 = vmatpush.bf16.msrb.mxu2 %v4643_v20  ;;  %v5042_v20 = vld [vmem:[#allocation2 + $0x468] sm:$0xf]  ;;  %v5947_v63 = vld [vmem:[#allocation2 + $0x694] sm:$0xf0] }
 0x4d7   :  { %3280 = vmatpush.bf16.msra.mxu1 %v5423_v21  ;;  %v5879_v21 = vld [vmem:[#allocation2 + $0x474] sm:$0xf0] }
 0x4d8   :  { %3293 = vmatpush.bf16.msra.mxu3 %v4531_v25  ;;  %v5819_v25 = vld [vmem:[#allocation2 + $0x294] sm:$0xf0]  ;;  %v5043_v31 = vor.u32 %v5879_v21, %v5042_v20  ;;  %v5234_v20 = vld [vmem:[#allocation2 + $0x5e8] sm:$0xf] }
 0x4d9   :  { %v5927_v21 = vld [vmem:[#allocation2 + $0x5f4] sm:$0xf0] }
 0x4da   :  { %3308 = vmatpush.bf16.msrb.mxu2 %v4627_v33 }
 0x4db   :  { %3281 = vmatpush.bf16.msra.mxu1 %v5407_v34  ;;  %v4803_v34 = vor.u32 %v5819_v25, %v4802_v24  ;;  %v5362_v25 = vld [vmem:[#allocation2 + $0x6e8] sm:$0xf] }
 0x4dc   :  { %3294 = vmatpush.bf16.msra.mxu3 %v4515_v36  ;;  %v4931_v36 = vor.u32 %v5851_v29, %v4930_v26  ;;  %v5959_v26 = vld [vmem:[#allocation2 + $0x6f4] sm:$0xf0] }
 0x4de   :  { %3309 = vmatpush.bf16.msrb.mxu2 %v4611_v40  ;;  %v5027_v40 = vor.u32 %v5875_v46, %v5026_v35  ;;  %v5235_v46 = vor.u32 %v5927_v21, %v5234_v20 }
 0x4df   :  { %3282 = vmatpush.bf16.msra.mxu1 %v5391_v18  ;;  %v5010_v18 = vld [vmem:[#allocation2 + $0x428] sm:$0xf] }
 0x4e0   :  { %3295 = vmatpush.bf16.msra.mxu3 %v4499_v45  ;;  %v4770_v45 = vld [vmem:[#allocation2 + $0x248] sm:$0xf]  ;;  %v5011_v52 = vor.u32 %v5871_v42, %v5010_v18 }
 0x4e1   :  { %3310 = vmatmul.bf16.vlgmr.msrb.gmra.mxu2 %v6901_v28  ;;  %v5442_v42 = vld [vmem:[#allocation2 + $0x788] sm:$0xf] }
 0x4e2   :  { %3341 = vmatpush.bf16.msra.mxu2 %v5107_v48  ;;  %v4787_v48 = vor.u32 %v5815_v37, %v4786_v41  ;;  %v5363_v41 = vor.u32 %v5959_v26, %v5362_v25  ;;  %v5218_v37 = vld [vmem:[#allocation2 + $0x5c8] sm:$0xf] }
 0x4e3   :  { %3283 = vmatpush.bf16.msra.mxu1 %v5375_v32  ;;  %v3090_v33 = vpop.f32.mrf.mxu1  ;;  %v4994_v32 = vld [vmem:[#allocation2 + $0x408] sm:$0xf] }
 0x4e4   :  { %3296 = vmatpush.bf16.msra.mxu3 %v4483_v55  ;;  %v3116_v0 = vpop.f32.mrf.mxu2  ;;  %v3091_v1 = vadd.f32 %v3090_v33, %v1793_v44  ;;  %v5867_v55 = vld [vmem:[#allocation2 + $0x414] sm:$0xf0]  ;;  %v4739_v33 = vor.u32 %v5803_v13, %v4738_v12 }
 0x4e5   :  { %v5923_v44 = vld [vmem:[#allocation2 + $0x5d4] sm:$0xf0] }
 0x4e6   :  { %3342 = vmatpush.bf16.msra.mxu2 %v5091_v54  ;;  %3284 = vmatmul.bf16.vlgmr.msra.gmra.mxu1 %v6940_v15  ;;  %v4771_v54 = vor.u32 %v5811_v51, %v4770_v45  ;;  %v5219_v18 = vor.u32 %v5923_v44, %v5218_v37  ;;  %v5347_v45 = vor.u32 %v5955_v47, %v5346_v39  ;;  %v5202_v51 = vld [vmem:[#allocation2 + $0x5a8] sm:$0xf]  ;;  %v5911_v12 = vld [vmem:[#allocation2 + $0x574] sm:$0xf0] }
 0x4e7   :  { %3315 = vmatpush.bf16.msrb.mxu1 %v4851_v60  ;;  %3297 = vmatmul.bf16.vlgmr.msra.gmra.mxu3 %v6899_v27  ;;  %v5490_v60 = vld [vmem:[#allocation2 + $0x7e8] sm:$0xf]  ;;  %v5963_v47 = vld [vmem:[#allocation2 + $0x714] sm:$0xf0] }
 0x4e8   :  { %3328 = vmatpush.bf16.msrb.mxu3 %v4979_v61  ;;  %v5991_v61 = vld [vmem:[#allocation2 + $0x7f4] sm:$0xf0]  ;;  %v5378_v39 = vld [vmem:[#allocation2 + $0x708] sm:$0xf] }
 0x4e9   :  { %v5491_v4 = vor.u32 %v5991_v61, %v5490_v60  ;;  %v5975_v60 = vld [vmem:[#allocation2 + $0x774] sm:$0xf0] }
 0x4ea   :  { %3343 = vmatpush.bf16.msra.mxu2 %v5075_v43  ;;  %v3103_v38 = vpop.f32.mrf.mxu3  ;;  %v5915_v61 = vld [vmem:[#allocation2 + $0x594] sm:$0xf0] }
 0x4eb   :  { %3316 = vmatpush.bf16.msrb.mxu1 %v4835_v3  ;;  %v3104_v53 = vadd.f32 %v3103_v38, %v3091_v1  ;;  %v3092_v59 = vpop.f32.mrf.mxu1  ;;  %v4995_v3 = vor.u32 %v5867_v55, %v4994_v32  ;;  %v5919_v1 = vld [vmem:[#allocation2 + $0x5b4] sm:$0xf0]  ;;  %v5426_v55 = vld [vmem:[#allocation2 + $0x768] sm:$0xf] }
 0x4ec   :  { %3329 = vmatpush.bf16.msrb.mxu3 %v4963_v8  ;;  %v3118_v56 = vpop.f32.mrf.mxu2  ;;  %v5474_v8 = vld [vmem:[#allocation2 + $0x7c8] sm:$0xf]  ;;  %v5951_v38 = vld [vmem:[#allocation2 + $0x6b4] sm:$0xf0]  ;;  %v5203_v32 = vor.u32 %v5919_v1, %v5202_v51  ;;  %v5427_v2 = vor.u32 %v5975_v60, %v5426_v55  ;;  %v5825_v55 = vld [vmem:[#allocation2 + $0x2cc] sm:$0xf] }
 0x4ed   :  { %v6959_v43 = vadd.f32 %v3116_v0, %v3104_v53  ;;  %v5458_v0 = vld [vmem:[#allocation2 + $0x7a8] sm:$0xf]  ;;  %v5331_v56 = vor.u32 %v5951_v38, %v5330_v49  ;;  %v5903_v51 = vld [vmem:[#allocation2 + $0x534] sm:$0xf0]  ;;  %v4836_v60 = vld [vmem:[#allocation2 + $0x2d8] sm:$0xf0] }
 0x4ee   :  { %3344 = vmatpush.bf16.msra.mxu2 %v5059_v14  ;;  %v4866_v14 = vld [vmem:[#allocation2 + $0x308] sm:$0xf]  ;;  %v5935_v49 = vld [vmem:[#allocation2 + $0x634] sm:$0xf0] }
 0x4ef   :  { %3317 = vmatpush.bf16.msrb.mxu1 %v4819_v16  ;;  %v5835_v16 = vld [vmem:[#allocation2 + $0x314] sm:$0xf0] }
 0x4f0   :  { %3330 = vmatpush.bf16.msrb.mxu3 %v4947_v22  ;;  %v6082_v22 = vmov 1.4142135   ;;  %v4867_v35 = vor.u32 %v5835_v16, %v4866_v14  ;;  %v5298_v14 = vld [vmem:[#allocation2 + $0x668] sm:$0xf]  ;;  %v5943_v16 = vld [vmem:[#allocation2 + $0x674] sm:$0xf0] }
 0x4f1   :  { %6040 = vrcp.f32 %v6082_v22 }
 0x4f2   :  { %3345 = vmatpush.bf16.msra.mxu2 %v5043_v31  ;;  %v3105_v24 = vpop.f32.mrf.mxu3  ;;  %v5475_v31 = vor.u32 %v5987_v9, %v5474_v8  ;;  %v5315_v9 = vor.u32 %v5947_v63, %v5314_v62  ;;  %v5250_v62 = vld [vmem:[#allocation2 + $0x608] sm:$0xf]  ;;  %v5931_v63 = vld [vmem:[#allocation2 + $0x614] sm:$0xf0] }
 0x4f3   :  { %3318 = vmatpush.bf16.msrb.mxu1 %v4803_v34  ;;  %v3129_v29 = vpop.f32.mrf.mxu1 }
 0x4f4   :  { %3331 = vmatpush.bf16.msrb.mxu3 %v4931_v36  ;;  %v6961_v34 = vpop.f32.mrf.mxu2  ;;  %v5983_v36 = vld [vmem:[#allocation2 + $0x7b4] sm:$0xf0]  ;;  %v3130_v8 = vadd.f32 %v3129_v29, %v6959_v43  ;;  %v5299_v43 = vor.u32 %v5943_v16, %v5298_v14  ;;  %v5154_v29 = vld [vmem:[#allocation2 + $0x548] sm:$0xf]  ;;  %v5821_v14 = vld [vmem:[#allocation2 + $0x2ac] sm:$0xf] }
 0x4f5   :  { %v4820_v16 = vld [vmem:[#allocation2 + $0x2b8] sm:$0xf0] }
 0x4f6   :  { %3346 = vmatpush.bf16.msra.mxu2 %v5027_v40 }
 0x4f7   :  { %3319 = vmatpush.bf16.msrb.mxu1 %v4787_v48  ;;  %v6964_v40 = vpop.eup %6040  ;;  %v5459_v48 = vor.u32 %v5983_v36, %v5458_v0  ;;  %v5282_v0 = vld [vmem:[#allocation2 + $0x648] sm:$0xf]  ;;  %v5939_v36 = vld [vmem:[#allocation2 + $0x654] sm:$0xf0] }
 0x4f8   :  { %3332 = vmatpush.bf16.msrb.mxu3 %v4915_v50  ;;  %v5979_v50 = vld [vmem:[#allocation2 + $0x794] sm:$0xf0]  ;;  %vm3506_vm0 = vweird.f32 %v6964_v40 }
 0x4f9   :  { %v5443_v59 = vor.u32 %v5979_v50, %v5442_v42  ;;  %v5283_v42 = vor.u32 %v5939_v36, %v5282_v0  ;;  %v4852_v50 = vld [vmem:[#allocation2 + $0x2f8] sm:$0xf0] }
 0x4fa   :  { %3347 = vmatpush.bf16.msra.mxu2 %v5011_v52  ;;  %v3142_v23 = vpop.f32.mrf.mxu3  ;;  %v3502_v52 = vmul.f32 1.4142135, %v6964_v40  ;;  %v4804_v0 = vld [vmem:[#allocation2 + $0x298] sm:$0xf0] }
 0x4fb   :  { %3320 = vmatpush.bf16.msrb.mxu1 %v4771_v54  ;;  %v3131_v53 = vpop.f32.mrf.mxu1  ;;  %v3143_v21 = vadd.f32 %v3142_v23, %v3130_v8  ;;  %v4839_v8 = vor.u32 %v5825_v55, %v4836_v60  ;;  %v5749_v60 = vld [vmem:[#allocation2 + $0x6c] sm:$0xf] }
 0x4fc   :  { %3333 = vmatpush.bf16.msrb.mxu3 %v4899_v58  ;;  %v3157_v54 = vpop.f32.mrf.mxu2  ;;  %v5186_v58 = vld [vmem:[#allocation2 + $0x588] sm:$0xf]  ;;  %v3503_v5 = vsub.f32 1.0, %v3502_v52  ;;  %v5379_v53 = vor.u32 %v5963_v47, %v5378_v39  ;;  %v4692_v39 = vld [vmem:[#allocation2 + $0x1b8] sm:$0xf0] }
 0x4fe   :  { %3348 = vmatpush.bf16.msra.mxu2 %v4995_v3  ;;  %v5187_v3 = vor.u32 %v5915_v61, %v5186_v58  ;;  %v3504_v20 = vmul.f32 %v6964_v40, %v3503_v5  ;;  %v5122_v58 = vld [vmem:[#allocation2 + $0x508] sm:$0xf]  ;;  %v5899_v61 = vld [vmem:[#allocation2 + $0x514] sm:$0xf0]  ;;  %v5765_v5 = vld [vmem:[#allocation2 + $0xec] sm:$0xf] }
 0x4ff   :  { %3321 = vmatpush.bf16.msrb.mxu1 %v4755_v6  ;;  %v5971_v6 = vld [vmem:[#allocation2 + $0x754] sm:$0xf0] }
 0x500   :  { %3334 = vmatpush.bf16.msrb.mxu3 %v4883_v10  ;;  %v5170_v10 = vld [vmem:[#allocation2 + $0x568] sm:$0xf] }
 0x501   :  { %3349 = vmatmul.bf16.vlgmr.msra.gmra.mxu2 %v6922_v19  ;;  %v5171_v26 = vor.u32 %v5911_v12, %v5170_v10  ;;  %v5251_v12 = vor.u32 %v5931_v63, %v5250_v62 }
 0x502   :  { %3380 = vmatpush.bf16.msrb.mxu2 %v5491_v4  ;;  %v5410_v4 = vld [vmem:[#allocation2 + $0x748] sm:$0xf]  ;;  %v3144_v13 = vpop.f32.mrf.mxu3 }
 0x503   :  { %3322 = vmatpush.bf16.msrb.mxu1 %v4739_v33  ;;  %v3168_v22 = vpop.f32.mrf.mxu1  ;;  %v5411_v24 = vor.u32 %v5971_v6, %v5410_v4  ;;  %v5967_v33 = vld [vmem:[#allocation2 + $0x734] sm:$0xf0]  ;;  %v5797_v4 = vld [vmem:[#allocation2 + $0x1ec] sm:$0xf]  ;;  %v4724_v6 = vld [vmem:[#allocation2 + $0x1f8] sm:$0xf0] }
 0x504   :  { %3335 = vmatpush.bf16.msrb.mxu3 %v4867_v35  ;;  %v6971_v25 = vpop.f32.mrf.mxu2  ;;  %v5907_v35 = vld [vmem:[#allocation2 + $0x554] sm:$0xf0] }
 0x505   :  { %v5155_v44 = vor.u32 %v5907_v35, %v5154_v29 }
 0x506   :  { %3381 = vmatpush.bf16.msrb.mxu2 %v5475_v31  ;;  %3323 = vmatmul.bf16.vlgmr.msrb.gmra.mxu1 %v6893_v7  ;;  %v5394_v31 = vld [vmem:[#allocation2 + $0x728] sm:$0xf] }
 0x507   :  { %3354 = vmatpush.bf16.msra.mxu1 %v5235_v46  ;;  %3336 = vmatmul.bf16.vlgmr.msrb.gmra.mxu3 %v6920_v17  ;;  %v3505_v46 = vadd.f32 %v6964_v40, %v3504_v20  ;;  %v5395_v37 = vor.u32 %v5967_v33, %v5394_v31  ;;  %v5793_v31 = vld [vmem:[#allocation2 + $0x1cc] sm:$0xf]  ;;  %v4708_v33 = vld [vmem:[#allocation2 + $0x1d8] sm:$0xf0] }
 0x508   :  { %3367 = vmatpush.bf16.msra.mxu3 %v5363_v41  ;;  %v3156_v41 = vadd.f32 %v6961_v34, %v3143_v21  ;;  %v5266_v34 = vld [vmem:[#allocation2 + $0x628] sm:$0xf]  ;;  %v4727_v21 = vor.u32 %v5797_v4, %v4724_v6  ;;  %v4711_v36 = vor.u32 %v5793_v31, %v4708_v33  ;;  %v5805_v4 = vld [vmem:[#allocation2 + $0x22c] sm:$0xf]  ;;  %v4756_v6 = vld [vmem:[#allocation2 + $0x238] sm:$0xf0] }
 0x509   :  { %v6977_v23 = vsel %vm3506_vm0, %v6964_v40, %v3505_v46  ;;  %v5267_v40 = vor.u32 %v5935_v49, %v5266_v34  ;;  %v5817_v46 = vld [vmem:[#allocation2 + $0x28c] sm:$0xf]  ;;  %v4676_v49 = vld [vmem:[#allocation2 + $0x198] sm:$0xf0] }
 0x50a   :  { %3382 = vmatpush.bf16.msrb.mxu2 %v5459_v48  ;;  %v5829_v48 = vld [vmem:[#allocation2 + $0x2ec] sm:$0xf]  ;;  %v3181_v1 = vpop.f32.mrf.mxu3  ;;  %v5236_v33 = vld [vmem:[#allocation2 + $0x5f8] sm:$0xf0] }
 0x50b   :  { %3355 = vmatpush.bf16.msra.mxu1 %v5219_v18  ;;  %v3169_v18 = vadd.f32 %v3168_v22, %v3156_v41  ;;  %v3170_v52 = vpop.f32.mrf.mxu1  ;;  %v4855_v54 = vor.u32 %v5829_v48, %v4852_v50  ;;  %v5761_v22 = vld [vmem:[#allocation2 + $0xcc] sm:$0xf]  ;;  %v4807_v48 = vor.u32 %v5817_v46, %v4804_v0  ;;  %v4788_v50 = vld [vmem:[#allocation2 + $0x278] sm:$0xf0] }
 0x50c   :  { %3368 = vmatpush.bf16.msra.mxu3 %v5347_v45  ;;  %v5138_v45 = vld [vmem:[#allocation2 + $0x528] sm:$0xf]  ;;  %v5757_v41 = vld [vmem:[#allocation2 + $0xac] sm:$0xf]  ;;  %v4628_v0 = vld [vmem:[#allocation2 + $0x138] sm:$0xf0] }
 0x50d   :  { %v6979_v38 = vadd.f32 %v3181_v1, %v3169_v18  ;;  %v4548_v1 = vld [vmem:[#allocation2 + $0x98] sm:$0xf0]  ;;  %v5785_v34 = vld [vmem:[#allocation2 + $0x18c] sm:$0xf] }
 0x50e   :  { %3383 = vmatpush.bf16.msrb.mxu2 %v5443_v59  ;;  %v3196_v59 = vpop.f32.mrf.mxu2  ;;  %v4679_v55 = vor.u32 %v5785_v34, %v4676_v49  ;;  %v5773_v46 = vld [vmem:[#allocation2 + $0x12c] sm:$0xf]  ;;  %v4980_v49 = vld [vmem:[#allocation2 + $0x3f8] sm:$0xf0] }
 0x50f   :  { %3356 = vmatpush.bf16.msra.mxu1 %v5203_v32  ;;  %v5139_v32 = vor.u32 %v5903_v51, %v5138_v45  ;;  %v5753_v51 = vld [vmem:[#allocation2 + $0x8c] sm:$0xf] }
 0x510   :  { %3369 = vmatpush.bf16.msra.mxu3 %v5331_v56  ;;  %v6983_v56 = vmul.f32 %v6977_v23, %v6979_v38  ;;  %v4551_v59 = vor.u32 %v5753_v51, %v4548_v1  ;;  %v5769_v51 = vld [vmem:[#allocation2 + $0x10c] sm:$0xf]  ;;  %v4612_v1 = vld [vmem:[#allocation2 + $0x118] sm:$0xf0] }
 0x511   :  { %v5861_v34 = vld [vmem:[#allocation2 + $0x3ec] sm:$0xf] }
 0x512   :  { %3384 = vmatpush.bf16.msrb.mxu2 %v5427_v2  ;;  %v4596_v2 = vld [vmem:[#allocation2 + $0xf8] sm:$0xf0]  ;;  %v3183_v20 = vpop.f32.mrf.mxu3 }
 0x513   :  { %3357 = vmatpush.bf16.msra.mxu1 %v5187_v3  ;;  %v3512_v3 = vmul.f32 %v6983_v56, %v6983_v56  ;;  %v4599_v13 = vor.u32 %v5765_v5, %v4596_v2  ;;  %v4759_v20 = vor.u32 %v5805_v4, %v4756_v6  ;;  %v4964_v4 = vld [vmem:[#allocation2 + $0x3d8] sm:$0xf0] }
 0x514   :  { %3370 = vmatpush.bf16.msra.mxu3 %v5315_v9  ;;  %v5123_v9 = vor.u32 %v5899_v61, %v5122_v58  ;;  %v5781_v58 = vld [vmem:[#allocation2 + $0x16c] sm:$0xf]  ;;  %v4660_v61 = vld [vmem:[#allocation2 + $0x178] sm:$0xf0] }
 0x515   :  { %v6987_v10 = vmin.f32 %v3512_v3, 16.0 }
 0x516   :  { %3385 = vmatpush.bf16.msrb.mxu2 %v5411_v24  ;;  %v4580_v24 = vld [vmem:[#allocation2 + $0xd8] sm:$0xf0] }
 0x517   :  { %3358 = vmatpush.bf16.msra.mxu1 %v5171_v26  ;;  %v3525_v26 = vmul.f32 3.8918573e-05, %v6987_v10  ;;  %v4583_v35 = vor.u32 %v5761_v22, %v4580_v24  ;;  %v5801_v22 = vld [vmem:[#allocation2 + $0x20c] sm:$0xf]  ;;  %v4740_v24 = vld [vmem:[#allocation2 + $0x218] sm:$0xf0] }
 0x518   :  { %3371 = vmatpush.bf16.msra.mxu3 %v5299_v43  ;;  %v4823_v43 = vor.u32 %v5821_v14, %v4820_v16  ;;  %v4644_v14 = vld [vmem:[#allocation2 + $0x158] sm:$0xf0] }
 0x519   :  { %v3526_v29 = vadd.f32 0.001143296, %v3525_v26  ;;  %v5925_v26 = vld [vmem:[#allocation2 + $0x5ec] sm:$0xf] }
 0x51a   :  { %3386 = vmatpush.bf16.msrb.mxu2 %v5395_v37  ;;  %v4564_v37 = vld [vmem:[#allocation2 + $0xb8] sm:$0xf0] }
 0x51b   :  { %3359 = vmatpush.bf16.msra.mxu1 %v5155_v44  ;;  %v5789_v44 = vld [vmem:[#allocation2 + $0x1ac] sm:$0xf]  ;;  %v3527_v47 = vmul.f32 %v3526_v29, %v6987_v10  ;;  %v4567_v18 = vor.u32 %v5757_v41, %v4564_v37  ;;  %v4500_v29 = vld [vmem:[#allocation2 + $0x38] sm:$0xf0]  ;;  %v4743_v37 = vor.u32 %v5801_v22, %v4740_v24 }
 0x51c   :  { %3372 = vmatpush.bf16.msra.mxu3 %v5283_v42  ;;  %v5813_v42 = vld [vmem:[#allocation2 + $0x26c] sm:$0xf]  ;;  %v4695_v45 = vor.u32 %v5789_v44, %v4692_v39  ;;  %v5239_v39 = vor.u32 %v5925_v26, %v5236_v33 }
 0x51d   :  { %v3528_v52 = vadd.f32 0.014752088, %v3527_v47  ;;  %v5853_v22 = vld [vmem:[#allocation2 + $0x3ac] sm:$0xf] }
 0x51e   :  { %3387 = vmatpush.bf16.msrb.mxu2 %v5379_v53  ;;  %v4791_v53 = vor.u32 %v5813_v42, %v4788_v50  ;;  %v4631_v42 = vor.u32 %v5773_v46, %v4628_v0  ;;  %v5737_v50 = vld [vmem:[#allocation2 + $0xc] sm:$0xf]  ;;  %v5172_v0 = vld [vmem:[#allocation2 + $0x578] sm:$0xf0] }
 0x51f   :  { %3360 = vmatpush.bf16.msra.mxu1 %v5139_v32  ;;  %v4772_v32 = vld [vmem:[#allocation2 + $0x258] sm:$0xf0]  ;;  %v3529_v62 = vmul.f32 %v3528_v52, %v6987_v10  ;;  %v5885_v26 = vld [vmem:[#allocation2 + $0x4ac] sm:$0xf] }
 0x520   :  { %3373 = vmatpush.bf16.msra.mxu3 %v5267_v40  ;;  %v4532_v40 = vld [vmem:[#allocation2 + $0x78] sm:$0xf0]  ;;  %v5909_v46 = vld [vmem:[#allocation2 + $0x56c] sm:$0xf] }
 0x521   :  { %3388 = vmatmul.bf16.vlgmr.msrb.gmra.mxu2 %v6940_v15  ;;  %v4535_v3 = vor.u32 %v5749_v60, %v4532_v40  ;;  %v3530_v16 = vadd.f32 0.112945676, %v3529_v62  ;;  %v4615_v60 = vor.u32 %v5769_v51, %v4612_v1  ;;  %v4983_v40 = vor.u32 %v5861_v34, %v4980_v49  ;;  %v5877_v51 = vld [vmem:[#allocation2 + $0x46c] sm:$0xf]  ;;  %v5044_v1 = vld [vmem:[#allocation2 + $0x478] sm:$0xf0] }
 0x522   :  { %3419 = vmatpush.bf16.msra.mxu2 %v4855_v54  ;;  %v5809_v54 = vld [vmem:[#allocation2 + $0x24c] sm:$0xf] }
 0x523   :  { %3361 = vmatpush.bf16.msra.mxu1 %v5123_v9  ;;  %v6995_v63 = vpop.f32.mrf.mxu1  ;;  %v4775_v5 = vor.u32 %v5809_v54, %v4772_v32  ;;  %v5745_v9 = vld [vmem:[#allocation2 + $0x4c] sm:$0xf]  ;;  %v3514_v54 = vmul.f32 2.1237322e-06, %v6987_v10 }
 0x524   :  { %3374 = vmatpush.bf16.msra.mxu3 %v5251_v12  ;;  %v6997_v2 = vpop.f32.mrf.mxu2  ;;  %v4516_v12 = vld [vmem:[#allocation2 + $0x58] sm:$0xf0] }
 0x526   :  { %3420 = vmatpush.bf16.msra.mxu2 %v4839_v8  ;;  %3362 = vmatmul.bf16.vlgmr.msra.gmra.mxu1 %v6914_v57  ;;  %v4663_v8 = vor.u32 %v5781_v58, %v4660_v61  ;;  %v5917_v58 = vld [vmem:[#allocation2 + $0x5ac] sm:$0xf]  ;;  %v5204_v61 = vld [vmem:[#allocation2 + $0x5b8] sm:$0xf0] }
 0x527   :  { %3393 = vmatpush.bf16.msrb.mxu1 %v4599_v13  ;;  %3375 = vmatmul.bf16.vlgmr.msra.gmra.mxu3 %v6935_v11  ;;  %v5777_v13 = vld [vmem:[#allocation2 + $0x14c] sm:$0xf] }
 0x528   :  { %3406 = vmatpush.bf16.msrb.mxu3 %v4727_v21  ;;  %v4519_v21 = vor.u32 %v5745_v9, %v4516_v12  ;;  %v4647_v31 = vor.u32 %v5777_v13, %v4644_v14  ;;  %v5092_v9 = vld [vmem:[#allocation2 + $0x4d8] sm:$0xf0]  ;;  %v3515_v12 = vadd.f32 0.00028619796, %v3514_v54  ;;  %v5207_v13 = vor.u32 %v5917_v58, %v5204_v61  ;;  %v5873_v61 = vld [vmem:[#allocation2 + $0x44c] sm:$0xf] }
 0x529   :  { %v4900_v58 = vld [vmem:[#allocation2 + $0x358] sm:$0xf0] }
 0x52a   :  { %3421 = vmatpush.bf16.msra.mxu2 %v4823_v43  ;;  %v5741_v43 = vld [vmem:[#allocation2 + $0x2c] sm:$0xf]  ;;  %v3516_v33 = vmul.f32 %v3515_v12, %v6987_v10 }
 0x52b   :  { %3394 = vmatpush.bf16.msrb.mxu1 %v4583_v35  ;;  %v6999_v35 = vpop.f32.mrf.mxu3  ;;  %v3209_v41 = vpop.f32.mrf.mxu1  ;;  %v4503_v47 = vor.u32 %v5741_v43, %v4500_v29 }
 0x52c   :  { %3407 = vmatpush.bf16.msrb.mxu3 %v4711_v36  ;;  %v3531_v36 = vmul.f32 %v3530_v16, %v6987_v10  ;;  %v3235_v44 = vpop.f32.mrf.mxu2  ;;  %v5913_v16 = vld [vmem:[#allocation2 + $0x58c] sm:$0xf] }
 0x52d   :  { %v5849_v41 = vld [vmem:[#allocation2 + $0x38c] sm:$0xf] }
 0x52e   :  { %3422 = vmatpush.bf16.msra.mxu2 %v4807_v48  ;;  %v5921_v48 = vld [vmem:[#allocation2 + $0x5cc] sm:$0xf]  ;;  %v3532_v52 = vadd.f32 0.4994258, %v3531_v36 }
 0x52f   :  { %3395 = vmatpush.bf16.msrb.mxu1 %v4567_v18  ;;  %v5220_v18 = vld [vmem:[#allocation2 + $0x5d8] sm:$0xf0]  ;;  %v5881_v44 = vld [vmem:[#allocation2 + $0x48c] sm:$0xf] }
 0x530   :  { %3408 = vmatpush.bf16.msrb.mxu3 %v4695_v45  ;;  %v4484_v45 = vld [vmem:[#allocation2 + $0x18] sm:$0xf0]  ;;  %v5223_v32 = vor.u32 %v5921_v48, %v5220_v18  ;;  %v3533_v6 = vmul.f32 %v3532_v52, %v6987_v10 }
 0x531   :  { %v5156_v18 = vld [vmem:[#allocation2 + $0x558] sm:$0xf0] }
 0x532   :  { %3423 = vmatpush.bf16.msra.mxu2 %v4791_v53  ;;  %v5893_v53 = vld [vmem:[#allocation2 + $0x4ec] sm:$0xf]  ;;  %v7005_v24 = vadd.f32 1.0, %v3533_v6 }
 0x533   :  { %3396 = vmatpush.bf16.msrb.mxu1 %v4551_v59  ;;  %v5108_v59 = vld [vmem:[#allocation2 + $0x4f8] sm:$0xf0]  ;;  %v3222_v62 = vpop.f32.mrf.mxu3 }
 0x534   :  { %3409 = vmatpush.bf16.msrb.mxu3 %v4679_v55  ;;  %v4487_v55 = vor.u32 %v5737_v50, %v4484_v45  ;;  %6042 = vrcp.f32 %v7005_v24  ;;  %v5845_v50 = vld [vmem:[#allocation2 + $0x36c] sm:$0xf]  ;;  %v4916_v45 = vld [vmem:[#allocation2 + $0x378] sm:$0xf0]  ;;  %vm3540_vm2 = vweird.f32 %v7005_v24 }
 0x535   :  { %v4919_v54 = vor.u32 %v5845_v50, %v4916_v45  ;;  %v5028_v62 = vld [vmem:[#allocation2 + $0x458] sm:$0xf0] }
 0x536   :  { %3424 = vmatpush.bf16.msra.mxu2 %v4775_v5  ;;  %v5111_v5 = vor.u32 %v5893_v53, %v5108_v59  ;;  %v5031_v12 = vor.u32 %v5873_v61, %v5028_v62 }
 0x537   :  { %3397 = vmatpush.bf16.msrb.mxu1 %v4535_v3  ;;  %v5857_v3 = vld [vmem:[#allocation2 + $0x3cc] sm:$0xf] }
 0x538   :  { %3410 = vmatpush.bf16.msrb.mxu3 %v4663_v8  ;;  %v5889_v8 = vld [vmem:[#allocation2 + $0x4cc] sm:$0xf]  ;;  %v4967_v14 = vor.u32 %v5857_v3, %v4964_v4 }
 0x53a   :  { %3425 = vmatpush.bf16.msra.mxu2 %v4759_v20  ;;  %v5188_v20 = vld [vmem:[#allocation2 + $0x598] sm:$0xf0]  ;;  %v7014_v53 = vpop.eup %6042 }
 0x53b   :  { %3398 = vmatpush.bf16.msrb.mxu1 %v4519_v21  ;;  %v5095_v21 = vor.u32 %v5889_v8, %v5092_v9  ;;  %v5191_v43 = vor.u32 %v5913_v16, %v5188_v20  ;;  %v3536_v3 = vmul.f32 %v7014_v53, %v7005_v24  ;;  %v5897_v8 = vld [vmem:[#allocation2 + $0x50c] sm:$0xf]  ;;  %v5124_v9 = vld [vmem:[#allocation2 + $0x518] sm:$0xf0]  ;;  %vm3541_vm1 = vweird.f32 %v7014_v53 }
 0x53c   :  { %3411 = vmatpush.bf16.msrb.mxu3 %v4647_v31  ;;  %v5076_v31 = vld [vmem:[#allocation2 + $0x4b8] sm:$0xf0]  ;;  %v5869_v20 = vld [vmem:[#allocation2 + $0x42c] sm:$0xf]  ;;  %vm7044_vm3 = vmor %vm3540_vm2, %vm3541_vm1 }
 0x53d   :  { %v5079_v36 = vor.u32 %v5885_v26, %v5076_v31  ;;  %v3537_v26 = vsub.f32 1.0, %v3536_v3  ;;  %v5332_v3 = vld [vmem:[#allocation2 + $0x6b8] sm:$0xf0] }
 0x53e   :  { %3426 = vmatpush.bf16.msra.mxu2 %v4743_v37  ;;  %v4932_v37 = vld [vmem:[#allocation2 + $0x398] sm:$0xf0] }
 0x53f   :  { %3399 = vmatpush.bf16.msrb.mxu1 %v4503_v47  ;;  %v5175_v47 = vor.u32 %v5909_v46, %v5172_v0  ;;  %v4935_v48 = vor.u32 %v5849_v41, %v4932_v37  ;;  %v4868_v41 = vld [vmem:[#allocation2 + $0x318] sm:$0xf0]  ;;  %v5865_v37 = vld [vmem:[#allocation2 + $0x40c] sm:$0xf] }
 0x540   :  { %3412 = vmatpush.bf16.msrb.mxu3 %v4631_v42 }
 0x541   :  { %3427 = vmatmul.bf16.vlgmr.msra.gmra.mxu2 %v6893_v7  ;;  %v4948_v7 = vld [vmem:[#allocation2 + $0x3b8] sm:$0xf0] }
 0x542   :  { %3458 = vmatpush.bf16.msrb.mxu2 %v5239_v39  ;;  %v4951_v29 = vor.u32 %v5853_v22, %v4948_v7  ;;  %v3517_v39 = vadd.f32 0.0036580483, %v3516_v33  ;;  %v1794_v22 = vperm.slane %v6956_v30, 1  ;;  %v5127_v33 = vor.u32 %v5897_v8, %v5124_v9  ;;  %v5957_v30 = vld [vmem:[#allocation2 + $0x6ec] sm:$0xf] }
 0x543   :  { %3400 = vmatpush.bf16.msrb.mxu1 %v4487_v55  ;;  %v7012_v49 = vpop.f32.mrf.mxu1  ;;  %v5140_v55 = vld [vmem:[#allocation2 + $0x538] sm:$0xf0] }
 0x544   :  { %3413 = vmatpush.bf16.msrb.mxu3 %v4615_v60  ;;  %v3518_v34 = vmul.f32 %v3517_v39, %v6987_v10  ;;  %v7016_v59 = vpop.f32.mrf.mxu2  ;;  %v5047_v60 = vor.u32 %v5877_v51, %v5044_v1  ;;  %v3195_v39 = vadd.f32 %v6971_v25, %v1794_v22  ;;  %v5460_v9 = vld [vmem:[#allocation2 + $0x7b8] sm:$0xf0] }
 0x546   :  { %3459 = vmatpush.bf16.msrb.mxu2 %v5223_v32  ;;  %3401 = vmatmul.bf16.vlgmr.msrb.gmra.mxu1 %v6899_v27  ;;  %v5060_v27 = vld [vmem:[#allocation2 + $0x498] sm:$0xf0]  ;;  %v5901_v32 = vld [vmem:[#allocation2 + $0x52c] sm:$0xf]  ;;  %v3208_v45 = vadd.f32 %v6995_v63, %v3195_v39  ;;  %v3546_v63 = vand.u32 2147483648, %v7005_v24 }
 0x547   :  { %3432 = vmatpush.bf16.msra.mxu1 %v4983_v40  ;;  %3414 = vmatmul.bf16.vlgmr.msrb.gmra.mxu3 %v6901_v28  ;;  %v5905_v28 = vld [vmem:[#allocation2 + $0x54c] sm:$0xf]  ;;  %v5063_v42 = vor.u32 %v5881_v44, %v5060_v27  ;;  %v5143_v4 = vor.u32 %v5901_v32, %v5140_v55  ;;  %v4996_v44 = vld [vmem:[#allocation2 + $0x418] sm:$0xf0] }
 0x548   :  { %3445 = vmatpush.bf16.msra.mxu3 %v5111_v5  ;;  %v5159_v52 = vor.u32 %v5905_v28, %v5156_v18  ;;  %v5841_v40 = vld [vmem:[#allocation2 + $0x34c] sm:$0xf]  ;;  %v3519_v5 = vadd.f32 0.05243302, %v3518_v34  ;;  %v5364_v27 = vld [vmem:[#allocation2 + $0x6f8] sm:$0xf0]  ;;  %v4999_v51 = vor.u32 %v5865_v37, %v4996_v44 }
 0x549   :  { %v4903_v6 = vor.u32 %v5841_v40, %v4900_v58  ;;  %v5989_v28 = vld [vmem:[#allocation2 + $0x7ec] sm:$0xf]  ;;  %v5492_v18 = vld [vmem:[#allocation2 + $0x7f8] sm:$0xf0]  ;;  %v5367_v1 = vor.u32 %v5957_v30, %v5364_v27 }
 0x54a   :  { %3460 = vmatpush.bf16.msrb.mxu2 %v5207_v13  ;;  %v5837_v13 = vld [vmem:[#allocation2 + $0x32c] sm:$0xf]  ;;  %v7020_v16 = vpop.f32.mrf.mxu3  ;;  %v3520_v7 = vmul.f32 %v3519_v5, %v6987_v10  ;;  %v5495_v25 = vor.u32 %v5989_v28, %v5492_v18  ;;  %v5476_v58 = vld [vmem:[#allocation2 + $0x7d8] sm:$0xf0] }
 0x54b   :  { %3433 = vmatpush.bf16.msra.mxu1 %v4967_v14  ;;  %v4884_v14 = vld [vmem:[#allocation2 + $0x338] sm:$0xf0]  ;;  %v3248_v31 = vpop.f32.mrf.mxu1  ;;  %v5985_v40 = vld [vmem:[#allocation2 + $0x7cc] sm:$0xf] }
 0x54c   :  { %3446 = vmatpush.bf16.msra.mxu3 %v5095_v21  ;;  %v5012_v21 = vld [vmem:[#allocation2 + $0x438] sm:$0xf0]  ;;  %v4887_v46 = vor.u32 %v5837_v13, %v4884_v14  ;;  %v5949_v5 = vld [vmem:[#allocation2 + $0x6ac] sm:$0xf]  ;;  %v5996_v13 = vld [vmem:[%s7190_s11 + $0x20] sm:$0xff] }
 0x54d   :  { %v5015_v0 = vor.u32 %v5869_v20, %v5012_v21  ;;  %v5335_v20 = vor.u32 %v5949_v5, %v5332_v3  ;;  %v5945_v21 = vld [vmem:[#allocation2 + $0x68c] sm:$0xf]  ;;  %v5995_v31 = vld [vmem:[%s7190_s11 + $0x18] sm:$0xff] }
 0x54e   :  { %3461 = vmatpush.bf16.msrb.mxu2 %v5191_v43  ;;  %v3274_v43 = vpop.f32.mrf.mxu2  ;;  %v5969_v28 = vld [vmem:[#allocation2 + $0x74c] sm:$0xf]  ;;  %v5412_v18 = vld [vmem:[#allocation2 + $0x758] sm:$0xf0] }
 0x54f   :  { %3434 = vmatpush.bf16.msra.mxu1 %v4951_v29  ;;  %v5999_v29 = vld [vmem:[%s7190_s11 + $0x38] sm:$0xff]  ;;  %v5961_v3 = vld [vmem:[#allocation2 + $0x70c] sm:$0xf] }
 0x550   :  { %3447 = vmatpush.bf16.msra.mxu3 %v5079_v36  ;;  %v5833_v36 = vld [vmem:[#allocation2 + $0x30c] sm:$0xf]  ;;  %v5252_v5 = vld [vmem:[#allocation2 + $0x618] sm:$0xf0] }
 0x551   :  { %v4871_v50 = vor.u32 %v5833_v36, %v4868_v41  ;;  %v5973_v36 = vld [vmem:[#allocation2 + $0x76c] sm:$0xf]  ;;  %v5994_v41 = vld [vmem:[%s7190_s11 + $0x10] sm:$0xff] }
 0x552   :  { %3462 = vmatpush.bf16.msrb.mxu2 %v5175_v47  ;;  %v3521_v47 = vadd.f32 0.18741608, %v3520_v7  ;;  %v3261_v34 = vpop.f32.mrf.mxu3 }
 0x553   :  { %3435 = vmatpush.bf16.msra.mxu1 %v4935_v48  ;;  %v3538_v48 = vmul.f32 %v7014_v53, %v3537_v26  ;;  %v5444_v26 = vld [vmem:[#allocation2 + $0x798] sm:$0xf0]  ;;  %v5933_v34 = vld [vmem:[#allocation2 + $0x62c] sm:$0xf] }
 0x554   :  { %3448 = vmatpush.bf16.msra.mxu3 %v5063_v42  ;;  %v5998_v42 = vld [vmem:[%s7190_s11 + $0x30] sm:$0xff]  ;;  %v3522_v32 = vmul.f32 %v3521_v47, %v6987_v10  ;;  %v3544_v10 = vand.u32 2147483647, %v7005_v24  ;;  %v5981_v24 = vld [vmem:[#allocation2 + $0x7ac] sm:$0xf] }
 0x555   :  { %v3539_v55 = vadd.f32 %v7014_v53, %v3538_v48  ;;  %v5937_v47 = vld [vmem:[#allocation2 + $0x64c] sm:$0xf]  ;;  %v5284_v48 = vld [vmem:[#allocation2 + $0x658] sm:$0xf0] }
 0x556   :  { %3463 = vmatpush.bf16.msrb.mxu2 %v5159_v52  ;;  %v5953_v52 = vld [vmem:[#allocation2 + $0x6cc] sm:$0xf]  ;;  %vm3545_vm4 = vcmp.eq.f32.partialorder %v3544_v10, 8.507059e+37 }
 0x557   :  { %3436 = vmatpush.bf16.msra.mxu1 %v4919_v54  ;;  %v5348_v54 = vld [vmem:[#allocation2 + $0x6d8] sm:$0xf0] }
 0x558   :  { %3449 = vmatpush.bf16.msra.mxu3 %v5047_v60  ;;  %v3221_v60 = vadd.f32 %v6999_v35, %v3208_v45  ;;  %v5351_v61 = vor.u32 %v5953_v52, %v5348_v54  ;;  %v5479_v35 = vor.u32 %v5985_v40, %v5476_v58  ;;  %v3497_v52 = vmul.f32 0.5, %v6979_v38  ;;  %v5992_v58 = vld [vmem:[%s7190_s11] sm:$0xff]  ;;  %v5929_v38 = vld [vmem:[#allocation2 + $0x60c] sm:$0xf] }
 0x55a   :  { %3464 = vmatpush.bf16.msrb.mxu2 %v5143_v4  ;;  %v3523_v4 = vadd.f32 1.1283791, %v3522_v32  ;;  %v3234_v8 = vadd.f32 %v6997_v2, %v3221_v60  ;;  %v5463_v2 = vor.u32 %v5981_v24, %v5460_v9  ;;  %v5396_v60 = vld [vmem:[#allocation2 + $0x738] sm:$0xf0] }
 0x55b   :  { %3437 = vmatpush.bf16.msra.mxu1 %v4903_v6  ;;  %v3543_v6 = vsel %vm7044_vm3, %v7014_v53, %v3539_v55  ;;  %v5965_v55 = vld [vmem:[#allocation2 + $0x72c] sm:$0xf] }
 0x55c   :  { %3450 = vmatpush.bf16.msra.mxu3 %v5031_v12  ;;  %v3547_v12 = vor.u32 1.1754944e-38, %v3546_v63  ;;  %v3247_v14 = vadd.f32 %v7012_v49, %v3234_v8  ;;  %v3524_v22 = vmul.f32 %v3523_v4, %v6983_v56  ;;  %v5428_v56 = vld [vmem:[#allocation2 + $0x778] sm:$0xf0] }
 0x55d   :  { %v5431_v39 = vor.u32 %v5973_v36, %v5428_v56  ;;  %v5380_v8 = vld [vmem:[#allocation2 + $0x718] sm:$0xf0] }
 0x55e   :  { %3465 = vmatpush.bf16.msrb.mxu2 %v5127_v33  ;;  %v3548_v53 = vsel %vm3545_vm4, %v3547_v12, %v3543_v6  ;;  %v3260_v7 = vadd.f32 %v7020_v16, %v3247_v14  ;;  %v5383_v14 = vor.u32 %v5961_v3, %v5380_v8  ;;  %v6015_v8 = vld [vmem:[%s7190_s11 + $0xb8] sm:$0xff] }
 0x55f   :  { %3438 = vmatpush.bf16.msra.mxu1 %v4887_v46  ;;  %v3549_v33 = vmul.f32 %v3548_v53, %v3524_v22  ;;  %v5300_v46 = vld [vmem:[#allocation2 + $0x678] sm:$0xf0]  ;;  %v6006_v22 = vld [vmem:[%s7190_s11 + $0x70] sm:$0xff] }
 0x560   :  { %3451 = vmatpush.bf16.msra.mxu3 %v5015_v0  ;;  %v3273_v0 = vadd.f32 %v7016_v59, %v3260_v7 }
 0x561   :  { %3466 = vmatmul.bf16.vlgmr.msrb.gmra.mxu2 %v6914_v57  ;;  %v5997_v57 = vld [vmem:[%s7190_s11 + $0x28] sm:$0xff]  ;;  %v5496_v37 = vclamps-f32 %v3549_v33, 1.0 }
 0x562   :  { %3944 = vmatpush.bf16.msra.mxu2 %v5999_v29  ;;  %v5941_v29 = vld [vmem:[#allocation2 + $0x66c] sm:$0xf] }
 0x563   :  { %3439 = vmatpush.bf16.msra.mxu1 %v4871_v50  ;;  %v3285_v16 = vpop.f32.mrf.mxu1  ;;  %v5303_v27 = vor.u32 %v5941_v29, %v5300_v46  ;;  %v3672_v50 = vadd.f32 1.0, %v5496_v37  ;;  %v6004_v29 = vld [vmem:[%s7190_s11 + $0x60] sm:$0xff] }
 0x564   :  { %3452 = vmatpush.bf16.msra.mxu3 %v4999_v51  ;;  %v7067_v44 = vadd.f32 %v3285_v16, %v3273_v0  ;;  %v7069_v30 = vpop.f32.mrf.mxu2  ;;  %v5287_v51 = vor.u32 %v5937_v47, %v5284_v48  ;;  %v6002_v16 = vld [vmem:[%s7190_s11 + $0x50] sm:$0xff] }
 0x565   :  { %v3676_v63 = vmul.f32 %v3672_v50, %v3497_v52 }
 0x566   :  { %3945 = vmatpush.bf16.msra.mxu2 %v5998_v42  ;;  %3440 = vmatmul.bf16.vlgmr.msra.gmra.mxu1 %v6920_v17  ;;  %v5316_v17 = vld [vmem:[#allocation2 + $0x698] sm:$0xf0]  ;;  %v7073_v59 = vmul.f32 %v6977_v23, %v7067_v44  ;;  %v5993_v42 = vld [vmem:[%s7190_s11 + $0x8] sm:$0xff] }
 0x567   :  { %3471 = vmatpush.bf16.msrb.mxu1 %v5367_v1  ;;  %3453 = vmatmul.bf16.vlgmr.msra.gmra.mxu3 %v6922_v19  ;;  %v5977_v19 = vld [vmem:[#allocation2 + $0x78c] sm:$0xf]  ;;  %v5319_v49 = vor.u32 %v5945_v21, %v5316_v17  ;;  %v5415_v1 = vor.u32 %v5969_v28, %v5412_v18  ;;  %v3680_v24 = vpack.c.bf16 %v3676_v63, %v3676_v63 }
 0x568   :  { %3484 = vmatpush.bf16.msrb.mxu3 %v5495_v25  ;;  %v5447_v43 = vor.u32 %v5977_v19, %v5444_v26  ;;  %v3552_v45 = vmul.f32 %v7073_v59, %v7073_v59  ;;  %v5268_v25 = vld [vmem:[#allocation2 + $0x638] sm:$0xf0]  ;;  %v6001_v18 = vld [vmem:[%s7190_s11 + $0x48] sm:$0xff] }
 0x569   :  { %v5271_v62 = vor.u32 %v5933_v34, %v5268_v25  ;;  %v6000_v34 = vld [vmem:[%s7190_s11 + $0x40] sm:$0xff] }
 0x56a   :  { %3946 = vmatpush.bf16.msra.mxu2 %v5997_v57  ;;  %v3553_v54 = vmin.f32 %v3552_v45, 16.0  ;;  %v7081_v32 = vpop.f32.mrf.mxu3 }
 0x56b   :  { %3472 = vmatpush.bf16.msrb.mxu1 %v5351_v61  ;;  %v3287_v40 = vpop.f32.mrf.mxu1 }
 0x56c   :  { %3485 = vmatpush.bf16.msrb.mxu3 %v5479_v35  ;;  %v3554_v57 = vmul.f32 2.1237322e-06, %v3553_v54  ;;  %v3565_v10 = vmul.f32 3.8918573e-05, %v3553_v54  ;;  %v3313_v61 = vpop.f32.mrf.mxu2  ;;  %v5399_v35 = vor.u32 %v5965_v55, %v5396_v60 }
 0x56e   :  { %3947 = vmatpush.bf16.msra.mxu2 %v5996_v13  ;;  %v3555_v4 = vadd.f32 0.00028619796, %v3554_v57  ;;  %v3566_v6 = vadd.f32 0.001143296, %v3565_v10  ;;  %v5255_v13 = vor.u32 %v5929_v38, %v5252_v5  ;;  %v3498_v10 = vmul.f32 0.5, %v7067_v44  ;;  %v6014_v44 = vld [vmem:[%s7190_s11 + $0xb0] sm:$0xff] }
 0x56f   :  { %3473 = vmatpush.bf16.msrb.mxu1 %v5335_v20  ;;  %v6007_v20 = vld [vmem:[%s7190_s11 + $0x78] sm:$0xff] }
 0x570   :  { %3486 = vmatpush.bf16.msrb.mxu3 %v5463_v2  ;;  %v3556_v9 = vmul.f32 %v3555_v4, %v3553_v54  ;;  %v3567_v12 = vmul.f32 %v3566_v6, %v3553_v54 }
 0x572   :  { %3948 = vmatpush.bf16.msra.mxu2 %v5995_v31  ;;  %v3568_v53 = vadd.f32 0.014752088, %v3567_v12  ;;  %v3300_v2 = vpop.f32.mrf.mxu3  ;;  %v3557_v21 = vadd.f32 0.0036580483, %v3556_v9  ;;  %v6005_v31 = vld [vmem:[%s7190_s11 + $0x68] sm:$0xff] }
 0x573   :  { %3474 = vmatpush.bf16.msrb.mxu1 %v5319_v49  ;;  %v6012_v2 = vld [vmem:[%s7190_s11 + $0xa0] sm:$0xff] }
 0x574   :  { %3487 = vmatpush.bf16.msrb.mxu3 %v5447_v43  ;;  %v3569_v17 = vmul.f32 %v3568_v53, %v3553_v54  ;;  %v3558_v19 = vmul.f32 %v3557_v21, %v3553_v54 }
 0x576   :  { %3949 = vmatpush.bf16.msra.mxu2 %v5994_v41  ;;  %v3570_v7 = vadd.f32 0.112945676, %v3569_v17  ;;  %v3559_v49 = vadd.f32 0.05243302, %v3558_v19 }
 0x577   :  { %3475 = vmatpush.bf16.msrb.mxu1 %v5303_v27 }
 0x578   :  { %3488 = vmatpush.bf16.msrb.mxu3 %v5431_v39  ;;  %v3571_v26 = vmul.f32 %v3570_v7, %v3553_v54  ;;  %v3560_v0 = vmul.f32 %v3559_v49, %v3553_v54  ;;  %v6011_v7 = vld [vmem:[%s7190_s11 + $0x98] sm:$0xff]  ;;  %v6010_v49 = vld [vmem:[%s7190_s11 + $0x90] sm:$0xff] }
 0x57a   :  { %3950 = vmatpush.bf16.msra.mxu2 %v5993_v42  ;;  %v3572_v33 = vadd.f32 0.4994258, %v3571_v26  ;;  %v3561_v56 = vadd.f32 0.18741608, %v3560_v0 }
 0x57b   :  { %3476 = vmatpush.bf16.msrb.mxu1 %v5287_v51 }
 0x57c   :  { %3489 = vmatpush.bf16.msrb.mxu3 %v5415_v1  ;;  %v3573_v43 = vmul.f32 %v3572_v33, %v3553_v54  ;;  %v3562_v37 = vmul.f32 %v3561_v56, %v3553_v54 }
 0x57e   :  { %3951 = vmatpush.bf16.msra.mxu2 %v5992_v58  ;;  %v3574_v46 = vadd.f32 1.0, %v3573_v43  ;;  %v3563_v50 = vadd.f32 1.1283791, %v3562_v37  ;;  %v7116_v58 = vld [vmem:[%s7189_s10] sm:$0xf] }
 0x57f   :  { %3477 = vmatpush.bf16.msrb.mxu1 %v5271_v62  ;;  %v1795_v63 = vperm.slane %v7116_v58, 2 }
 0x580   :  { %3490 = vmatpush.bf16.msrb.mxu3 %v5399_v35  ;;  %6044 = vrcp.f32 %v3574_v46  ;;  %v3586_v42 = vand.u32 2147483648, %v3574_v46  ;;  %v3584_v51 = vand.u32 2147483647, %v3574_v46  ;;  %vm3580_vm6 = vweird.f32 %v3574_v46 }
 0x581   :  { %3952 = vmatmul.bf16.vlgmr.msra.gmra.mxu2 %v3680_v24  ;;  %v3564_v52 = vmul.f32 %v3563_v50, %v7073_v59  ;;  %v3299_v62 = vadd.f32 %v7081_v32, %v1795_v63 }
 0x582   :  { %v3587_v25 = vor.u32 1.1754944e-38, %v3586_v42  ;;  %vm3585_vm8 = vcmp.eq.f32.partialorder %v3584_v51, 8.507059e+37 }
 0x583   :  { %3478 = vmatpush.bf16.msrb.mxu1 %v5255_v13  ;;  %v3312_v38 = vadd.f32 %v7069_v30, %v3299_v62 }
 0x584   :  { %3491 = vmatpush.bf16.msrb.mxu3 %v5383_v14  ;;  %v3350_v36 = vpop.f32.mrf.mxu2  ;;  %v6013_v14 = vld [vmem:[%s7190_s11 + $0xa8] sm:$0xff] }
 0x586   :  { %3479 = vmatmul.bf16.vlgmr.msrb.gmra.mxu1 %v6935_v11  ;;  %v3324_v11 = vpop.f32.mrf.mxu1  ;;  %v6045_v41 = vpop.eup %6044 }
 0x587   :  { %3957 = vmatpush.bf16.msra.mxu1 %v6007_v20  ;;  %3492 = vmatmul.bf16.vlgmr.msrb.gmra.mxu3 %v6940_v15  ;;  %v6003_v15 = vld [vmem:[%s7190_s11 + $0x58] sm:$0xff]  ;;  %v3576_v27 = vmul.f32 %v6045_v41, %v3574_v46  ;;  %vm3581_vm5 = vweird.f32 %v6045_v41  ;;  %v3325_v5 = vadd.f32 %v3324_v11, %v3312_v38  ;;  %v6009_v11 = vld [vmem:[%s7190_s11 + $0x88] sm:$0xff] }
 0x588   :  { %vm3582_vm7 = vmor %vm3580_vm6, %vm3581_vm5  ;;  %3970 = vmatpush.bf16.msra.mxu3 %v6015_v8 }
 0x589   :  { %v3577_v48 = vsub.f32 1.0, %v3576_v27 }
 0x58a   :  { %v3337_v39 = vpop.f32.mrf.mxu3 }
 0x58b   :  { %3958 = vmatpush.bf16.msra.mxu1 %v6006_v22  ;;  %v3578_v45 = vmul.f32 %v6045_v41, %v3577_v48  ;;  %v3338_v3 = vadd.f32 %v3337_v39, %v3325_v5 }
 0x58c   :  { %v3352_v28 = vpop.f32.mrf.mxu2  ;;  %3971 = vmatpush.bf16.msra.mxu3 %v6014_v44 }
 0x58d   :  { %v3579_v1 = vadd.f32 %v6045_v41, %v3578_v45  ;;  %v3351_v24 = vadd.f32 %v3350_v36, %v3338_v3 }
 0x58e   :  { %v3326_v47 = vpop.f32.mrf.mxu1 }
 0x58f   :  { %3959 = vmatpush.bf16.msra.mxu1 %v6005_v31  ;;  %v3583_v54 = vsel %vm3582_vm7, %v6045_v41, %v3579_v1  ;;  %v6008_v41 = vld [vmem:[%s7190_s11 + $0x80] sm:$0xff] }
 0x590   :  { %v3588_v60 = vsel %vm3585_vm8, %v3587_v25, %v3583_v54  ;;  %3972 = vmatpush.bf16.msra.mxu3 %v6013_v14 }
 0x591   :  { %v3589_v40 = vmul.f32 %v3588_v60, %v3564_v52 }
 0x592   :  { %v3339_v55 = vpop.f32.mrf.mxu3 }
 0x593   :  { %3960 = vmatpush.bf16.msra.mxu1 %v6004_v29  ;;  %v5497_v57 = vclamps-f32 %v3589_v40, 1.0 }
 0x594   :  { %3973 = vmatpush.bf16.msra.mxu3 %v6012_v2 }
 0x595   :  { %v3673_v61 = vadd.f32 1.0, %v5497_v57 }
 0x597   :  { %3961 = vmatpush.bf16.msra.mxu1 %v6003_v15  ;;  %v3677_v59 = vmul.f32 %v3673_v61, %v3498_v10 }
 0x598   :  { %3974 = vmatpush.bf16.msra.mxu3 %v6011_v7  ;;  %v6022_v7 = vld [vmem:[%s7190_s11 + $0xf0] sm:$0xff] }
 0x599   :  { %v3681_v35 = vpack.c.bf16 %v3677_v59, %v3677_v59 }
 0x59b   :  { %3962 = vmatpush.bf16.msra.mxu1 %v6002_v16 }
 0x59c   :  { %3975 = vmatpush.bf16.msra.mxu3 %v6010_v49 }
 0x59f   :  { %3963 = vmatpush.bf16.msra.mxu1 %v6001_v18 }
 0x5a0   :  { %3976 = vmatpush.bf16.msra.mxu3 %v6009_v11 }
 0x5a3   :  { %3964 = vmatpush.bf16.msra.mxu1 %v6000_v34  ;;  %v3363_v4 = vpop.f32.mrf.mxu1 }
 0x5a4   :  { %v3389_v6 = vpop.f32.mrf.mxu2  ;;  %v3364_v32 = vadd.f32 %v3363_v4, %v3351_v24  ;;  %3977 = vmatpush.bf16.msra.mxu3 %v6008_v41 }
 0x5a6   :  { %3965 = vmatmul.bf16.vlgmr.msra.gmra.mxu1 %v3681_v35 }
 0x5aa   :  { %v3376_v9 = vpop.f32.mrf.mxu3 }
 0x5ab   :  { %v3377_v12 = vadd.f32 %v3376_v9, %v3364_v32  ;;  %v3365_v30 = vpop.f32.mrf.mxu1 }
 0x5ac   :  { %v3391_v13 = vpop.f32.mrf.mxu2 }
 0x5ad   :  { %v3390_v20 = vadd.f32 %v3389_v6, %v3377_v12  ;;  %v1796_v12 = vperm.slane %v7116_v58, 3 }
 0x5af   :  { %v3510_v53 = vmul.f32 %v6977_v23, %v3390_v20  ;;  %v3499_v3 = vmul.f32 0.5, %v3390_v20 }
 0x5b1   :  { %v3592_v21 = vmul.f32 %v3510_v53, %v3510_v53 }
 0x5b2   :  { %v3378_v17 = vpop.f32.mrf.mxu3 }
 0x5b3   :  { %v3593_v22 = vmin.f32 %v3592_v21, 16.0  ;;  %v6023_v21 = vld [vmem:[%s7190_s11 + $0xf8] sm:$0xff] }
 0x5b4   :  { %3983 = vmatpush.bf16.msrb.mxu2 %v6023_v21 }
 0x5b5   :  { %v3594_v19 = vmul.f32 2.1237322e-06, %v3593_v22  ;;  %v3605_v26 = vmul.f32 3.8918573e-05, %v3593_v22 }
 0x5b7   :  { %v3595_v31 = vadd.f32 0.00028619796, %v3594_v19  ;;  %v3606_v33 = vadd.f32 0.001143296, %v3605_v26 }
 0x5b8   :  { %3984 = vmatpush.bf16.msrb.mxu2 %v6022_v7 }
 0x5b9   :  { %v3596_v43 = vmul.f32 %v3595_v31, %v3593_v22  ;;  %v3607_v29 = vmul.f32 %v3606_v33, %v3593_v22  ;;  %v6021_v31 = vld [vmem:[%s7190_s11 + $0xe8] sm:$0xff] }
 0x5bb   :  { %v3608_v46 = vadd.f32 0.014752088, %v3607_v29  ;;  %v3597_v0 = vadd.f32 0.0036580483, %v3596_v43 }
 0x5bc   :  { %3985 = vmatpush.bf16.msrb.mxu2 %v6021_v31 }
 0x5bd   :  { %v3609_v36 = vmul.f32 %v3608_v46, %v3593_v22  ;;  %v3598_v56 = vmul.f32 %v3597_v0, %v3593_v22  ;;  %v6020_v46 = vld [vmem:[%s7190_s11 + $0xe0] sm:$0xff] }
 0x5bf   :  { %v3610_v15 = vadd.f32 0.112945676, %v3609_v36  ;;  %v3599_v47 = vadd.f32 0.05243302, %v3598_v56 }
 0x5c0   :  { %3986 = vmatpush.bf16.msrb.mxu2 %v6020_v46 }
 0x5c1   :  { %v3611_v37 = vmul.f32 %v3610_v15, %v3593_v22  ;;  %v3600_v42 = vmul.f32 %v3599_v47, %v3593_v22  ;;  %v6019_v15 = vld [vmem:[%s7190_s11 + $0xd8] sm:$0xff] }
 0x5c3   :  { %v3402_v16 = vpop.f32.mrf.mxu1  ;;  %v3612_v39 = vadd.f32 0.4994258, %v3611_v37  ;;  %v3601_v51 = vadd.f32 0.18741608, %v3600_v42 }
 0x5c4   :  { %v3428_v27 = vpop.f32.mrf.mxu2  ;;  %v3403_v13 = vadd.f32 %v3402_v16, %v1796_v12  ;;  %3987 = vmatpush.bf16.msrb.mxu2 %v6019_v15 }
 0x5c5   :  { %v3613_v48 = vmul.f32 %v3612_v39, %v3593_v22  ;;  %v3602_v25 = vmul.f32 %v3601_v51, %v3593_v22 }
 0x5c7   :  { %v3614_v28 = vadd.f32 1.0, %v3613_v48  ;;  %v3603_v60 = vadd.f32 1.1283791, %v3602_v25 }
 0x5c9   :  { %6046 = vrcp.f32 %v3614_v28  ;;  %v3626_v55 = vand.u32 2147483648, %v3614_v28  ;;  %v3624_v63 = vand.u32 2147483647, %v3614_v28  ;;  %vm3620_vm10 = vweird.f32 %v3614_v28 }
 0x5ca   :  { %v3415_v18 = vpop.f32.mrf.mxu3  ;;  %v3604_v61 = vmul.f32 %v3603_v60, %v3510_v53 }
 0x5cb   :  { %v3404_v50 = vpop.f32.mrf.mxu1  ;;  %v3627_v10 = vor.u32 1.1754944e-38, %v3626_v55  ;;  %vm3625_vm12 = vcmp.eq.f32.partialorder %v3624_v63, 8.507059e+37  ;;  %v3416_v14 = vadd.f32 %v3415_v18, %v3403_v13 }
 0x5cc   :  { %v3430_v45 = vpop.f32.mrf.mxu2 }
 0x5cd   :  { %v3429_v53 = vadd.f32 %v3428_v27, %v3416_v14  ;;  %v6016_v45 = vld [vmem:[%s7190_s11 + $0xc0] sm:$0xff] }
 0x5cf   :  { %v6047_v1 = vpop.eup %6046 }
 0x5d0   :  { %v3616_v52 = vmul.f32 %v6047_v1, %v3614_v28  ;;  %vm3621_vm9 = vweird.f32 %v6047_v1  ;;  %v6017_v28 = vld [vmem:[%s7190_s11 + $0xc8] sm:$0xff] }
 0x5d1   :  { %vm3622_vm11 = vmor %vm3620_vm10, %vm3621_vm9 }
 0x5d2   :  { %v3417_v34 = vpop.f32.mrf.mxu3  ;;  %v3617_v54 = vsub.f32 1.0, %v3616_v52 }
 0x5d3   :  { %v6033_v34 = vld [vmem:[%s7191_s12] ss:$0 sm:$0xff] }
 0x5d4   :  { %v3618_v40 = vmul.f32 %v6047_v1, %v3617_v54 }
 0x5d6   :  { %v3619_v57 = vadd.f32 %v6047_v1, %v3618_v40 }
 0x5d8   :  { %v3623_v62 = vsel %vm3622_vm11, %v6047_v1, %v3619_v57 }
 0x5d9   :  { %v3628_v59 = vsel %vm3625_vm12, %v3627_v10, %v3623_v62 }
 0x5da   :  { %v3629_v35 = vmul.f32 %v3628_v59, %v3604_v61 }
 0x5dc   :  { %v5498_v38 = vclamps-f32 %v3629_v35, 1.0 }
 0x5de   :  { %v3674_v4 = vadd.f32 1.0, %v5498_v38 }
 0x5e0   :  { %v3678_v8 = vmul.f32 %v3674_v4, %v3499_v3 }
 0x5e2   :  { %v3682_v24 = vpack.c.bf16 %v3678_v8, %v3678_v8 }
 0x5e3   :  { %v3441_v5 = vpop.f32.mrf.mxu1 }
 0x5e4   :  { %v3467_v6 = vpop.f32.mrf.mxu2  ;;  %3978 = vmatmul.bf16.vlgmr.msra.gmra.mxu3 %v3682_v24  ;;  %v3442_v2 = vadd.f32 %v3441_v5, %v3429_v53 }
 0x5ea   :  { %v3454_v44 = vpop.f32.mrf.mxu3 }
 0x5eb   :  { %v3443_v32 = vpop.f32.mrf.mxu1  ;;  %v3455_v20 = vadd.f32 %v3454_v44, %v3442_v2 }
 0x5ec   :  { %v3469_v9 = vpop.f32.mrf.mxu2 }
 0x5ed   :  { %v3468_v19 = vadd.f32 %v3467_v6, %v3455_v20 }
 0x5f2   :  { %v3456_v30 = vpop.f32.mrf.mxu3 }
 0x603   :  { %v3480_v17 = vpop.f32.mrf.mxu1 }
 0x604   :  { %v3953_v22 = vpop.f32.mrf.mxu2  ;;  %v3481_v58 = vadd.f32 %v3480_v17, %v3468_v19 }
 0x605   :  { %v3954_v55 = vadd.f32 %v6033_v34, %v3953_v22 }
 0x60a   :  { %v3493_v26 = vpop.f32.mrf.mxu3 }
 0x60b   :  { %v3494_v33 = vadd.f32 %v3493_v26, %v3481_v58  ;;  %v3482_v49 = vpop.f32.mrf.mxu1 }
 0x60c   :  { %v3955_v43 = vpop.f32.mrf.mxu2 }
 0x60d   :  { %v3511_v29 = vmul.f32 %v6977_v23, %v3494_v33  ;;  %v6018_v23 = vld [vmem:[%s7190_s11 + $0xd0] sm:$0xff]  ;;  %v3500_v30 = vmul.f32 0.5, %v3494_v33 }
 0x60e   :  { %3988 = vmatpush.bf16.msrb.mxu2 %v6018_v23 }
 0x60f   :  { %v3632_v0 = vmul.f32 %v3511_v29, %v3511_v29 }
 0x611   :  { %v3633_v11 = vmin.f32 %v3632_v0, 16.0 }
 0x612   :  { %v3495_v36 = vpop.f32.mrf.mxu3  ;;  %3989 = vmatpush.bf16.msrb.mxu2 %v6017_v28 }
 0x613   :  { %v3634_v56 = vmul.f32 2.1237322e-06, %v3633_v11  ;;  %v3645_v16 = vmul.f32 3.8918573e-05, %v3633_v11 }
 0x615   :  { %v3635_v41 = vadd.f32 0.00028619796, %v3634_v56  ;;  %v3646_v37 = vadd.f32 0.001143296, %v3645_v16 }
 0x616   :  { %3990 = vmatpush.bf16.msrb.mxu2 %v6016_v45 }
 0x617   :  { %v3636_v27 = vmul.f32 %v3635_v41, %v3633_v11  ;;  %v3647_v39 = vmul.f32 %v3646_v37, %v3633_v11 }
 0x619   :  { %v3648_v47 = vadd.f32 0.014752088, %v3647_v39  ;;  %v3637_v48 = vadd.f32 0.0036580483, %v3636_v27 }
 0x61b   :  { %v3649_v18 = vmul.f32 %v3648_v47, %v3633_v11  ;;  %v3638_v50 = vmul.f32 %v3637_v48, %v3633_v11 }
 0x61d   :  { %v3650_v42 = vadd.f32 0.112945676, %v3649_v18  ;;  %v3639_v25 = vadd.f32 0.05243302, %v3638_v50 }
 0x61f   :  { %v3651_v51 = vmul.f32 %v3650_v42, %v3633_v11  ;;  %v3640_v60 = vmul.f32 %v3639_v25, %v3633_v11 }
 0x621   :  { %v3652_v1 = vadd.f32 0.4994258, %v3651_v51  ;;  %v3641_v57 = vadd.f32 0.18741608, %v3640_v60 }
 0x623   :  { %v3653_v52 = vmul.f32 %v3652_v1, %v3633_v11  ;;  %v3966_v40 = vpop.f32.mrf.mxu1  ;;  %v3642_v61 = vmul.f32 %v3641_v57, %v3633_v11 }
 0x624   :  { %v3967_v63 = vadd.f32 %v3966_v40, %v3954_v55 }
 0x625   :  { %v3654_v54 = vadd.f32 1.0, %v3653_v52  ;;  %v3643_v5 = vadd.f32 1.1283791, %v3642_v61 }
 0x627   :  { %6048 = vrcp.f32 %v3654_v54  ;;  %v3666_v38 = vand.u32 2147483648, %v3654_v54  ;;  %v3664_v4 = vand.u32 2147483647, %v3654_v54  ;;  %vm3660_vm14 = vweird.f32 %v3654_v54 }
 0x628   :  { %v3644_v24 = vmul.f32 %v3643_v5, %v3511_v29 }
 0x629   :  { %v3667_v8 = vor.u32 1.1754944e-38, %v3666_v38  ;;  %vm3665_vm0 = vcmp.eq.f32.partialorder %v3664_v4, 8.507059e+37 }
 0x62b   :  { %v3968_v59 = vpop.f32.mrf.mxu1 }
 0x62d   :  { %v6049_v10 = vpop.eup %6048 }
 0x62e   :  { %v3656_v62 = vmul.f32 %v6049_v10, %v3654_v54  ;;  %vm3661_vm13 = vweird.f32 %v6049_v10 }
 0x62f   :  { %vm3662_vm15 = vmor %vm3660_vm14, %vm3661_vm13 }
 0x630   :  { %v3657_v35 = vsub.f32 1.0, %v3656_v62 }
 0x632   :  { %v3658_v3 = vmul.f32 %v6049_v10, %v3657_v35 }
 0x634   :  { %v3659_v6 = vadd.f32 %v6049_v10, %v3658_v3 }
 0x636   :  { %v3663_v44 = vsel %vm3662_vm15, %v6049_v10, %v3659_v6 }
 0x637   :  { %v3668_v32 = vsel %vm3665_vm0, %v3667_v8, %v3663_v44 }
 0x638   :  { %v3669_v9 = vmul.f32 %v3668_v32, %v3644_v24 }
 0x63a   :  { %v5499_v12 = vclamps-f32 %v3669_v9, 1.0 }
 0x63c   :  { %v3675_v13 = vadd.f32 1.0, %v5499_v12 }
 0x63e   :  { %v3679_v14 = vmul.f32 %v3675_v13, %v3500_v30 }
 0x640   :  { %v3683_v53 = vpack.c.bf16 %v3679_v14, %v3679_v14 }
 0x642   :  { %3991 = vmatmul.bf16.vlgmr.msrb.gmra.mxu2 %v3683_v53 }
 0x667   :  { %v3979_v2 = vpop.f32.mrf.mxu3 }
 0x668   :  { %v3980_v21 = vadd.f32 %v3979_v2, %v3967_v63 }
 0x66f   :  { %v3981_v20 = vpop.f32.mrf.mxu3 }
 0x6c5   :  { %v3992_v17 = vpop.f32.mrf.mxu2 }
 0x6c6   :  { %v3993_v22 = vadd.f32 %v3992_v17, %v3980_v21 }
 0x6c8   :  { %3996 = vst [vmem:[%s7193_s14] sm:$0xff] %v3993_v22 }
 0x6cd   :  { %v3994_v7 = vpop.f32.mrf.mxu2 }
 0x6ce   :  { %4005 = vsyncpa [#allocation3], 1 }

</bundles_post_ra>
